<compile_context>
chip_gen: v6e
topology: v6e:2x2x1
jax: 0.10.0
libtpu: 0.0.40
codegen_flags: <defaults>
</compile_context>

<pallas_src>
import math
import functools

import jax
import jax.numpy as jnp
from jax.experimental import pallas as pl
from jax.experimental.pallas import tpu as pltpu

EPS = 1e-5       # PyTorch LayerNorm default eps
OUT_LANES = 128  # lane-dense output slab width


def _layernorm(x, gamma, beta):
    mean = jnp.mean(x, axis=-1, keepdims=True)
    var = jnp.mean(jnp.square(x - mean), axis=-1, keepdims=True)
    return (x - mean) * jax.lax.rsqrt(var + EPS) * gamma + beta


# ----------------------------- fused Pallas kernel ---------------------------


def fused_forward_kernel(
        states_ref,
        # input prep
        sn_g, sn_b, w_in, b_in, in_g, in_b, pe,
        # encoder layers (stacked along leading "layer" axis)
        wqkv, bqkv, wo, bo, n1g, n1b, w1, b1, w2, b2, n2g, n2b,
        # value head
        vw1, vb1, vg1, vbt1, vw2, vb2, vg2, vbt2, vw3, vb3,
        # advantage head
        aw1, ab1, ag1, abt1, aw2, ab2, ag2, abt2, aw3, ab3,
        # output: lane-dense (B, OUT_LANES) slab
        out_ref,
        *, nhead, seq_len, num_layers, action_dim):
    D = w_in.shape[1]
    hd = D // nhead
    scale = 1.0 / math.sqrt(hd)
    BS = states_ref.shape[0]
    B = BS // seq_len

    # --- block-diagonal additive mask, generated in-kernel (no HBM input) ---
    row_ids = jax.lax.broadcasted_iota(jnp.int32, (BS, BS), 0)
    col_ids = jax.lax.broadcasted_iota(jnp.int32, (BS, BS), 1)
    same = None
    for b in range(B):                       # static, tiny B; pure VPU compares
        lo, hi = b * seq_len, (b + 1) * seq_len
        blk = ((row_ids >= lo) & (row_ids < hi)) & ((col_ids >= lo) & (col_ids < hi))
        same = blk if same is None else (same | blk)
    neg_mask = jnp.where(same, 0.0, -1e30).astype(jnp.float32)

    # --- input norm + projection + positional encoding (whole batch at once) ---
    x = states_ref[...]                                          # (B*S, state_dim)
    x = _layernorm(x, sn_g[...], sn_b[...])
    x = jnp.dot(x, w_in[...], preferred_element_type=jnp.float32) + b_in[...]
    x = _layernorm(x, in_g[...], in_b[...])
    # pe is (S, D): broadcast over batch in-kernel via a (B, S, D) view.
    x = (x.reshape(B, seq_len, D) + pe[...][None, :, :]).reshape(BS, D)

    # --- transformer encoder layers (post-norm, ReLU FFN), unrolled ---
    # TODO(synk): for large num_layers switch to lax.fori_loop with dynamic
    # first-axis indexing into the stacked weight refs to bound live ranges.
    for l in range(num_layers):
        # fused QKV: one (BS,D)@(D,3D) push, then static lane slices.
        qkv = jnp.dot(x, wqkv[l], preferred_element_type=jnp.float32) + bqkv[l]
        q = qkv[:, :D]
        k = qkv[:, D:2 * D]
        v = qkv[:, 2 * D:]

        heads = []
        for h in range(nhead):               # static head loop, batch handled by mask
            qh = q[:, h * hd:(h + 1) * hd]
            kh = k[:, h * hd:(h + 1) * hd]
            vh = v[:, h * hd:(h + 1) * hd]
            s = jax.lax.dot_general(qh, kh, (((1,), (1,)), ((), ())),
                                    preferred_element_type=jnp.float32)
            s = s * scale + neg_mask
            s = s - jnp.max(s, axis=-1, keepdims=True)
            p = jnp.exp(s)
            denom = jnp.sum(p, axis=-1, keepdims=True)
            r = pl.reciprocal(denom, approx=True)      # EUP estimate
            r = r * (2.0 - denom * r)                  # one Newton step -> fp32 accuracy
            p = p * r
            heads.append(jnp.dot(p, vh, preferred_element_type=jnp.float32))  # (BS, hd)

        o = jnp.concatenate(heads, axis=-1)            # (BS, D) static lane concat
        attn = jnp.dot(o, wo[l], preferred_element_type=jnp.float32) + bo[l]

        # TODO(synk): dropout is identity here (inference semantics).
        x = _layernorm(x + attn, n1g[l], n1b[l])
        h1 = jnp.maximum(
            jnp.dot(x, w1[l], preferred_element_type=jnp.float32) + b1[l], 0.0)
        ff = jnp.dot(h1, w2[l], preferred_element_type=jnp.float32) + b2[l]
        x = _layernorm(x + ff, n2g[l], n2b[l])

    # --- last token per batch element: single reshape + static slice ---
    xl = x.reshape(B, seq_len, D)[:, seq_len - 1, :]   # (B, D)

    def mlp(h, w1_, b1_, g1_, bt1_, w2_, b2_, g2_, bt2_, w3_, b3_):
        h = jnp.dot(h, w1_[...], preferred_element_type=jnp.float32) + b1_[...]
        h = jnp.maximum(_layernorm(h, g1_[...], bt1_[...]), 0.0)
        h = jnp.dot(h, w2_[...], preferred_element_type=jnp.float32) + b2_[...]
        h = jnp.maximum(_layernorm(h, g2_[...], bt2_[...]), 0.0)
        return jnp.dot(h, w3_[...], preferred_element_type=jnp.float32) + b3_[...]

    value = mlp(xl, vw1, vb1, vg1, vbt1, vw2, vb2, vg2, vbt2, vw3, vb3)   # (B, 1)
    adv = mlp(xl, aw1, ab1, ag1, abt1, aw2, ab2, ag2, abt2, aw3, ab3)     # (B, A)
    q_out = value + adv - jnp.mean(adv, axis=1, keepdims=True)            # (B, A)

    # lane-dense output: q in lanes [0, A), value in lane A, zero pad to 128.
    pad = out_ref.shape[1] - action_dim - 1
    out_ref[...] = jnp.concatenate(
        [q_out, value, jnp.zeros((out_ref.shape[0], pad), jnp.float32)], axis=-1)


# ------------------------------ wrapper --------------------------------------


def mec_transformer_forward(states, params, *, nhead):
    if states.ndim == 2:
        states = states[None]
    B, S, sd = states.shape
    D = params["w_in"].shape[1]
    A = params["a_w3"].shape[1]
    layers = params["layers"]
    L = len(layers)
    BS = B * S

    states2 = states.reshape(BS, sd)

    def stack(key):
        return jnp.stack([lp[key] for lp in layers], axis=0)

    layer_args = tuple(stack(k) for k in (
        "wqkv", "bqkv", "wo", "bo", "n1_g", "n1_b",
        "w1", "b1", "w2", "b2", "n2_g", "n2_b"))
    prep_args = (params["sn_g"], params["sn_b"], params["w_in"], params["b_in"],
                 params["in_g"], params["in_b"], params["pe"])
    vhead = tuple(params[k] for k in ("v_w1", "v_b1", "v_g1", "v_bt1",
                                      "v_w2", "v_b2", "v_g2", "v_bt2",
                                      "v_w3", "v_b3"))
    ahead = tuple(params[k] for k in ("a_w1", "a_b1", "a_g1", "a_bt1",
                                      "a_w2", "a_b2", "a_g2", "a_bt2",
                                      "a_w3", "a_b3"))

    kernel = functools.partial(fused_forward_kernel, nhead=nhead, seq_len=S,
                               num_layers=L, action_dim=A)
    out = pl.pallas_call(
        kernel,
        out_shape=jax.ShapeDtypeStruct((B, OUT_LANES), jnp.float32),
        compiler_params=pltpu.CompilerParams(vmem_limit_bytes=32 * 1024 * 1024),
    )(states2, *prep_args, *layer_args, *vhead, *ahead)

    q_values = out[:, :A]
    value = out[:, A:A + 1]
    return q_values, value


# ------------------------- parameters / reference ----------------------------


def make_positional_encoding(seq_length, d_model):
    pos = jnp.arange(seq_length, dtype=jnp.float32)[:, None]
    div = jnp.exp(jnp.arange(0, d_model, 2, dtype=jnp.float32)
                  * (-math.log(10000.0) / d_model))
    pe = jnp.zeros((seq_length, d_model), jnp.float32)
    pe = pe.at[:, 0::2].set(jnp.sin(pos * div))
    pe = pe.at[:, 1::2].set(jnp.cos(pos * div))
    return pe


def init_params(key, state_dim, action_dim, seq_length, d_model, num_layers):
    keys = iter(jax.random.split(key, 64))

    def kaiming_t(out_dim, in_dim):
        # kaiming_normal_ (fan_in, gain=sqrt(2)); stored transposed (in, out)
        std = math.sqrt(2.0 / in_dim)
        w = jax.random.normal(next(keys), (out_dim, in_dim), jnp.float32) * std
        return w.T

    def ln(dim):
        g = jax.random.uniform(next(keys), (1, dim), jnp.float32, -0.1, 0.1)
        return g, jnp.zeros((1, dim), jnp.float32)

    p = {}
    p["sn_g"], p["sn_b"] = ln(state_dim)
    p["w_in"] = kaiming_t(d_model, state_dim)
    p["b_in"] = jnp.zeros((1, d_model), jnp.float32)
    p["in_g"], p["in_b"] = ln(d_model)
    p["pe"] = make_positional_encoding(seq_length, d_model)

    layers = []
    for _ in range(num_layers):
        lp = {}
        lp["wqkv"] = kaiming_t(3 * d_model, d_model)
        lp["bqkv"] = jnp.zeros((1, 3 * d_model), jnp.float32)
        lp["wo"] = kaiming_t(d_model, d_model)
        lp["bo"] = jnp.zeros((1, d_model), jnp.float32)
        lp["n1_g"], lp["n1_b"] = ln(d_model)
        lp["w1"] = kaiming_t(4 * d_model, d_model)
        lp["b1"] = jnp.zeros((1, 4 * d_model), jnp.float32)
        lp["w2"] = kaiming_t(d_model, 4 * d_model)
        lp["b2"] = jnp.zeros((1, d_model), jnp.float32)
        lp["n2_g"], lp["n2_b"] = ln(d_model)
        layers.append(lp)
    p["layers"] = layers

    dh = d_model // 2
    for pre, out in (("v", 1), ("a", action_dim)):
        p[f"{pre}_w1"] = kaiming_t(d_model, d_model)
        p[f"{pre}_b1"] = jnp.zeros((1, d_model), jnp.float32)
        p[f"{pre}_g1"], p[f"{pre}_bt1"] = ln(d_model)
        p[f"{pre}_w2"] = kaiming_t(dh, d_model)
        p[f"{pre}_b2"] = jnp.zeros((1, dh), jnp.float32)
        p[f"{pre}_g2"], p[f"{pre}_bt2"] = ln(dh)
        p[f"{pre}_w3"] = kaiming_t(out, dh)
        p[f"{pre}_b3"] = jnp.zeros((1, out), jnp.float32)
    return p


def reference_forward(states, params, *, nhead):
    """Pure-JAX reference mirroring the PyTorch forward (eval mode)."""
    if states.ndim == 2:
        states = states[None]
    x = _layernorm(states, params["sn_g"][0], params["sn_b"][0])
    x = x @ params["w_in"] + params["b_in"][0]
    x = _layernorm(x, params["in_g"][0], params["in_b"][0])
    x = x + params["pe"][None]
    B, S, D = x.shape
    hd = D // nhead
    for lp in params["layers"]:
        qkv = x @ lp["wqkv"] + lp["bqkv"][0]
        q, k, v = qkv[..., :D], qkv[..., D:2 * D], qkv[..., 2 * D:]
        q = q.reshape(B, S, nhead, hd).transpose(0, 2, 1, 3)
        k = k.reshape(B, S, nhead, hd).transpose(0, 2, 1, 3)
        v = v.reshape(B, S, nhead, hd).transpose(0, 2, 1, 3)
        s = jnp.einsum("bhqd,bhkd->bhqk", q, k) / math.sqrt(hd)
        p = jax.nn.softmax(s, axis=-1)
        o = jnp.einsum("bhqk,bhkd->bhqd", p, v).transpose(0, 2, 1, 3).reshape(B, S, D)
        o = o @ lp["wo"] + lp["bo"][0]
        x = _layernorm(x + o, lp["n1_g"][0], lp["n1_b"][0])
        ff = jnp.maximum(x @ lp["w1"] + lp["b1"][0], 0.0) @ lp["w2"] + lp["b2"][0]
        x = _layernorm(x + ff, lp["n2_g"][0], lp["n2_b"][0])
    xl = x[:, -1]

    def mlp(h, pre):
        h = h @ params[f"{pre}_w1"] + params[f"{pre}_b1"][0]
        h = jnp.maximum(_layernorm(h, params[f"{pre}_g1"][0], params[f"{pre}_bt1"][0]), 0.0)
        h = h @ params[f"{pre}_w2"] + params[f"{pre}_b2"][0]
        h = jnp.maximum(_layernorm(h, params[f"{pre}_g2"][0], params[f"{pre}_bt2"][0]), 0.0)
        return h @ params[f"{pre}_w3"] + params[f"{pre}_b3"][0]

    value = mlp(xl, "v")
    adv = mlp(xl, "a")
    q_values = value + adv - adv.mean(axis=1, keepdims=True)
    return q_values, value


if __name__ == "__main__":
    STATE_DIM, ACTION_DIM = 12, 6
    SEQ, D_MODEL, NHEAD, NUM_LAYERS = 8, 32, 4, 2
    B = 2

    key = jax.random.PRNGKey(0)
    pkey, skey = jax.random.split(key)
    params = init_params(pkey, STATE_DIM, ACTION_DIM, SEQ, D_MODEL, NUM_LAYERS)
    states = jax.random.normal(skey, (B, SEQ, STATE_DIM), jnp.float32)

    q_values, value = mec_transformer_forward(states, params, nhead=NHEAD)
    jax.block_until_ready((q_values, value))

    q_ref, v_ref = reference_forward(states, params, nhead=NHEAD)
    assert q_values.shape == (B, ACTION_DIM) and value.shape == (B, 1)
    # Softmax uses approx reciprocal + one Newton step (fp32-accurate); all
    # other math is fp32, so 1e-3 is a comfortable margin over MXU rounding.
    assert jnp.allclose(q_values, q_ref, atol=1e-3, rtol=1e-3)
    assert jnp.allclose(value, v_ref, atol=1e-3, rtol=1e-3)
    print("KERNEL_OK")
</pallas_src>

<mosaic_0001>
module attributes {stable_mosaic.version = 11 : i64} {
  func.func @fused_forward_kernel(%arg0: memref<16x12xf32, #tpu.memory_space<vmem>>, %arg1: memref<1x12xf32, #tpu.memory_space<vmem>>, %arg2: memref<1x12xf32, #tpu.memory_space<vmem>>, %arg3: memref<12x32xf32, #tpu.memory_space<vmem>>, %arg4: memref<1x32xf32, #tpu.memory_space<vmem>>, %arg5: memref<1x32xf32, #tpu.memory_space<vmem>>, %arg6: memref<1x32xf32, #tpu.memory_space<vmem>>, %arg7: memref<8x32xf32, #tpu.memory_space<vmem>>, %arg8: memref<2x32x96xf32, #tpu.memory_space<vmem>>, %arg9: memref<2x1x96xf32, #tpu.memory_space<vmem>>, %arg10: memref<2x32x32xf32, #tpu.memory_space<vmem>>, %arg11: memref<2x1x32xf32, #tpu.memory_space<vmem>>, %arg12: memref<2x1x32xf32, #tpu.memory_space<vmem>>, %arg13: memref<2x1x32xf32, #tpu.memory_space<vmem>>, %arg14: memref<2x32x128xf32, #tpu.memory_space<vmem>>, %arg15: memref<2x1x128xf32, #tpu.memory_space<vmem>>, %arg16: memref<2x128x32xf32, #tpu.memory_space<vmem>>, %arg17: memref<2x1x32xf32, #tpu.memory_space<vmem>>, %arg18: memref<2x1x32xf32, #tpu.memory_space<vmem>>, %arg19: memref<2x1x32xf32, #tpu.memory_space<vmem>>, %arg20: memref<32x32xf32, #tpu.memory_space<vmem>>, %arg21: memref<1x32xf32, #tpu.memory_space<vmem>>, %arg22: memref<1x32xf32, #tpu.memory_space<vmem>>, %arg23: memref<1x32xf32, #tpu.memory_space<vmem>>, %arg24: memref<32x16xf32, #tpu.memory_space<vmem>>, %arg25: memref<1x16xf32, #tpu.memory_space<vmem>>, %arg26: memref<1x16xf32, #tpu.memory_space<vmem>>, %arg27: memref<1x16xf32, #tpu.memory_space<vmem>>, %arg28: memref<16x1xf32, #tpu.memory_space<vmem>>, %arg29: memref<1x1xf32, #tpu.memory_space<vmem>>, %arg30: memref<32x32xf32, #tpu.memory_space<vmem>>, %arg31: memref<1x32xf32, #tpu.memory_space<vmem>>, %arg32: memref<1x32xf32, #tpu.memory_space<vmem>>, %arg33: memref<1x32xf32, #tpu.memory_space<vmem>>, %arg34: memref<32x16xf32, #tpu.memory_space<vmem>>, %arg35: memref<1x16xf32, #tpu.memory_space<vmem>>, %arg36: memref<1x16xf32, #tpu.memory_space<vmem>>, %arg37: memref<1x16xf32, #tpu.memory_space<vmem>>, %arg38: memref<16x6xf32, #tpu.memory_space<vmem>>, %arg39: memref<1x6xf32, #tpu.memory_space<vmem>>, %arg40: memref<2x128xf32, #tpu.memory_space<vmem>>) attributes {dimension_semantics = [], scalar_prefetch = 0 : i64, scratch_operands = 0 : i64, tpu.core_type = #tpu.core_type<tc>} {
    %0 = tpu.iota {dimensions = array<i32: 0>} : vector<16x16xi32>
    %1 = tpu.iota {dimensions = array<i32: 1>} : vector<16x16xi32>
    %c0_i32 = arith.constant 0 : i32
    %2 = vector.broadcast %c0_i32 : i32 to vector<16x16xi32>
    %3 = arith.cmpi sge, %0, %2 : vector<16x16xi32>
    %c8_i32 = arith.constant 8 : i32
    %4 = vector.broadcast %c8_i32 : i32 to vector<16x16xi32>
    %5 = arith.cmpi slt, %0, %4 : vector<16x16xi32>
    %6 = arith.andi %3, %5 : vector<16x16xi1>
    %c0_i32_0 = arith.constant 0 : i32
    %7 = vector.broadcast %c0_i32_0 : i32 to vector<16x16xi32>
    %8 = arith.cmpi sge, %1, %7 : vector<16x16xi32>
    %c8_i32_1 = arith.constant 8 : i32
    %9 = vector.broadcast %c8_i32_1 : i32 to vector<16x16xi32>
    %10 = arith.cmpi slt, %1, %9 : vector<16x16xi32>
    %11 = arith.andi %8, %10 : vector<16x16xi1>
    %12 = arith.andi %6, %11 : vector<16x16xi1>
    %c8_i32_2 = arith.constant 8 : i32
    %13 = vector.broadcast %c8_i32_2 : i32 to vector<16x16xi32>
    %14 = arith.cmpi sge, %0, %13 : vector<16x16xi32>
    %c16_i32 = arith.constant 16 : i32
    %15 = vector.broadcast %c16_i32 : i32 to vector<16x16xi32>
    %16 = arith.cmpi slt, %0, %15 : vector<16x16xi32>
    %17 = arith.andi %14, %16 : vector<16x16xi1>
    %c8_i32_3 = arith.constant 8 : i32
    %18 = vector.broadcast %c8_i32_3 : i32 to vector<16x16xi32>
    %19 = arith.cmpi sge, %1, %18 : vector<16x16xi32>
    %c16_i32_4 = arith.constant 16 : i32
    %20 = vector.broadcast %c16_i32_4 : i32 to vector<16x16xi32>
    %21 = arith.cmpi slt, %1, %20 : vector<16x16xi32>
    %22 = arith.andi %19, %21 : vector<16x16xi1>
    %23 = arith.andi %17, %22 : vector<16x16xi1>
    %24 = arith.ori %12, %23 : vector<16x16xi1>
    %cst = arith.constant 0.000000e+00 : f32
    %cst_5 = arith.constant -1.000000e+30 : f32
    %25 = vector.broadcast %cst : f32 to vector<16x16xf32>
    %26 = vector.broadcast %cst_5 : f32 to vector<16x16xf32>
    %27 = arith.select %24, %25, %26 : vector<16x16xi1>, vector<16x16xf32>
    %c0 = arith.constant 0 : index
    %c0_6 = arith.constant 0 : index
    %28 = vector.load %arg0[%c0, %c0_6] : memref<16x12xf32, #tpu.memory_space<vmem>>, vector<16x12xf32>
    %c0_7 = arith.constant 0 : index
    %c0_8 = arith.constant 0 : index
    %29 = vector.load %arg1[%c0_7, %c0_8] : memref<1x12xf32, #tpu.memory_space<vmem>>, vector<1x12xf32>
    %c0_9 = arith.constant 0 : index
    %c0_10 = arith.constant 0 : index
    %30 = vector.load %arg2[%c0_9, %c0_10] : memref<1x12xf32, #tpu.memory_space<vmem>>, vector<1x12xf32>
    %cst_11 = arith.constant dense<0.000000e+00> : vector<16xf32>
    %31 = vector.multi_reduction <add>, %28, %cst_11 [1] : vector<16x12xf32> to vector<16xf32>
    %32 = vector.shape_cast %31 : vector<16xf32> to vector<16x1xf32>
    %cst_12 = arith.constant 1.200000e+01 : f32
    %33 = vector.broadcast %cst_12 : f32 to vector<16x1xf32>
    %34 = arith.divf %32, %33 : vector<16x1xf32>
    %35 = vector.broadcast %34 : vector<16x1xf32> to vector<16x12xf32>
    %36 = arith.subf %28, %35 : vector<16x12xf32>
    %37 = arith.mulf %36, %36 : vector<16x12xf32>
    %cst_13 = arith.constant dense<0.000000e+00> : vector<16xf32>
    %38 = vector.multi_reduction <add>, %37, %cst_13 [1] : vector<16x12xf32> to vector<16xf32>
    %39 = vector.shape_cast %38 : vector<16xf32> to vector<16x1xf32>
    %cst_14 = arith.constant 1.200000e+01 : f32
    %40 = vector.broadcast %cst_14 : f32 to vector<16x1xf32>
    %41 = arith.divf %39, %40 : vector<16x1xf32>
    %42 = vector.broadcast %34 : vector<16x1xf32> to vector<16x12xf32>
    %43 = arith.subf %28, %42 : vector<16x12xf32>
    %cst_15 = arith.constant 9.99999974E-6 : f32
    %44 = vector.broadcast %cst_15 : f32 to vector<16x1xf32>
    %45 = arith.addf %41, %44 : vector<16x1xf32>
    %46 = math.rsqrt %45 : vector<16x1xf32>
    %47 = vector.broadcast %46 : vector<16x1xf32> to vector<16x12xf32>
    %48 = arith.mulf %43, %47 : vector<16x12xf32>
    %49 = vector.broadcast %29 : vector<1x12xf32> to vector<16x12xf32>
    %50 = arith.mulf %48, %49 : vector<16x12xf32>
    %51 = vector.broadcast %30 : vector<1x12xf32> to vector<16x12xf32>
    %52 = arith.addf %50, %51 : vector<16x12xf32>
    %c0_16 = arith.constant 0 : index
    %c0_17 = arith.constant 0 : index
    %53 = vector.load %arg3[%c0_16, %c0_17] : memref<12x32xf32, #tpu.memory_space<vmem>>, vector<12x32xf32>
    %cst_18 = arith.constant dense<0.000000e+00> : vector<16x32xf32>
    %54 = tpu.matmul %52, %53, %cst_18 {dimension_numbers = #tpu.dot_dimension_numbers<[1], [0], [0], [1], [0, 0, 1, 1], [], []>} : vector<16x12xf32>, vector<12x32xf32>, vector<16x32xf32> -> vector<16x32xf32>
    %c0_19 = arith.constant 0 : index
    %c0_20 = arith.constant 0 : index
    %55 = vector.load %arg4[%c0_19, %c0_20] : memref<1x32xf32, #tpu.memory_space<vmem>>, vector<1x32xf32>
    %56 = vector.broadcast %55 : vector<1x32xf32> to vector<16x32xf32>
    %57 = arith.addf %54, %56 : vector<16x32xf32>
    %c0_21 = arith.constant 0 : index
    %c0_22 = arith.constant 0 : index
    %58 = vector.load %arg5[%c0_21, %c0_22] : memref<1x32xf32, #tpu.memory_space<vmem>>, vector<1x32xf32>
    %c0_23 = arith.constant 0 : index
    %c0_24 = arith.constant 0 : index
    %59 = vector.load %arg6[%c0_23, %c0_24] : memref<1x32xf32, #tpu.memory_space<vmem>>, vector<1x32xf32>
    %cst_25 = arith.constant dense<0.000000e+00> : vector<16xf32>
    %60 = vector.multi_reduction <add>, %57, %cst_25 [1] : vector<16x32xf32> to vector<16xf32>
    %61 = vector.shape_cast %60 : vector<16xf32> to vector<16x1xf32>
    %cst_26 = arith.constant 3.200000e+01 : f32
    %62 = vector.broadcast %cst_26 : f32 to vector<16x1xf32>
    %63 = arith.divf %61, %62 : vector<16x1xf32>
    %64 = vector.broadcast %63 : vector<16x1xf32> to vector<16x32xf32>
    %65 = arith.subf %57, %64 : vector<16x32xf32>
    %66 = arith.mulf %65, %65 : vector<16x32xf32>
    %cst_27 = arith.constant dense<0.000000e+00> : vector<16xf32>
    %67 = vector.multi_reduction <add>, %66, %cst_27 [1] : vector<16x32xf32> to vector<16xf32>
    %68 = vector.shape_cast %67 : vector<16xf32> to vector<16x1xf32>
    %cst_28 = arith.constant 3.200000e+01 : f32
    %69 = vector.broadcast %cst_28 : f32 to vector<16x1xf32>
    %70 = arith.divf %68, %69 : vector<16x1xf32>
    %71 = vector.broadcast %63 : vector<16x1xf32> to vector<16x32xf32>
    %72 = arith.subf %57, %71 : vector<16x32xf32>
    %cst_29 = arith.constant 9.99999974E-6 : f32
    %73 = vector.broadcast %cst_29 : f32 to vector<16x1xf32>
    %74 = arith.addf %70, %73 : vector<16x1xf32>
    %75 = math.rsqrt %74 : vector<16x1xf32>
    %76 = vector.broadcast %75 : vector<16x1xf32> to vector<16x32xf32>
    %77 = arith.mulf %72, %76 : vector<16x32xf32>
    %78 = vector.broadcast %58 : vector<1x32xf32> to vector<16x32xf32>
    %79 = arith.mulf %77, %78 : vector<16x32xf32>
    %80 = vector.broadcast %59 : vector<1x32xf32> to vector<16x32xf32>
    %81 = arith.addf %79, %80 : vector<16x32xf32>
    %82 = vector.shape_cast %81 : vector<16x32xf32> to vector<2x8x32xf32>
    %c0_30 = arith.constant 0 : index
    %c0_31 = arith.constant 0 : index
    %83 = vector.load %arg7[%c0_30, %c0_31] : memref<8x32xf32, #tpu.memory_space<vmem>>, vector<8x32xf32>
    %84 = vector.shape_cast %83 : vector<8x32xf32> to vector<1x8x32xf32>
    %85 = vector.broadcast %84 : vector<1x8x32xf32> to vector<2x8x32xf32>
    %86 = arith.addf %82, %85 : vector<2x8x32xf32>
    %87 = vector.shape_cast %86 : vector<2x8x32xf32> to vector<16x32xf32>
    %c0_32 = arith.constant 0 : index
    %c0_33 = arith.constant 0 : index
    %c0_34 = arith.constant 0 : index
    %88 = vector.load %arg8[%c0_32, %c0_33, %c0_34] : memref<2x32x96xf32, #tpu.memory_space<vmem>>, vector<1x32x96xf32>
    %89 = vector.shape_cast %88 : vector<1x32x96xf32> to vector<32x96xf32>
    %cst_35 = arith.constant dense<0.000000e+00> : vector<16x96xf32>
    %90 = tpu.matmul %87, %89, %cst_35 {dimension_numbers = #tpu.dot_dimension_numbers<[1], [0], [0], [1], [0, 0, 1, 1], [], []>} : vector<16x32xf32>, vector<32x96xf32>, vector<16x96xf32> -> vector<16x96xf32>
    %c0_36 = arith.constant 0 : index
    %c0_37 = arith.constant 0 : index
    %c0_38 = arith.constant 0 : index
    %91 = vector.load %arg9[%c0_36, %c0_37, %c0_38] : memref<2x1x96xf32, #tpu.memory_space<vmem>>, vector<1x1x96xf32>
    %92 = vector.shape_cast %91 : vector<1x1x96xf32> to vector<1x96xf32>
    %93 = vector.broadcast %92 : vector<1x96xf32> to vector<16x96xf32>
    %94 = arith.addf %90, %93 : vector<16x96xf32>
    %95 = vector.extract_strided_slice %94 {offsets = [0, 0], sizes = [16, 32], strides = [1, 1]} : vector<16x96xf32> to vector<16x32xf32>
    %96 = vector.extract_strided_slice %94 {offsets = [0, 32], sizes = [16, 32], strides = [1, 1]} : vector<16x96xf32> to vector<16x32xf32>
    %97 = vector.extract_strided_slice %94 {offsets = [0, 64], sizes = [16, 32], strides = [1, 1]} : vector<16x96xf32> to vector<16x32xf32>
    %98 = vector.extract_strided_slice %95 {offsets = [0, 0], sizes = [16, 8], strides = [1, 1]} : vector<16x32xf32> to vector<16x8xf32>
    %99 = vector.extract_strided_slice %96 {offsets = [0, 0], sizes = [16, 8], strides = [1, 1]} : vector<16x32xf32> to vector<16x8xf32>
    %100 = vector.extract_strided_slice %97 {offsets = [0, 0], sizes = [16, 8], strides = [1, 1]} : vector<16x32xf32> to vector<16x8xf32>
    %cst_39 = arith.constant dense<0.000000e+00> : vector<16x16xf32>
    %101 = tpu.matmul %98, %99, %cst_39 {dimension_numbers = #tpu.dot_dimension_numbers<[1], [1], [0], [0], [0, 0, 1, 0], [], []>} : vector<16x8xf32>, vector<16x8xf32>, vector<16x16xf32> -> vector<16x16xf32>
    %cst_40 = arith.constant 0.353553385 : f32
    %102 = vector.broadcast %cst_40 : f32 to vector<16x16xf32>
    %103 = arith.mulf %101, %102 : vector<16x16xf32>
    %104 = arith.addf %103, %27 : vector<16x16xf32>
    %cst_41 = arith.constant dense<0xFF800000> : vector<16xf32>
    %105 = vector.multi_reduction <maximumf>, %104, %cst_41 [1] : vector<16x16xf32> to vector<16xf32>
    %106 = vector.shape_cast %105 : vector<16xf32> to vector<16x1xf32>
    %107 = vector.broadcast %106 : vector<16x1xf32> to vector<16x16xf32>
    %108 = arith.subf %104, %107 : vector<16x16xf32>
    %109 = math.exp %108 : vector<16x16xf32>
    %cst_42 = arith.constant dense<0.000000e+00> : vector<16xf32>
    %110 = vector.multi_reduction <add>, %109, %cst_42 [1] : vector<16x16xf32> to vector<16xf32>
    %111 = vector.shape_cast %110 : vector<16xf32> to vector<16x1xf32>
    %112 = tpu.reciprocal %111 {approx = true} : vector<16x1xf32> -> vector<16x1xf32>
    %113 = arith.mulf %111, %112 : vector<16x1xf32>
    %cst_43 = arith.constant 2.000000e+00 : f32
    %114 = vector.broadcast %cst_43 : f32 to vector<16x1xf32>
    %115 = arith.subf %114, %113 : vector<16x1xf32>
    %116 = arith.mulf %112, %115 : vector<16x1xf32>
    %117 = vector.broadcast %116 : vector<16x1xf32> to vector<16x16xf32>
    %118 = arith.mulf %109, %117 : vector<16x16xf32>
    %cst_44 = arith.constant dense<0.000000e+00> : vector<16x8xf32>
    %119 = tpu.matmul %118, %100, %cst_44 {dimension_numbers = #tpu.dot_dimension_numbers<[1], [0], [0], [1], [0, 0, 1, 1], [], []>} : vector<16x16xf32>, vector<16x8xf32>, vector<16x8xf32> -> vector<16x8xf32>
    %120 = vector.extract_strided_slice %95 {offsets = [0, 8], sizes = [16, 8], strides = [1, 1]} : vector<16x32xf32> to vector<16x8xf32>
    %121 = vector.extract_strided_slice %96 {offsets = [0, 8], sizes = [16, 8], strides = [1, 1]} : vector<16x32xf32> to vector<16x8xf32>
    %122 = vector.extract_strided_slice %97 {offsets = [0, 8], sizes = [16, 8], strides = [1, 1]} : vector<16x32xf32> to vector<16x8xf32>
    %cst_45 = arith.constant dense<0.000000e+00> : vector<16x16xf32>
    %123 = tpu.matmul %120, %121, %cst_45 {dimension_numbers = #tpu.dot_dimension_numbers<[1], [1], [0], [0], [0, 0, 1, 0], [], []>} : vector<16x8xf32>, vector<16x8xf32>, vector<16x16xf32> -> vector<16x16xf32>
    %cst_46 = arith.constant 0.353553385 : f32
    %124 = vector.broadcast %cst_46 : f32 to vector<16x16xf32>
    %125 = arith.mulf %123, %124 : vector<16x16xf32>
    %126 = arith.addf %125, %27 : vector<16x16xf32>
    %cst_47 = arith.constant dense<0xFF800000> : vector<16xf32>
    %127 = vector.multi_reduction <maximumf>, %126, %cst_47 [1] : vector<16x16xf32> to vector<16xf32>
    %128 = vector.shape_cast %127 : vector<16xf32> to vector<16x1xf32>
    %129 = vector.broadcast %128 : vector<16x1xf32> to vector<16x16xf32>
    %130 = arith.subf %126, %129 : vector<16x16xf32>
    %131 = math.exp %130 : vector<16x16xf32>
    %cst_48 = arith.constant dense<0.000000e+00> : vector<16xf32>
    %132 = vector.multi_reduction <add>, %131, %cst_48 [1] : vector<16x16xf32> to vector<16xf32>
    %133 = vector.shape_cast %132 : vector<16xf32> to vector<16x1xf32>
    %134 = tpu.reciprocal %133 {approx = true} : vector<16x1xf32> -> vector<16x1xf32>
    %135 = arith.mulf %133, %134 : vector<16x1xf32>
    %cst_49 = arith.constant 2.000000e+00 : f32
    %136 = vector.broadcast %cst_49 : f32 to vector<16x1xf32>
    %137 = arith.subf %136, %135 : vector<16x1xf32>
    %138 = arith.mulf %134, %137 : vector<16x1xf32>
    %139 = vector.broadcast %138 : vector<16x1xf32> to vector<16x16xf32>
    %140 = arith.mulf %131, %139 : vector<16x16xf32>
    %cst_50 = arith.constant dense<0.000000e+00> : vector<16x8xf32>
    %141 = tpu.matmul %140, %122, %cst_50 {dimension_numbers = #tpu.dot_dimension_numbers<[1], [0], [0], [1], [0, 0, 1, 1], [], []>} : vector<16x16xf32>, vector<16x8xf32>, vector<16x8xf32> -> vector<16x8xf32>
    %142 = vector.extract_strided_slice %95 {offsets = [0, 16], sizes = [16, 8], strides = [1, 1]} : vector<16x32xf32> to vector<16x8xf32>
    %143 = vector.extract_strided_slice %96 {offsets = [0, 16], sizes = [16, 8], strides = [1, 1]} : vector<16x32xf32> to vector<16x8xf32>
    %144 = vector.extract_strided_slice %97 {offsets = [0, 16], sizes = [16, 8], strides = [1, 1]} : vector<16x32xf32> to vector<16x8xf32>
    %cst_51 = arith.constant dense<0.000000e+00> : vector<16x16xf32>
    %145 = tpu.matmul %142, %143, %cst_51 {dimension_numbers = #tpu.dot_dimension_numbers<[1], [1], [0], [0], [0, 0, 1, 0], [], []>} : vector<16x8xf32>, vector<16x8xf32>, vector<16x16xf32> -> vector<16x16xf32>
    %cst_52 = arith.constant 0.353553385 : f32
    %146 = vector.broadcast %cst_52 : f32 to vector<16x16xf32>
    %147 = arith.mulf %145, %146 : vector<16x16xf32>
    %148 = arith.addf %147, %27 : vector<16x16xf32>
    %cst_53 = arith.constant dense<0xFF800000> : vector<16xf32>
    %149 = vector.multi_reduction <maximumf>, %148, %cst_53 [1] : vector<16x16xf32> to vector<16xf32>
    %150 = vector.shape_cast %149 : vector<16xf32> to vector<16x1xf32>
    %151 = vector.broadcast %150 : vector<16x1xf32> to vector<16x16xf32>
    %152 = arith.subf %148, %151 : vector<16x16xf32>
    %153 = math.exp %152 : vector<16x16xf32>
    %cst_54 = arith.constant dense<0.000000e+00> : vector<16xf32>
    %154 = vector.multi_reduction <add>, %153, %cst_54 [1] : vector<16x16xf32> to vector<16xf32>
    %155 = vector.shape_cast %154 : vector<16xf32> to vector<16x1xf32>
    %156 = tpu.reciprocal %155 {approx = true} : vector<16x1xf32> -> vector<16x1xf32>
    %157 = arith.mulf %155, %156 : vector<16x1xf32>
    %cst_55 = arith.constant 2.000000e+00 : f32
    %158 = vector.broadcast %cst_55 : f32 to vector<16x1xf32>
    %159 = arith.subf %158, %157 : vector<16x1xf32>
    %160 = arith.mulf %156, %159 : vector<16x1xf32>
    %161 = vector.broadcast %160 : vector<16x1xf32> to vector<16x16xf32>
    %162 = arith.mulf %153, %161 : vector<16x16xf32>
    %cst_56 = arith.constant dense<0.000000e+00> : vector<16x8xf32>
    %163 = tpu.matmul %162, %144, %cst_56 {dimension_numbers = #tpu.dot_dimension_numbers<[1], [0], [0], [1], [0, 0, 1, 1], [], []>} : vector<16x16xf32>, vector<16x8xf32>, vector<16x8xf32> -> vector<16x8xf32>
    %164 = vector.extract_strided_slice %95 {offsets = [0, 24], sizes = [16, 8], strides = [1, 1]} : vector<16x32xf32> to vector<16x8xf32>
    %165 = vector.extract_strided_slice %96 {offsets = [0, 24], sizes = [16, 8], strides = [1, 1]} : vector<16x32xf32> to vector<16x8xf32>
    %166 = vector.extract_strided_slice %97 {offsets = [0, 24], sizes = [16, 8], strides = [1, 1]} : vector<16x32xf32> to vector<16x8xf32>
    %cst_57 = arith.constant dense<0.000000e+00> : vector<16x16xf32>
    %167 = tpu.matmul %164, %165, %cst_57 {dimension_numbers = #tpu.dot_dimension_numbers<[1], [1], [0], [0], [0, 0, 1, 0], [], []>} : vector<16x8xf32>, vector<16x8xf32>, vector<16x16xf32> -> vector<16x16xf32>
    %cst_58 = arith.constant 0.353553385 : f32
    %168 = vector.broadcast %cst_58 : f32 to vector<16x16xf32>
    %169 = arith.mulf %167, %168 : vector<16x16xf32>
    %170 = arith.addf %169, %27 : vector<16x16xf32>
    %cst_59 = arith.constant dense<0xFF800000> : vector<16xf32>
    %171 = vector.multi_reduction <maximumf>, %170, %cst_59 [1] : vector<16x16xf32> to vector<16xf32>
    %172 = vector.shape_cast %171 : vector<16xf32> to vector<16x1xf32>
    %173 = vector.broadcast %172 : vector<16x1xf32> to vector<16x16xf32>
    %174 = arith.subf %170, %173 : vector<16x16xf32>
    %175 = math.exp %174 : vector<16x16xf32>
    %cst_60 = arith.constant dense<0.000000e+00> : vector<16xf32>
    %176 = vector.multi_reduction <add>, %175, %cst_60 [1] : vector<16x16xf32> to vector<16xf32>
    %177 = vector.shape_cast %176 : vector<16xf32> to vector<16x1xf32>
    %178 = tpu.reciprocal %177 {approx = true} : vector<16x1xf32> -> vector<16x1xf32>
    %179 = arith.mulf %177, %178 : vector<16x1xf32>
    %cst_61 = arith.constant 2.000000e+00 : f32
    %180 = vector.broadcast %cst_61 : f32 to vector<16x1xf32>
    %181 = arith.subf %180, %179 : vector<16x1xf32>
    %182 = arith.mulf %178, %181 : vector<16x1xf32>
    %183 = vector.broadcast %182 : vector<16x1xf32> to vector<16x16xf32>
    %184 = arith.mulf %175, %183 : vector<16x16xf32>
    %cst_62 = arith.constant dense<0.000000e+00> : vector<16x8xf32>
    %185 = tpu.matmul %184, %166, %cst_62 {dimension_numbers = #tpu.dot_dimension_numbers<[1], [0], [0], [1], [0, 0, 1, 1], [], []>} : vector<16x16xf32>, vector<16x8xf32>, vector<16x8xf32> -> vector<16x8xf32>
    %186 = tpu.concatenate %119, %141, %163, %185 in 1 : vector<16x8xf32>, vector<16x8xf32>, vector<16x8xf32>, vector<16x8xf32> -> vector<16x32xf32>
    %c0_63 = arith.constant 0 : index
    %c0_64 = arith.constant 0 : index
    %c0_65 = arith.constant 0 : index
    %187 = vector.load %arg10[%c0_63, %c0_64, %c0_65] : memref<2x32x32xf32, #tpu.memory_space<vmem>>, vector<1x32x32xf32>
    %188 = vector.shape_cast %187 : vector<1x32x32xf32> to vector<32x32xf32>
    %cst_66 = arith.constant dense<0.000000e+00> : vector<16x32xf32>
    %189 = tpu.matmul %186, %188, %cst_66 {dimension_numbers = #tpu.dot_dimension_numbers<[1], [0], [0], [1], [0, 0, 1, 1], [], []>} : vector<16x32xf32>, vector<32x32xf32>, vector<16x32xf32> -> vector<16x32xf32>
    %c0_67 = arith.constant 0 : index
    %c0_68 = arith.constant 0 : index
    %c0_69 = arith.constant 0 : index
    %190 = vector.load %arg11[%c0_67, %c0_68, %c0_69] : memref<2x1x32xf32, #tpu.memory_space<vmem>>, vector<1x1x32xf32>
    %191 = vector.shape_cast %190 : vector<1x1x32xf32> to vector<1x32xf32>
    %192 = vector.broadcast %191 : vector<1x32xf32> to vector<16x32xf32>
    %193 = arith.addf %189, %192 : vector<16x32xf32>
    %194 = arith.addf %87, %193 : vector<16x32xf32>
    %c0_70 = arith.constant 0 : index
    %c0_71 = arith.constant 0 : index
    %c0_72 = arith.constant 0 : index
    %195 = vector.load %arg12[%c0_70, %c0_71, %c0_72] : memref<2x1x32xf32, #tpu.memory_space<vmem>>, vector<1x1x32xf32>
    %196 = vector.shape_cast %195 : vector<1x1x32xf32> to vector<1x32xf32>
    %c0_73 = arith.constant 0 : index
    %c0_74 = arith.constant 0 : index
    %c0_75 = arith.constant 0 : index
    %197 = vector.load %arg13[%c0_73, %c0_74, %c0_75] : memref<2x1x32xf32, #tpu.memory_space<vmem>>, vector<1x1x32xf32>
    %198 = vector.shape_cast %197 : vector<1x1x32xf32> to vector<1x32xf32>
    %cst_76 = arith.constant dense<0.000000e+00> : vector<16xf32>
    %199 = vector.multi_reduction <add>, %194, %cst_76 [1] : vector<16x32xf32> to vector<16xf32>
    %200 = vector.shape_cast %199 : vector<16xf32> to vector<16x1xf32>
    %cst_77 = arith.constant 3.200000e+01 : f32
    %201 = vector.broadcast %cst_77 : f32 to vector<16x1xf32>
    %202 = arith.divf %200, %201 : vector<16x1xf32>
    %203 = vector.broadcast %202 : vector<16x1xf32> to vector<16x32xf32>
    %204 = arith.subf %194, %203 : vector<16x32xf32>
    %205 = arith.mulf %204, %204 : vector<16x32xf32>
    %cst_78 = arith.constant dense<0.000000e+00> : vector<16xf32>
    %206 = vector.multi_reduction <add>, %205, %cst_78 [1] : vector<16x32xf32> to vector<16xf32>
    %207 = vector.shape_cast %206 : vector<16xf32> to vector<16x1xf32>
    %cst_79 = arith.constant 3.200000e+01 : f32
    %208 = vector.broadcast %cst_79 : f32 to vector<16x1xf32>
    %209 = arith.divf %207, %208 : vector<16x1xf32>
    %210 = vector.broadcast %202 : vector<16x1xf32> to vector<16x32xf32>
    %211 = arith.subf %194, %210 : vector<16x32xf32>
    %cst_80 = arith.constant 9.99999974E-6 : f32
    %212 = vector.broadcast %cst_80 : f32 to vector<16x1xf32>
    %213 = arith.addf %209, %212 : vector<16x1xf32>
    %214 = math.rsqrt %213 : vector<16x1xf32>
    %215 = vector.broadcast %214 : vector<16x1xf32> to vector<16x32xf32>
    %216 = arith.mulf %211, %215 : vector<16x32xf32>
    %217 = vector.broadcast %196 : vector<1x32xf32> to vector<16x32xf32>
    %218 = arith.mulf %216, %217 : vector<16x32xf32>
    %219 = vector.broadcast %198 : vector<1x32xf32> to vector<16x32xf32>
    %220 = arith.addf %218, %219 : vector<16x32xf32>
    %c0_81 = arith.constant 0 : index
    %c0_82 = arith.constant 0 : index
    %c0_83 = arith.constant 0 : index
    %221 = vector.load %arg14[%c0_81, %c0_82, %c0_83] : memref<2x32x128xf32, #tpu.memory_space<vmem>>, vector<1x32x128xf32>
    %222 = vector.shape_cast %221 : vector<1x32x128xf32> to vector<32x128xf32>
    %cst_84 = arith.constant dense<0.000000e+00> : vector<16x128xf32>
    %223 = tpu.matmul %220, %222, %cst_84 {dimension_numbers = #tpu.dot_dimension_numbers<[1], [0], [0], [1], [0, 0, 1, 1], [], []>} : vector<16x32xf32>, vector<32x128xf32>, vector<16x128xf32> -> vector<16x128xf32>
    %c0_85 = arith.constant 0 : index
    %c0_86 = arith.constant 0 : index
    %c0_87 = arith.constant 0 : index
    %224 = vector.load %arg15[%c0_85, %c0_86, %c0_87] : memref<2x1x128xf32, #tpu.memory_space<vmem>>, vector<1x1x128xf32>
    %225 = vector.shape_cast %224 : vector<1x1x128xf32> to vector<1x128xf32>
    %226 = vector.broadcast %225 : vector<1x128xf32> to vector<16x128xf32>
    %227 = arith.addf %223, %226 : vector<16x128xf32>
    %cst_88 = arith.constant 0.000000e+00 : f32
    %228 = vector.broadcast %cst_88 : f32 to vector<16x128xf32>
    %229 = arith.maximumf %227, %228 : vector<16x128xf32>
    %c0_89 = arith.constant 0 : index
    %c0_90 = arith.constant 0 : index
    %c0_91 = arith.constant 0 : index
    %230 = vector.load %arg16[%c0_89, %c0_90, %c0_91] : memref<2x128x32xf32, #tpu.memory_space<vmem>>, vector<1x128x32xf32>
    %231 = vector.shape_cast %230 : vector<1x128x32xf32> to vector<128x32xf32>
    %cst_92 = arith.constant dense<0.000000e+00> : vector<16x32xf32>
    %232 = tpu.matmul %229, %231, %cst_92 {dimension_numbers = #tpu.dot_dimension_numbers<[1], [0], [0], [1], [0, 0, 1, 1], [], []>} : vector<16x128xf32>, vector<128x32xf32>, vector<16x32xf32> -> vector<16x32xf32>
    %c0_93 = arith.constant 0 : index
    %c0_94 = arith.constant 0 : index
    %c0_95 = arith.constant 0 : index
    %233 = vector.load %arg17[%c0_93, %c0_94, %c0_95] : memref<2x1x32xf32, #tpu.memory_space<vmem>>, vector<1x1x32xf32>
    %234 = vector.shape_cast %233 : vector<1x1x32xf32> to vector<1x32xf32>
    %235 = vector.broadcast %234 : vector<1x32xf32> to vector<16x32xf32>
    %236 = arith.addf %232, %235 : vector<16x32xf32>
    %237 = arith.addf %220, %236 : vector<16x32xf32>
    %c0_96 = arith.constant 0 : index
    %c0_97 = arith.constant 0 : index
    %c0_98 = arith.constant 0 : index
    %238 = vector.load %arg18[%c0_96, %c0_97, %c0_98] : memref<2x1x32xf32, #tpu.memory_space<vmem>>, vector<1x1x32xf32>
    %239 = vector.shape_cast %238 : vector<1x1x32xf32> to vector<1x32xf32>
    %c0_99 = arith.constant 0 : index
    %c0_100 = arith.constant 0 : index
    %c0_101 = arith.constant 0 : index
    %240 = vector.load %arg19[%c0_99, %c0_100, %c0_101] : memref<2x1x32xf32, #tpu.memory_space<vmem>>, vector<1x1x32xf32>
    %241 = vector.shape_cast %240 : vector<1x1x32xf32> to vector<1x32xf32>
    %cst_102 = arith.constant dense<0.000000e+00> : vector<16xf32>
    %242 = vector.multi_reduction <add>, %237, %cst_102 [1] : vector<16x32xf32> to vector<16xf32>
    %243 = vector.shape_cast %242 : vector<16xf32> to vector<16x1xf32>
    %cst_103 = arith.constant 3.200000e+01 : f32
    %244 = vector.broadcast %cst_103 : f32 to vector<16x1xf32>
    %245 = arith.divf %243, %244 : vector<16x1xf32>
    %246 = vector.broadcast %245 : vector<16x1xf32> to vector<16x32xf32>
    %247 = arith.subf %237, %246 : vector<16x32xf32>
    %248 = arith.mulf %247, %247 : vector<16x32xf32>
    %cst_104 = arith.constant dense<0.000000e+00> : vector<16xf32>
    %249 = vector.multi_reduction <add>, %248, %cst_104 [1] : vector<16x32xf32> to vector<16xf32>
    %250 = vector.shape_cast %249 : vector<16xf32> to vector<16x1xf32>
    %cst_105 = arith.constant 3.200000e+01 : f32
    %251 = vector.broadcast %cst_105 : f32 to vector<16x1xf32>
    %252 = arith.divf %250, %251 : vector<16x1xf32>
    %253 = vector.broadcast %245 : vector<16x1xf32> to vector<16x32xf32>
    %254 = arith.subf %237, %253 : vector<16x32xf32>
    %cst_106 = arith.constant 9.99999974E-6 : f32
    %255 = vector.broadcast %cst_106 : f32 to vector<16x1xf32>
    %256 = arith.addf %252, %255 : vector<16x1xf32>
    %257 = math.rsqrt %256 : vector<16x1xf32>
    %258 = vector.broadcast %257 : vector<16x1xf32> to vector<16x32xf32>
    %259 = arith.mulf %254, %258 : vector<16x32xf32>
    %260 = vector.broadcast %239 : vector<1x32xf32> to vector<16x32xf32>
    %261 = arith.mulf %259, %260 : vector<16x32xf32>
    %262 = vector.broadcast %241 : vector<1x32xf32> to vector<16x32xf32>
    %263 = arith.addf %261, %262 : vector<16x32xf32>
    %c1 = arith.constant 1 : index
    %c0_107 = arith.constant 0 : index
    %c0_108 = arith.constant 0 : index
    %264 = vector.load %arg8[%c1, %c0_107, %c0_108] : memref<2x32x96xf32, #tpu.memory_space<vmem>>, vector<1x32x96xf32>
    %265 = vector.shape_cast %264 : vector<1x32x96xf32> to vector<32x96xf32>
    %cst_109 = arith.constant dense<0.000000e+00> : vector<16x96xf32>
    %266 = tpu.matmul %263, %265, %cst_109 {dimension_numbers = #tpu.dot_dimension_numbers<[1], [0], [0], [1], [0, 0, 1, 1], [], []>} : vector<16x32xf32>, vector<32x96xf32>, vector<16x96xf32> -> vector<16x96xf32>
    %c1_110 = arith.constant 1 : index
    %c0_111 = arith.constant 0 : index
    %c0_112 = arith.constant 0 : index
    %267 = vector.load %arg9[%c1_110, %c0_111, %c0_112] : memref<2x1x96xf32, #tpu.memory_space<vmem>>, vector<1x1x96xf32>
    %268 = vector.shape_cast %267 : vector<1x1x96xf32> to vector<1x96xf32>
    %269 = vector.broadcast %268 : vector<1x96xf32> to vector<16x96xf32>
    %270 = arith.addf %266, %269 : vector<16x96xf32>
    %271 = vector.extract_strided_slice %270 {offsets = [0, 0], sizes = [16, 32], strides = [1, 1]} : vector<16x96xf32> to vector<16x32xf32>
    %272 = vector.extract_strided_slice %270 {offsets = [0, 32], sizes = [16, 32], strides = [1, 1]} : vector<16x96xf32> to vector<16x32xf32>
    %273 = vector.extract_strided_slice %270 {offsets = [0, 64], sizes = [16, 32], strides = [1, 1]} : vector<16x96xf32> to vector<16x32xf32>
    %274 = vector.extract_strided_slice %271 {offsets = [0, 0], sizes = [16, 8], strides = [1, 1]} : vector<16x32xf32> to vector<16x8xf32>
    %275 = vector.extract_strided_slice %272 {offsets = [0, 0], sizes = [16, 8], strides = [1, 1]} : vector<16x32xf32> to vector<16x8xf32>
    %276 = vector.extract_strided_slice %273 {offsets = [0, 0], sizes = [16, 8], strides = [1, 1]} : vector<16x32xf32> to vector<16x8xf32>
    %cst_113 = arith.constant dense<0.000000e+00> : vector<16x16xf32>
    %277 = tpu.matmul %274, %275, %cst_113 {dimension_numbers = #tpu.dot_dimension_numbers<[1], [1], [0], [0], [0, 0, 1, 0], [], []>} : vector<16x8xf32>, vector<16x8xf32>, vector<16x16xf32> -> vector<16x16xf32>
    %cst_114 = arith.constant 0.353553385 : f32
    %278 = vector.broadcast %cst_114 : f32 to vector<16x16xf32>
    %279 = arith.mulf %277, %278 : vector<16x16xf32>
    %280 = arith.addf %279, %27 : vector<16x16xf32>
    %cst_115 = arith.constant dense<0xFF800000> : vector<16xf32>
    %281 = vector.multi_reduction <maximumf>, %280, %cst_115 [1] : vector<16x16xf32> to vector<16xf32>
    %282 = vector.shape_cast %281 : vector<16xf32> to vector<16x1xf32>
    %283 = vector.broadcast %282 : vector<16x1xf32> to vector<16x16xf32>
    %284 = arith.subf %280, %283 : vector<16x16xf32>
    %285 = math.exp %284 : vector<16x16xf32>
    %cst_116 = arith.constant dense<0.000000e+00> : vector<16xf32>
    %286 = vector.multi_reduction <add>, %285, %cst_116 [1] : vector<16x16xf32> to vector<16xf32>
    %287 = vector.shape_cast %286 : vector<16xf32> to vector<16x1xf32>
    %288 = tpu.reciprocal %287 {approx = true} : vector<16x1xf32> -> vector<16x1xf32>
    %289 = arith.mulf %287, %288 : vector<16x1xf32>
    %cst_117 = arith.constant 2.000000e+00 : f32
    %290 = vector.broadcast %cst_117 : f32 to vector<16x1xf32>
    %291 = arith.subf %290, %289 : vector<16x1xf32>
    %292 = arith.mulf %288, %291 : vector<16x1xf32>
    %293 = vector.broadcast %292 : vector<16x1xf32> to vector<16x16xf32>
    %294 = arith.mulf %285, %293 : vector<16x16xf32>
    %cst_118 = arith.constant dense<0.000000e+00> : vector<16x8xf32>
    %295 = tpu.matmul %294, %276, %cst_118 {dimension_numbers = #tpu.dot_dimension_numbers<[1], [0], [0], [1], [0, 0, 1, 1], [], []>} : vector<16x16xf32>, vector<16x8xf32>, vector<16x8xf32> -> vector<16x8xf32>
    %296 = vector.extract_strided_slice %271 {offsets = [0, 8], sizes = [16, 8], strides = [1, 1]} : vector<16x32xf32> to vector<16x8xf32>
    %297 = vector.extract_strided_slice %272 {offsets = [0, 8], sizes = [16, 8], strides = [1, 1]} : vector<16x32xf32> to vector<16x8xf32>
    %298 = vector.extract_strided_slice %273 {offsets = [0, 8], sizes = [16, 8], strides = [1, 1]} : vector<16x32xf32> to vector<16x8xf32>
    %cst_119 = arith.constant dense<0.000000e+00> : vector<16x16xf32>
    %299 = tpu.matmul %296, %297, %cst_119 {dimension_numbers = #tpu.dot_dimension_numbers<[1], [1], [0], [0], [0, 0, 1, 0], [], []>} : vector<16x8xf32>, vector<16x8xf32>, vector<16x16xf32> -> vector<16x16xf32>
    %cst_120 = arith.constant 0.353553385 : f32
    %300 = vector.broadcast %cst_120 : f32 to vector<16x16xf32>
    %301 = arith.mulf %299, %300 : vector<16x16xf32>
    %302 = arith.addf %301, %27 : vector<16x16xf32>
    %cst_121 = arith.constant dense<0xFF800000> : vector<16xf32>
    %303 = vector.multi_reduction <maximumf>, %302, %cst_121 [1] : vector<16x16xf32> to vector<16xf32>
    %304 = vector.shape_cast %303 : vector<16xf32> to vector<16x1xf32>
    %305 = vector.broadcast %304 : vector<16x1xf32> to vector<16x16xf32>
    %306 = arith.subf %302, %305 : vector<16x16xf32>
    %307 = math.exp %306 : vector<16x16xf32>
    %cst_122 = arith.constant dense<0.000000e+00> : vector<16xf32>
    %308 = vector.multi_reduction <add>, %307, %cst_122 [1] : vector<16x16xf32> to vector<16xf32>
    %309 = vector.shape_cast %308 : vector<16xf32> to vector<16x1xf32>
    %310 = tpu.reciprocal %309 {approx = true} : vector<16x1xf32> -> vector<16x1xf32>
    %311 = arith.mulf %309, %310 : vector<16x1xf32>
    %cst_123 = arith.constant 2.000000e+00 : f32
    %312 = vector.broadcast %cst_123 : f32 to vector<16x1xf32>
    %313 = arith.subf %312, %311 : vector<16x1xf32>
    %314 = arith.mulf %310, %313 : vector<16x1xf32>
    %315 = vector.broadcast %314 : vector<16x1xf32> to vector<16x16xf32>
    %316 = arith.mulf %307, %315 : vector<16x16xf32>
    %cst_124 = arith.constant dense<0.000000e+00> : vector<16x8xf32>
    %317 = tpu.matmul %316, %298, %cst_124 {dimension_numbers = #tpu.dot_dimension_numbers<[1], [0], [0], [1], [0, 0, 1, 1], [], []>} : vector<16x16xf32>, vector<16x8xf32>, vector<16x8xf32> -> vector<16x8xf32>
    %318 = vector.extract_strided_slice %271 {offsets = [0, 16], sizes = [16, 8], strides = [1, 1]} : vector<16x32xf32> to vector<16x8xf32>
    %319 = vector.extract_strided_slice %272 {offsets = [0, 16], sizes = [16, 8], strides = [1, 1]} : vector<16x32xf32> to vector<16x8xf32>
    %320 = vector.extract_strided_slice %273 {offsets = [0, 16], sizes = [16, 8], strides = [1, 1]} : vector<16x32xf32> to vector<16x8xf32>
    %cst_125 = arith.constant dense<0.000000e+00> : vector<16x16xf32>
    %321 = tpu.matmul %318, %319, %cst_125 {dimension_numbers = #tpu.dot_dimension_numbers<[1], [1], [0], [0], [0, 0, 1, 0], [], []>} : vector<16x8xf32>, vector<16x8xf32>, vector<16x16xf32> -> vector<16x16xf32>
    %cst_126 = arith.constant 0.353553385 : f32
    %322 = vector.broadcast %cst_126 : f32 to vector<16x16xf32>
    %323 = arith.mulf %321, %322 : vector<16x16xf32>
    %324 = arith.addf %323, %27 : vector<16x16xf32>
    %cst_127 = arith.constant dense<0xFF800000> : vector<16xf32>
    %325 = vector.multi_reduction <maximumf>, %324, %cst_127 [1] : vector<16x16xf32> to vector<16xf32>
    %326 = vector.shape_cast %325 : vector<16xf32> to vector<16x1xf32>
    %327 = vector.broadcast %326 : vector<16x1xf32> to vector<16x16xf32>
    %328 = arith.subf %324, %327 : vector<16x16xf32>
    %329 = math.exp %328 : vector<16x16xf32>
    %cst_128 = arith.constant dense<0.000000e+00> : vector<16xf32>
    %330 = vector.multi_reduction <add>, %329, %cst_128 [1] : vector<16x16xf32> to vector<16xf32>
    %331 = vector.shape_cast %330 : vector<16xf32> to vector<16x1xf32>
    %332 = tpu.reciprocal %331 {approx = true} : vector<16x1xf32> -> vector<16x1xf32>
    %333 = arith.mulf %331, %332 : vector<16x1xf32>
    %cst_129 = arith.constant 2.000000e+00 : f32
    %334 = vector.broadcast %cst_129 : f32 to vector<16x1xf32>
    %335 = arith.subf %334, %333 : vector<16x1xf32>
    %336 = arith.mulf %332, %335 : vector<16x1xf32>
    %337 = vector.broadcast %336 : vector<16x1xf32> to vector<16x16xf32>
    %338 = arith.mulf %329, %337 : vector<16x16xf32>
    %cst_130 = arith.constant dense<0.000000e+00> : vector<16x8xf32>
    %339 = tpu.matmul %338, %320, %cst_130 {dimension_numbers = #tpu.dot_dimension_numbers<[1], [0], [0], [1], [0, 0, 1, 1], [], []>} : vector<16x16xf32>, vector<16x8xf32>, vector<16x8xf32> -> vector<16x8xf32>
    %340 = vector.extract_strided_slice %271 {offsets = [0, 24], sizes = [16, 8], strides = [1, 1]} : vector<16x32xf32> to vector<16x8xf32>
    %341 = vector.extract_strided_slice %272 {offsets = [0, 24], sizes = [16, 8], strides = [1, 1]} : vector<16x32xf32> to vector<16x8xf32>
    %342 = vector.extract_strided_slice %273 {offsets = [0, 24], sizes = [16, 8], strides = [1, 1]} : vector<16x32xf32> to vector<16x8xf32>
    %cst_131 = arith.constant dense<0.000000e+00> : vector<16x16xf32>
    %343 = tpu.matmul %340, %341, %cst_131 {dimension_numbers = #tpu.dot_dimension_numbers<[1], [1], [0], [0], [0, 0, 1, 0], [], []>} : vector<16x8xf32>, vector<16x8xf32>, vector<16x16xf32> -> vector<16x16xf32>
    %cst_132 = arith.constant 0.353553385 : f32
    %344 = vector.broadcast %cst_132 : f32 to vector<16x16xf32>
    %345 = arith.mulf %343, %344 : vector<16x16xf32>
    %346 = arith.addf %345, %27 : vector<16x16xf32>
    %cst_133 = arith.constant dense<0xFF800000> : vector<16xf32>
    %347 = vector.multi_reduction <maximumf>, %346, %cst_133 [1] : vector<16x16xf32> to vector<16xf32>
    %348 = vector.shape_cast %347 : vector<16xf32> to vector<16x1xf32>
    %349 = vector.broadcast %348 : vector<16x1xf32> to vector<16x16xf32>
    %350 = arith.subf %346, %349 : vector<16x16xf32>
    %351 = math.exp %350 : vector<16x16xf32>
    %cst_134 = arith.constant dense<0.000000e+00> : vector<16xf32>
    %352 = vector.multi_reduction <add>, %351, %cst_134 [1] : vector<16x16xf32> to vector<16xf32>
    %353 = vector.shape_cast %352 : vector<16xf32> to vector<16x1xf32>
    %354 = tpu.reciprocal %353 {approx = true} : vector<16x1xf32> -> vector<16x1xf32>
    %355 = arith.mulf %353, %354 : vector<16x1xf32>
    %cst_135 = arith.constant 2.000000e+00 : f32
    %356 = vector.broadcast %cst_135 : f32 to vector<16x1xf32>
    %357 = arith.subf %356, %355 : vector<16x1xf32>
    %358 = arith.mulf %354, %357 : vector<16x1xf32>
    %359 = vector.broadcast %358 : vector<16x1xf32> to vector<16x16xf32>
    %360 = arith.mulf %351, %359 : vector<16x16xf32>
    %cst_136 = arith.constant dense<0.000000e+00> : vector<16x8xf32>
    %361 = tpu.matmul %360, %342, %cst_136 {dimension_numbers = #tpu.dot_dimension_numbers<[1], [0], [0], [1], [0, 0, 1, 1], [], []>} : vector<16x16xf32>, vector<16x8xf32>, vector<16x8xf32> -> vector<16x8xf32>
    %362 = tpu.concatenate %295, %317, %339, %361 in 1 : vector<16x8xf32>, vector<16x8xf32>, vector<16x8xf32>, vector<16x8xf32> -> vector<16x32xf32>
    %c1_137 = arith.constant 1 : index
    %c0_138 = arith.constant 0 : index
    %c0_139 = arith.constant 0 : index
    %363 = vector.load %arg10[%c1_137, %c0_138, %c0_139] : memref<2x32x32xf32, #tpu.memory_space<vmem>>, vector<1x32x32xf32>
    %364 = vector.shape_cast %363 : vector<1x32x32xf32> to vector<32x32xf32>
    %cst_140 = arith.constant dense<0.000000e+00> : vector<16x32xf32>
    %365 = tpu.matmul %362, %364, %cst_140 {dimension_numbers = #tpu.dot_dimension_numbers<[1], [0], [0], [1], [0, 0, 1, 1], [], []>} : vector<16x32xf32>, vector<32x32xf32>, vector<16x32xf32> -> vector<16x32xf32>
    %c1_141 = arith.constant 1 : index
    %c0_142 = arith.constant 0 : index
    %c0_143 = arith.constant 0 : index
    %366 = vector.load %arg11[%c1_141, %c0_142, %c0_143] : memref<2x1x32xf32, #tpu.memory_space<vmem>>, vector<1x1x32xf32>
    %367 = vector.shape_cast %366 : vector<1x1x32xf32> to vector<1x32xf32>
    %368 = vector.broadcast %367 : vector<1x32xf32> to vector<16x32xf32>
    %369 = arith.addf %365, %368 : vector<16x32xf32>
    %370 = arith.addf %263, %369 : vector<16x32xf32>
    %c1_144 = arith.constant 1 : index
    %c0_145 = arith.constant 0 : index
    %c0_146 = arith.constant 0 : index
    %371 = vector.load %arg12[%c1_144, %c0_145, %c0_146] : memref<2x1x32xf32, #tpu.memory_space<vmem>>, vector<1x1x32xf32>
    %372 = vector.shape_cast %371 : vector<1x1x32xf32> to vector<1x32xf32>
    %c1_147 = arith.constant 1 : index
    %c0_148 = arith.constant 0 : index
    %c0_149 = arith.constant 0 : index
    %373 = vector.load %arg13[%c1_147, %c0_148, %c0_149] : memref<2x1x32xf32, #tpu.memory_space<vmem>>, vector<1x1x32xf32>
    %374 = vector.shape_cast %373 : vector<1x1x32xf32> to vector<1x32xf32>
    %cst_150 = arith.constant dense<0.000000e+00> : vector<16xf32>
    %375 = vector.multi_reduction <add>, %370, %cst_150 [1] : vector<16x32xf32> to vector<16xf32>
    %376 = vector.shape_cast %375 : vector<16xf32> to vector<16x1xf32>
    %cst_151 = arith.constant 3.200000e+01 : f32
    %377 = vector.broadcast %cst_151 : f32 to vector<16x1xf32>
    %378 = arith.divf %376, %377 : vector<16x1xf32>
    %379 = vector.broadcast %378 : vector<16x1xf32> to vector<16x32xf32>
    %380 = arith.subf %370, %379 : vector<16x32xf32>
    %381 = arith.mulf %380, %380 : vector<16x32xf32>
    %cst_152 = arith.constant dense<0.000000e+00> : vector<16xf32>
    %382 = vector.multi_reduction <add>, %381, %cst_152 [1] : vector<16x32xf32> to vector<16xf32>
    %383 = vector.shape_cast %382 : vector<16xf32> to vector<16x1xf32>
    %cst_153 = arith.constant 3.200000e+01 : f32
    %384 = vector.broadcast %cst_153 : f32 to vector<16x1xf32>
    %385 = arith.divf %383, %384 : vector<16x1xf32>
    %386 = vector.broadcast %378 : vector<16x1xf32> to vector<16x32xf32>
    %387 = arith.subf %370, %386 : vector<16x32xf32>
    %cst_154 = arith.constant 9.99999974E-6 : f32
    %388 = vector.broadcast %cst_154 : f32 to vector<16x1xf32>
    %389 = arith.addf %385, %388 : vector<16x1xf32>
    %390 = math.rsqrt %389 : vector<16x1xf32>
    %391 = vector.broadcast %390 : vector<16x1xf32> to vector<16x32xf32>
    %392 = arith.mulf %387, %391 : vector<16x32xf32>
    %393 = vector.broadcast %372 : vector<1x32xf32> to vector<16x32xf32>
    %394 = arith.mulf %392, %393 : vector<16x32xf32>
    %395 = vector.broadcast %374 : vector<1x32xf32> to vector<16x32xf32>
    %396 = arith.addf %394, %395 : vector<16x32xf32>
    %c1_155 = arith.constant 1 : index
    %c0_156 = arith.constant 0 : index
    %c0_157 = arith.constant 0 : index
    %397 = vector.load %arg14[%c1_155, %c0_156, %c0_157] : memref<2x32x128xf32, #tpu.memory_space<vmem>>, vector<1x32x128xf32>
    %398 = vector.shape_cast %397 : vector<1x32x128xf32> to vector<32x128xf32>
    %cst_158 = arith.constant dense<0.000000e+00> : vector<16x128xf32>
    %399 = tpu.matmul %396, %398, %cst_158 {dimension_numbers = #tpu.dot_dimension_numbers<[1], [0], [0], [1], [0, 0, 1, 1], [], []>} : vector<16x32xf32>, vector<32x128xf32>, vector<16x128xf32> -> vector<16x128xf32>
    %c1_159 = arith.constant 1 : index
    %c0_160 = arith.constant 0 : index
    %c0_161 = arith.constant 0 : index
    %400 = vector.load %arg15[%c1_159, %c0_160, %c0_161] : memref<2x1x128xf32, #tpu.memory_space<vmem>>, vector<1x1x128xf32>
    %401 = vector.shape_cast %400 : vector<1x1x128xf32> to vector<1x128xf32>
    %402 = vector.broadcast %401 : vector<1x128xf32> to vector<16x128xf32>
    %403 = arith.addf %399, %402 : vector<16x128xf32>
    %cst_162 = arith.constant 0.000000e+00 : f32
    %404 = vector.broadcast %cst_162 : f32 to vector<16x128xf32>
    %405 = arith.maximumf %403, %404 : vector<16x128xf32>
    %c1_163 = arith.constant 1 : index
    %c0_164 = arith.constant 0 : index
    %c0_165 = arith.constant 0 : index
    %406 = vector.load %arg16[%c1_163, %c0_164, %c0_165] : memref<2x128x32xf32, #tpu.memory_space<vmem>>, vector<1x128x32xf32>
    %407 = vector.shape_cast %406 : vector<1x128x32xf32> to vector<128x32xf32>
    %cst_166 = arith.constant dense<0.000000e+00> : vector<16x32xf32>
    %408 = tpu.matmul %405, %407, %cst_166 {dimension_numbers = #tpu.dot_dimension_numbers<[1], [0], [0], [1], [0, 0, 1, 1], [], []>} : vector<16x128xf32>, vector<128x32xf32>, vector<16x32xf32> -> vector<16x32xf32>
    %c1_167 = arith.constant 1 : index
    %c0_168 = arith.constant 0 : index
    %c0_169 = arith.constant 0 : index
    %409 = vector.load %arg17[%c1_167, %c0_168, %c0_169] : memref<2x1x32xf32, #tpu.memory_space<vmem>>, vector<1x1x32xf32>
    %410 = vector.shape_cast %409 : vector<1x1x32xf32> to vector<1x32xf32>
    %411 = vector.broadcast %410 : vector<1x32xf32> to vector<16x32xf32>
    %412 = arith.addf %408, %411 : vector<16x32xf32>
    %413 = arith.addf %396, %412 : vector<16x32xf32>
    %c1_170 = arith.constant 1 : index
    %c0_171 = arith.constant 0 : index
    %c0_172 = arith.constant 0 : index
    %414 = vector.load %arg18[%c1_170, %c0_171, %c0_172] : memref<2x1x32xf32, #tpu.memory_space<vmem>>, vector<1x1x32xf32>
    %415 = vector.shape_cast %414 : vector<1x1x32xf32> to vector<1x32xf32>
    %c1_173 = arith.constant 1 : index
    %c0_174 = arith.constant 0 : index
    %c0_175 = arith.constant 0 : index
    %416 = vector.load %arg19[%c1_173, %c0_174, %c0_175] : memref<2x1x32xf32, #tpu.memory_space<vmem>>, vector<1x1x32xf32>
    %417 = vector.shape_cast %416 : vector<1x1x32xf32> to vector<1x32xf32>
    %cst_176 = arith.constant dense<0.000000e+00> : vector<16xf32>
    %418 = vector.multi_reduction <add>, %413, %cst_176 [1] : vector<16x32xf32> to vector<16xf32>
    %419 = vector.shape_cast %418 : vector<16xf32> to vector<16x1xf32>
    %cst_177 = arith.constant 3.200000e+01 : f32
    %420 = vector.broadcast %cst_177 : f32 to vector<16x1xf32>
    %421 = arith.divf %419, %420 : vector<16x1xf32>
    %422 = vector.broadcast %421 : vector<16x1xf32> to vector<16x32xf32>
    %423 = arith.subf %413, %422 : vector<16x32xf32>
    %424 = arith.mulf %423, %423 : vector<16x32xf32>
    %cst_178 = arith.constant dense<0.000000e+00> : vector<16xf32>
    %425 = vector.multi_reduction <add>, %424, %cst_178 [1] : vector<16x32xf32> to vector<16xf32>
    %426 = vector.shape_cast %425 : vector<16xf32> to vector<16x1xf32>
    %cst_179 = arith.constant 3.200000e+01 : f32
    %427 = vector.broadcast %cst_179 : f32 to vector<16x1xf32>
    %428 = arith.divf %426, %427 : vector<16x1xf32>
    %429 = vector.broadcast %421 : vector<16x1xf32> to vector<16x32xf32>
    %430 = arith.subf %413, %429 : vector<16x32xf32>
    %cst_180 = arith.constant 9.99999974E-6 : f32
    %431 = vector.broadcast %cst_180 : f32 to vector<16x1xf32>
    %432 = arith.addf %428, %431 : vector<16x1xf32>
    %433 = math.rsqrt %432 : vector<16x1xf32>
    %434 = vector.broadcast %433 : vector<16x1xf32> to vector<16x32xf32>
    %435 = arith.mulf %430, %434 : vector<16x32xf32>
    %436 = vector.broadcast %415 : vector<1x32xf32> to vector<16x32xf32>
    %437 = arith.mulf %435, %436 : vector<16x32xf32>
    %438 = vector.broadcast %417 : vector<1x32xf32> to vector<16x32xf32>
    %439 = arith.addf %437, %438 : vector<16x32xf32>
    %440 = vector.shape_cast %439 : vector<16x32xf32> to vector<2x8x32xf32>
    %441 = vector.extract_strided_slice %440 {offsets = [0, 7, 0], sizes = [2, 1, 32], strides = [1, 1, 1]} : vector<2x8x32xf32> to vector<2x1x32xf32>
    %442 = vector.shape_cast %441 : vector<2x1x32xf32> to vector<2x32xf32>
    %c0_181 = arith.constant 0 : index
    %c0_182 = arith.constant 0 : index
    %443 = vector.load %arg20[%c0_181, %c0_182] : memref<32x32xf32, #tpu.memory_space<vmem>>, vector<32x32xf32>
    %cst_183 = arith.constant dense<0.000000e+00> : vector<2x32xf32>
    %444 = tpu.matmul %442, %443, %cst_183 {dimension_numbers = #tpu.dot_dimension_numbers<[1], [0], [0], [1], [0, 0, 1, 1], [], []>} : vector<2x32xf32>, vector<32x32xf32>, vector<2x32xf32> -> vector<2x32xf32>
    %c0_184 = arith.constant 0 : index
    %c0_185 = arith.constant 0 : index
    %445 = vector.load %arg21[%c0_184, %c0_185] : memref<1x32xf32, #tpu.memory_space<vmem>>, vector<1x32xf32>
    %446 = vector.broadcast %445 : vector<1x32xf32> to vector<2x32xf32>
    %447 = arith.addf %444, %446 : vector<2x32xf32>
    %c0_186 = arith.constant 0 : index
    %c0_187 = arith.constant 0 : index
    %448 = vector.load %arg22[%c0_186, %c0_187] : memref<1x32xf32, #tpu.memory_space<vmem>>, vector<1x32xf32>
    %c0_188 = arith.constant 0 : index
    %c0_189 = arith.constant 0 : index
    %449 = vector.load %arg23[%c0_188, %c0_189] : memref<1x32xf32, #tpu.memory_space<vmem>>, vector<1x32xf32>
    %cst_190 = arith.constant dense<0.000000e+00> : vector<2xf32>
    %450 = vector.multi_reduction <add>, %447, %cst_190 [1] : vector<2x32xf32> to vector<2xf32>
    %451 = vector.shape_cast %450 : vector<2xf32> to vector<2x1xf32>
    %cst_191 = arith.constant 3.200000e+01 : f32
    %452 = vector.broadcast %cst_191 : f32 to vector<2x1xf32>
    %453 = arith.divf %451, %452 : vector<2x1xf32>
    %454 = vector.broadcast %453 : vector<2x1xf32> to vector<2x32xf32>
    %455 = arith.subf %447, %454 : vector<2x32xf32>
    %456 = arith.mulf %455, %455 : vector<2x32xf32>
    %cst_192 = arith.constant dense<0.000000e+00> : vector<2xf32>
    %457 = vector.multi_reduction <add>, %456, %cst_192 [1] : vector<2x32xf32> to vector<2xf32>
    %458 = vector.shape_cast %457 : vector<2xf32> to vector<2x1xf32>
    %cst_193 = arith.constant 3.200000e+01 : f32
    %459 = vector.broadcast %cst_193 : f32 to vector<2x1xf32>
    %460 = arith.divf %458, %459 : vector<2x1xf32>
    %461 = vector.broadcast %453 : vector<2x1xf32> to vector<2x32xf32>
    %462 = arith.subf %447, %461 : vector<2x32xf32>
    %cst_194 = arith.constant 9.99999974E-6 : f32
    %463 = vector.broadcast %cst_194 : f32 to vector<2x1xf32>
    %464 = arith.addf %460, %463 : vector<2x1xf32>
    %465 = math.rsqrt %464 : vector<2x1xf32>
    %466 = vector.broadcast %465 : vector<2x1xf32> to vector<2x32xf32>
    %467 = arith.mulf %462, %466 : vector<2x32xf32>
    %468 = vector.broadcast %448 : vector<1x32xf32> to vector<2x32xf32>
    %469 = arith.mulf %467, %468 : vector<2x32xf32>
    %470 = vector.broadcast %449 : vector<1x32xf32> to vector<2x32xf32>
    %471 = arith.addf %469, %470 : vector<2x32xf32>
    %cst_195 = arith.constant 0.000000e+00 : f32
    %472 = vector.broadcast %cst_195 : f32 to vector<2x32xf32>
    %473 = arith.maximumf %471, %472 : vector<2x32xf32>
    %c0_196 = arith.constant 0 : index
    %c0_197 = arith.constant 0 : index
    %474 = vector.load %arg24[%c0_196, %c0_197] : memref<32x16xf32, #tpu.memory_space<vmem>>, vector<32x16xf32>
    %cst_198 = arith.constant dense<0.000000e+00> : vector<2x16xf32>
    %475 = tpu.matmul %473, %474, %cst_198 {dimension_numbers = #tpu.dot_dimension_numbers<[1], [0], [0], [1], [0, 0, 1, 1], [], []>} : vector<2x32xf32>, vector<32x16xf32>, vector<2x16xf32> -> vector<2x16xf32>
    %c0_199 = arith.constant 0 : index
    %c0_200 = arith.constant 0 : index
    %476 = vector.load %arg25[%c0_199, %c0_200] : memref<1x16xf32, #tpu.memory_space<vmem>>, vector<1x16xf32>
    %477 = vector.broadcast %476 : vector<1x16xf32> to vector<2x16xf32>
    %478 = arith.addf %475, %477 : vector<2x16xf32>
    %c0_201 = arith.constant 0 : index
    %c0_202 = arith.constant 0 : index
    %479 = vector.load %arg26[%c0_201, %c0_202] : memref<1x16xf32, #tpu.memory_space<vmem>>, vector<1x16xf32>
    %c0_203 = arith.constant 0 : index
    %c0_204 = arith.constant 0 : index
    %480 = vector.load %arg27[%c0_203, %c0_204] : memref<1x16xf32, #tpu.memory_space<vmem>>, vector<1x16xf32>
    %cst_205 = arith.constant dense<0.000000e+00> : vector<2xf32>
    %481 = vector.multi_reduction <add>, %478, %cst_205 [1] : vector<2x16xf32> to vector<2xf32>
    %482 = vector.shape_cast %481 : vector<2xf32> to vector<2x1xf32>
    %cst_206 = arith.constant 1.600000e+01 : f32
    %483 = vector.broadcast %cst_206 : f32 to vector<2x1xf32>
    %484 = arith.divf %482, %483 : vector<2x1xf32>
    %485 = vector.broadcast %484 : vector<2x1xf32> to vector<2x16xf32>
    %486 = arith.subf %478, %485 : vector<2x16xf32>
    %487 = arith.mulf %486, %486 : vector<2x16xf32>
    %cst_207 = arith.constant dense<0.000000e+00> : vector<2xf32>
    %488 = vector.multi_reduction <add>, %487, %cst_207 [1] : vector<2x16xf32> to vector<2xf32>
    %489 = vector.shape_cast %488 : vector<2xf32> to vector<2x1xf32>
    %cst_208 = arith.constant 1.600000e+01 : f32
    %490 = vector.broadcast %cst_208 : f32 to vector<2x1xf32>
    %491 = arith.divf %489, %490 : vector<2x1xf32>
    %492 = vector.broadcast %484 : vector<2x1xf32> to vector<2x16xf32>
    %493 = arith.subf %478, %492 : vector<2x16xf32>
    %cst_209 = arith.constant 9.99999974E-6 : f32
    %494 = vector.broadcast %cst_209 : f32 to vector<2x1xf32>
    %495 = arith.addf %491, %494 : vector<2x1xf32>
    %496 = math.rsqrt %495 : vector<2x1xf32>
    %497 = vector.broadcast %496 : vector<2x1xf32> to vector<2x16xf32>
    %498 = arith.mulf %493, %497 : vector<2x16xf32>
    %499 = vector.broadcast %479 : vector<1x16xf32> to vector<2x16xf32>
    %500 = arith.mulf %498, %499 : vector<2x16xf32>
    %501 = vector.broadcast %480 : vector<1x16xf32> to vector<2x16xf32>
    %502 = arith.addf %500, %501 : vector<2x16xf32>
    %cst_210 = arith.constant 0.000000e+00 : f32
    %503 = vector.broadcast %cst_210 : f32 to vector<2x16xf32>
    %504 = arith.maximumf %502, %503 : vector<2x16xf32>
    %c0_211 = arith.constant 0 : index
    %c0_212 = arith.constant 0 : index
    %505 = vector.load %arg28[%c0_211, %c0_212] : memref<16x1xf32, #tpu.memory_space<vmem>>, vector<16x1xf32>
    %cst_213 = arith.constant dense<0.000000e+00> : vector<2x1xf32>
    %506 = tpu.matmul %504, %505, %cst_213 {dimension_numbers = #tpu.dot_dimension_numbers<[1], [0], [0], [1], [0, 0, 1, 1], [], []>} : vector<2x16xf32>, vector<16x1xf32>, vector<2x1xf32> -> vector<2x1xf32>
    %c0_214 = arith.constant 0 : index
    %c0_215 = arith.constant 0 : index
    %507 = vector.load %arg29[%c0_214, %c0_215] : memref<1x1xf32, #tpu.memory_space<vmem>>, vector<1x1xf32>
    %508 = vector.broadcast %507 : vector<1x1xf32> to vector<2x1xf32>
    %509 = arith.addf %506, %508 : vector<2x1xf32>
    %c0_216 = arith.constant 0 : index
    %c0_217 = arith.constant 0 : index
    %510 = vector.load %arg30[%c0_216, %c0_217] : memref<32x32xf32, #tpu.memory_space<vmem>>, vector<32x32xf32>
    %cst_218 = arith.constant dense<0.000000e+00> : vector<2x32xf32>
    %511 = tpu.matmul %442, %510, %cst_218 {dimension_numbers = #tpu.dot_dimension_numbers<[1], [0], [0], [1], [0, 0, 1, 1], [], []>} : vector<2x32xf32>, vector<32x32xf32>, vector<2x32xf32> -> vector<2x32xf32>
    %c0_219 = arith.constant 0 : index
    %c0_220 = arith.constant 0 : index
    %512 = vector.load %arg31[%c0_219, %c0_220] : memref<1x32xf32, #tpu.memory_space<vmem>>, vector<1x32xf32>
    %513 = vector.broadcast %512 : vector<1x32xf32> to vector<2x32xf32>
    %514 = arith.addf %511, %513 : vector<2x32xf32>
    %c0_221 = arith.constant 0 : index
    %c0_222 = arith.constant 0 : index
    %515 = vector.load %arg32[%c0_221, %c0_222] : memref<1x32xf32, #tpu.memory_space<vmem>>, vector<1x32xf32>
    %c0_223 = arith.constant 0 : index
    %c0_224 = arith.constant 0 : index
    %516 = vector.load %arg33[%c0_223, %c0_224] : memref<1x32xf32, #tpu.memory_space<vmem>>, vector<1x32xf32>
    %cst_225 = arith.constant dense<0.000000e+00> : vector<2xf32>
    %517 = vector.multi_reduction <add>, %514, %cst_225 [1] : vector<2x32xf32> to vector<2xf32>
    %518 = vector.shape_cast %517 : vector<2xf32> to vector<2x1xf32>
    %cst_226 = arith.constant 3.200000e+01 : f32
    %519 = vector.broadcast %cst_226 : f32 to vector<2x1xf32>
    %520 = arith.divf %518, %519 : vector<2x1xf32>
    %521 = vector.broadcast %520 : vector<2x1xf32> to vector<2x32xf32>
    %522 = arith.subf %514, %521 : vector<2x32xf32>
    %523 = arith.mulf %522, %522 : vector<2x32xf32>
    %cst_227 = arith.constant dense<0.000000e+00> : vector<2xf32>
    %524 = vector.multi_reduction <add>, %523, %cst_227 [1] : vector<2x32xf32> to vector<2xf32>
    %525 = vector.shape_cast %524 : vector<2xf32> to vector<2x1xf32>
    %cst_228 = arith.constant 3.200000e+01 : f32
    %526 = vector.broadcast %cst_228 : f32 to vector<2x1xf32>
    %527 = arith.divf %525, %526 : vector<2x1xf32>
    %528 = vector.broadcast %520 : vector<2x1xf32> to vector<2x32xf32>
    %529 = arith.subf %514, %528 : vector<2x32xf32>
    %cst_229 = arith.constant 9.99999974E-6 : f32
    %530 = vector.broadcast %cst_229 : f32 to vector<2x1xf32>
    %531 = arith.addf %527, %530 : vector<2x1xf32>
    %532 = math.rsqrt %531 : vector<2x1xf32>
    %533 = vector.broadcast %532 : vector<2x1xf32> to vector<2x32xf32>
    %534 = arith.mulf %529, %533 : vector<2x32xf32>
    %535 = vector.broadcast %515 : vector<1x32xf32> to vector<2x32xf32>
    %536 = arith.mulf %534, %535 : vector<2x32xf32>
    %537 = vector.broadcast %516 : vector<1x32xf32> to vector<2x32xf32>
    %538 = arith.addf %536, %537 : vector<2x32xf32>
    %cst_230 = arith.constant 0.000000e+00 : f32
    %539 = vector.broadcast %cst_230 : f32 to vector<2x32xf32>
    %540 = arith.maximumf %538, %539 : vector<2x32xf32>
    %c0_231 = arith.constant 0 : index
    %c0_232 = arith.constant 0 : index
    %541 = vector.load %arg34[%c0_231, %c0_232] : memref<32x16xf32, #tpu.memory_space<vmem>>, vector<32x16xf32>
    %cst_233 = arith.constant dense<0.000000e+00> : vector<2x16xf32>
    %542 = tpu.matmul %540, %541, %cst_233 {dimension_numbers = #tpu.dot_dimension_numbers<[1], [0], [0], [1], [0, 0, 1, 1], [], []>} : vector<2x32xf32>, vector<32x16xf32>, vector<2x16xf32> -> vector<2x16xf32>
    %c0_234 = arith.constant 0 : index
    %c0_235 = arith.constant 0 : index
    %543 = vector.load %arg35[%c0_234, %c0_235] : memref<1x16xf32, #tpu.memory_space<vmem>>, vector<1x16xf32>
    %544 = vector.broadcast %543 : vector<1x16xf32> to vector<2x16xf32>
    %545 = arith.addf %542, %544 : vector<2x16xf32>
    %c0_236 = arith.constant 0 : index
    %c0_237 = arith.constant 0 : index
    %546 = vector.load %arg36[%c0_236, %c0_237] : memref<1x16xf32, #tpu.memory_space<vmem>>, vector<1x16xf32>
    %c0_238 = arith.constant 0 : index
    %c0_239 = arith.constant 0 : index
    %547 = vector.load %arg37[%c0_238, %c0_239] : memref<1x16xf32, #tpu.memory_space<vmem>>, vector<1x16xf32>
    %cst_240 = arith.constant dense<0.000000e+00> : vector<2xf32>
    %548 = vector.multi_reduction <add>, %545, %cst_240 [1] : vector<2x16xf32> to vector<2xf32>
    %549 = vector.shape_cast %548 : vector<2xf32> to vector<2x1xf32>
    %cst_241 = arith.constant 1.600000e+01 : f32
    %550 = vector.broadcast %cst_241 : f32 to vector<2x1xf32>
    %551 = arith.divf %549, %550 : vector<2x1xf32>
    %552 = vector.broadcast %551 : vector<2x1xf32> to vector<2x16xf32>
    %553 = arith.subf %545, %552 : vector<2x16xf32>
    %554 = arith.mulf %553, %553 : vector<2x16xf32>
    %cst_242 = arith.constant dense<0.000000e+00> : vector<2xf32>
    %555 = vector.multi_reduction <add>, %554, %cst_242 [1] : vector<2x16xf32> to vector<2xf32>
    %556 = vector.shape_cast %555 : vector<2xf32> to vector<2x1xf32>
    %cst_243 = arith.constant 1.600000e+01 : f32
    %557 = vector.broadcast %cst_243 : f32 to vector<2x1xf32>
    %558 = arith.divf %556, %557 : vector<2x1xf32>
    %559 = vector.broadcast %551 : vector<2x1xf32> to vector<2x16xf32>
    %560 = arith.subf %545, %559 : vector<2x16xf32>
    %cst_244 = arith.constant 9.99999974E-6 : f32
    %561 = vector.broadcast %cst_244 : f32 to vector<2x1xf32>
    %562 = arith.addf %558, %561 : vector<2x1xf32>
    %563 = math.rsqrt %562 : vector<2x1xf32>
    %564 = vector.broadcast %563 : vector<2x1xf32> to vector<2x16xf32>
    %565 = arith.mulf %560, %564 : vector<2x16xf32>
    %566 = vector.broadcast %546 : vector<1x16xf32> to vector<2x16xf32>
    %567 = arith.mulf %565, %566 : vector<2x16xf32>
    %568 = vector.broadcast %547 : vector<1x16xf32> to vector<2x16xf32>
    %569 = arith.addf %567, %568 : vector<2x16xf32>
    %cst_245 = arith.constant 0.000000e+00 : f32
    %570 = vector.broadcast %cst_245 : f32 to vector<2x16xf32>
    %571 = arith.maximumf %569, %570 : vector<2x16xf32>
    %c0_246 = arith.constant 0 : index
    %c0_247 = arith.constant 0 : index
    %572 = vector.load %arg38[%c0_246, %c0_247] : memref<16x6xf32, #tpu.memory_space<vmem>>, vector<16x6xf32>
    %cst_248 = arith.constant dense<0.000000e+00> : vector<2x6xf32>
    %573 = tpu.matmul %571, %572, %cst_248 {dimension_numbers = #tpu.dot_dimension_numbers<[1], [0], [0], [1], [0, 0, 1, 1], [], []>} : vector<2x16xf32>, vector<16x6xf32>, vector<2x6xf32> -> vector<2x6xf32>
    %c0_249 = arith.constant 0 : index
    %c0_250 = arith.constant 0 : index
    %574 = vector.load %arg39[%c0_249, %c0_250] : memref<1x6xf32, #tpu.memory_space<vmem>>, vector<1x6xf32>
    %575 = vector.broadcast %574 : vector<1x6xf32> to vector<2x6xf32>
    %576 = arith.addf %573, %575 : vector<2x6xf32>
    %577 = vector.broadcast %509 : vector<2x1xf32> to vector<2x6xf32>
    %578 = arith.addf %577, %576 : vector<2x6xf32>
    %cst_251 = arith.constant dense<0.000000e+00> : vector<2xf32>
    %579 = vector.multi_reduction <add>, %576, %cst_251 [1] : vector<2x6xf32> to vector<2xf32>
    %580 = vector.shape_cast %579 : vector<2xf32> to vector<2x1xf32>
    %cst_252 = arith.constant 6.000000e+00 : f32
    %581 = vector.broadcast %cst_252 : f32 to vector<2x1xf32>
    %582 = arith.divf %580, %581 : vector<2x1xf32>
    %583 = vector.broadcast %582 : vector<2x1xf32> to vector<2x6xf32>
    %584 = arith.subf %578, %583 : vector<2x6xf32>
    %cst_253 = arith.constant 0.000000e+00 : f32
    %585 = vector.broadcast %cst_253 : f32 to vector<2x121xf32>
    %586 = tpu.concatenate %584, %509, %585 in 1 : vector<2x6xf32>, vector<2x1xf32>, vector<2x121xf32> -> vector<2x128xf32>
    %c0_254 = arith.constant 0 : index
    %c0_255 = arith.constant 0 : index
    %587 = vector.load %arg40[%c0_254, %c0_255] : memref<2x128xf32, #tpu.memory_space<vmem>>, vector<2x128xf32>
    tpu.vector_store %arg40[%c0_254, %c0_255], %586 {strides = array<i32>} : memref<2x128xf32, #tpu.memory_space<vmem>>, vector<2x128xf32>,
    return
  }
}

</mosaic_0001>

<bundles_post_ra>
// kernel: tpu_custom_call.1
= control target key start
LH: loop header
LB: loop body
LE: loop exit
PB: predicated region body
PF: predicated region fallthrough
CT: control target
= control target key end

     0   :  { %s4576_s6 = smov 1   ;;  %s4577_s10 = smov 2   ;;  %s5342_s0 = inlined_call_operand.smem [shape: u32[41], index: -1, kind: input, shape index: {}] }
   0x1   :  { %s4644_s5 = sld [smem:[%s5342_s0]]   ;;  %s4578_s14 = smov 3  }
   0x2   :  { %s4649_s9 = sld [smem:[%s5342_s0 + %s4576_s6]]   ;;  %s4579_s18 = smov 4  }
   0x3   :  { %s4654_s13 = sld [smem:[%s5342_s0 + %s4577_s10]]   ;;  %s4580_s22 = smov 5  }
   0x4   :  { %s4659_s17 = sld [smem:[%s5342_s0 + %s4578_s14]]   ;;  %s4581_s26 = smov 6  }
   0x5   :  { %s4664_s21 = sld [smem:[%s5342_s0 + %s4579_s18]]   ;;  %s4582_s30 = smov 7  }
   0x6   :  { %s4669_s25 = sld [smem:[%s5342_s0 + %s4580_s22]]   ;;  %s4583_s4 = smov 8  }
   0x7   :  { %s4674_s29 = sld [smem:[%s5342_s0 + %s4581_s26]]   ;;  %s4584_s10 = smov 9  }
   0x8   :  { %s4679_s3 = sld [smem:[%s5342_s0 + %s4582_s30]]   ;;  %s4585_s15 = smov 10  }
   0x9   :  { %s4684_s8 = sld [smem:[%s5342_s0 + %s4583_s4]]   ;;  %s4586_s20 = smov 11  }
   0xa   :  { %s4689_s14 = sld [smem:[%s5342_s0 + %s4584_s10]]   ;;  %s4587_s26 = smov 12  }
   0xb   :  { %s4694_s19 = sld [smem:[%s5342_s0 + %s4585_s15]]   ;;  %s4588_s1 = smov 13  }
   0xc   :  { %s4699_s24 = sld [smem:[%s5342_s0 + %s4586_s20]]   ;;  %s4589_s7 = smov 14  }
   0xd   :  { %s4704_s30 = sld [smem:[%s5342_s0 + %s4587_s26]]   ;;  %s4590_s15 = smov 15  }
   0xe   :  { %s4709_s6 = sld [smem:[%s5342_s0 + %s4588_s1]]   ;;  %s4591_s22 = smov 16  }
   0xf   :  { %s4714_s12 = sld [smem:[%s5342_s0 + %s4589_s7]]   ;;  %s4592_s28 = smov 17  }
  0x10   :  { %s4719_s20 = sld [smem:[%s5342_s0 + %s4590_s15]]   ;;  %s4593_s7 = smov 18  }
  0x11   :  { %s4724_s27 = sld [smem:[%s5342_s0 + %s4591_s22]]   ;;  %s4594_s15 = smov 19  }
  0x12   :  { %s4729_s4 = sld [smem:[%s5342_s0 + %s4592_s28]]   ;;  %s4595_s22 = smov 20  }
  0x13   :  { %5354 = sst [smem:[#allocation6_spill]] %s4704_s30  ;;  %s4596_s28 = smov 21  }
  0x14   :  { %5355 = sst [smem:[#allocation7_spill]] %s4709_s6  ;;  %s4605_s10 = smov 30  }
  0x15   :  { %s4734_s6 = sld [smem:[%s5342_s0 + %s4593_s7]]   ;;  %s4597_s7 = smov 22  }
  0x16   :  { %5356 = sst [smem:[#allocation8_spill]] %s4719_s20  ;;  %s4606_s16 = smov 31  }
  0x17   :  { %5357 = sst [smem:[#allocation9_spill]] %s4724_s27  ;;  %s4607_s23 = smov 32  }
  0x18   :  { %5358 = sst [smem:[#allocation10_spill]] %s4729_s4  ;;  %s4608_s1 = smov 33  }
  0x19   :  { %s4739_s20 = sld [smem:[%s5342_s0 + %s4594_s15]]   ;;  %s4598_s15 = smov 23  }
  0x1a   :  { %s4744_s30 = sld [smem:[%s5342_s0 + %s4595_s22]]   ;;  %s4599_s22 = smov 24  }
  0x1b   :  { %5359 = sst [smem:[#allocation11_spill]] %s4734_s6 }
  0x1c   :  { %s4749_s4 = sld [smem:[%s5342_s0 + %s4596_s28]]   ;;  %s4600_s28 = smov 25  }
  0x1d   :  { %s4754_s6 = sld [smem:[%s5342_s0 + %s4597_s7]]   ;;  %s4601_s7 = smov 26  }
  0x1e   :  { %s4807_s27 = sld [smem:[%s5342_s0 + %s4608_s1]]   ;;  %s4612_s1 = smov 37  }
  0x1f   :  { %5360 = sst [smem:[#allocation12_spill]] %s4739_s20 }
  0x20   :  { %5361 = sst [smem:[#allocation13_spill]] %s4744_s30 }
  0x21   :  { %s4759_s20 = sld [smem:[%s5342_s0 + %s4598_s15]]   ;;  %s4602_s15 = smov 27  }
  0x22   :  { %5362 = sst [smem:[#allocation14_spill]] %s4749_s4 }
  0x23   :  { %5363 = sst [smem:[#allocation15_spill]] %s4754_s6 }
  0x24   :  { %s4764_s30 = sld [smem:[%s5342_s0 + %s4599_s22]]   ;;  %s4603_s22 = smov 28  }
  0x25   :  { %s4769_s4 = sld [smem:[%s5342_s0 + %s4600_s28]]   ;;  %s4604_s28 = smov 29  }
  0x26   :  { %s4774_s6 = sld [smem:[%s5342_s0 + %s4601_s7]]   ;;  %s4613_s7 = smov 38  }
  0x27   :  { %5364 = sst [smem:[#allocation16_spill]] %s4759_s20 }
  0x28   :  { %s4779_s20 = sld [smem:[%s5342_s0 + %s4602_s15]]  }
  0x29   :  { %5373 = sst [smem:[#allocation25_spill]] %s4807_s27 }
  0x2a   :  { %5365 = sst [smem:[#allocation17_spill]] %s4764_s30 }
  0x2b   :  { %5366 = sst [smem:[#allocation18_spill]] %s4769_s4 }
  0x2c   :  { %5367 = sst [smem:[#allocation19_spill]] %s4774_s6 }
  0x2d   :  { %s4784_s30 = sld [smem:[%s5342_s0 + %s4603_s22]]  }
  0x2e   :  { %5368 = sst [smem:[#allocation20_spill]] %s4779_s20 }
  0x2f   :  { %s3766_s4 = sld [smem:[%s5342_s0 + %s4604_s28]]  }
  0x30   :  { %s4792_s6 = sld [smem:[%s5342_s0 + %s4605_s10]]   ;;  %s4609_s10 = smov 34  }
  0x31   :  { %s4797_s20 = sld [smem:[%s5342_s0 + %s4606_s16]]   ;;  %s4610_s16 = smov 35  }
  0x33   :  { %5369 = sst [smem:[#allocation21_spill]] %s4784_s30 }
  0x34   :  { %s4802_s30 = sld [smem:[%s5342_s0 + %s4607_s23]]   ;;  %s4611_s23 = smov 36  }
  0x35   :  { %v86_v0 = vstv %s3766_s4  ;;  %s4822_s28 = sld [smem:[%s5342_s0 + %s4611_s23]]   ;;  %s4614_s4 = smov 39  }
  0x36   :  { %5370 = sst [smem:[#allocation22_spill]] %s4792_s6  ;;  %87 = vst [vmem:[#allocation2] sm:$0x1] %v86_v0  ;;  %s4615_s23 = smov 40  }
  0x37   :  { %5371 = sst [smem:[#allocation23_spill]] %s4797_s20 }
  0x38   :  { %s4812_s6 = sld [smem:[%s5342_s0 + %s4609_s10]]  }
  0x39   :  { %s4817_s20 = sld [smem:[%s5342_s0 + %s4610_s16]]  }
  0x3a   :  { %5372 = sst [smem:[#allocation24_spill]] %s4802_s30 }
  0x3b   :  { %5375 = sst [smem:[#allocation27_spill]] %s4822_s28 }
  0x3c   :  { %s4827_s10 = sld [smem:[%s5342_s0 + %s4612_s1]]  }
  0x3d   :  { %s4832_s16 = sld [smem:[%s5342_s0 + %s4613_s7]]  }
  0x3e   :  { %s4837_s22 = sld [smem:[%s5342_s0 + %s4614_s4]]  }
  0x3f   :  { %5374 = sst [smem:[#allocation26_spill]] %s4817_s20 }
  0x40   :  { %s4842_s20 = sld [smem:[%s5342_s0 + %s4615_s23]]  }
  0x41   :  { %v200_v1 = vld [vmem:[%s4644_s5] sm:$0xff]  ;;  %vm204_vm0 = vcmask 97280   ;;  %v201_v2 = vld [vmem:[%s4644_s5 + $0x8] sm:$0xff] }
  0x42   :  { %88 = vsyncpa [#allocation4], 0  ;;  %v205_v3 = vsel %vm204_vm0, %v200_v1, 0.0  ;;  %v208_v4 = vsel %vm204_vm0, %v201_v2, 0.0  ;;  %v249_v15 = vld [vmem:[%s4659_s17 + $0x8] sm:$0xf] }
  0x43   :  { %206 = vadd.xlane.f32.xlu0 %v205_v3  ;;  %vm263_vm1 = vcmask 1043456   ;;  %v248_v16 = vld [vmem:[%s4659_s17] sm:$0xff]  ;;  %vm344_vm2 = vcmask 261120   ;;  %v394_v50 = vld [vmem:[%s4684_s8 + $0x18] sm:$0xff]  ;;  %v393_v51 = vld [vmem:[%s4684_s8 + $0x10] sm:$0xff]  ;;  %vm489_vm3 = vcmask 64512  }
  0x44   :  { %4084 = vmatprep.subr.msk.mxu0 %vm263_vm1, %v249_v15  ;;  %v3778_v24 = vld [vmem:[%s4649_s9] ss:$0 sm:$0xff]  ;;  %4091 = vmatprep.subr.mxu1 %v394_v50  ;;  %v392_v52 = vld [vmem:[%s4684_s8 + $0x8] sm:$0xff]  ;;  %s4616_s0 = smov 96   ;;  %s4617_s5 = smov 120   ;;  %vm577_vm8 = vcmask 130048  }
  0x45   :  { %4085 = vmatpush3.msk.msra.mxu0 %vm263_vm1, %v249_v15  ;;  %v3779_v26 = vld [vmem:[%s4654_s13] ss:$0 sm:$0xff]  ;;  %4092 = vmatpush3.msra.mxu1 %v394_v50  ;;  %s4618_s9 = smov 88   ;;  %s4620_s13 = smov 64   ;;  %vm1351_vm9 = vcmask 195584   ;;  %vm4632_vm10 = vmmov 0  }
  0x46   :  { %4086 = vmatprep.subr.mxu0 %v248_v16  ;;  %v3780_v33 = vld [vmem:[%s4664_s21] ss:$0 sm:$0xff]  ;;  %4093 = vmatprep.subr.mxu1 %v393_v51  ;;  %s4621_s17 = smov 56   ;;  %s4622_s21 = smov 80   ;;  %vm3093_vm11 = vcmask 1041409   ;;  %vm3169_vm12 = vcmask 254976  }
  0x47   :  { %209 = vadd.xlane.f32.xlu0 %v208_v4  ;;  %4087 = vmatpush3.msra.mxu0 %v248_v16  ;;  %v391_v53 = vld [vmem:[%s4684_s8] sm:$0xff]  ;;  %s4626_s30 = smov 104   ;;  %s4627_s27 = smov 40   ;;  %vm3284_vm13 = vcmask 123904   ;;  %vm3709_vm14 = vcmask 41984   ;;  %vm3719_vm15 = vcmask 48128  }
  0x48   :  { %4094 = vmatpush3.msra.mxu1 %v393_v51  ;;  %v3784_v61 = vld [vmem:[%s4669_s25] ss:$0 sm:$0xff]  ;;  %s4623_s25 = smov 112   ;;  %s4628_s28 = smov 8  }
  0x49   :  { %4095 = vmatprep.subr.mxu1 %v392_v52  ;;  %v3785_v0 = vld [vmem:[%s4674_s29] ss:$0 sm:$0xff]  ;;  %s4624_s29 = smov 48   ;;  %s4629_s1 = smov 16  }
  0x4a   :  { %4096 = vmatpush3.msra.mxu1 %v392_v52  ;;  %s4630_s2 = smov 24   ;;  %s5376_s7 = sld [smem:[#allocation9_spill]] }
  0x4b   :  { %4097 = vmatprep.subr.mxu1 %v391_v53  ;;  %s5377_s11 = sld [smem:[#allocation6_spill]] }
  0x4c   :  { %4098 = vmatpush3.msra.mxu1 %v391_v53  ;;  %s5378_s4 = sld [smem:[#allocation7_spill]] }
  0x4d   :  { %s5379_s15 = sld [smem:[#allocation8_spill]] }
  0x4e   :  { %s5380_s18 = sld [smem:[#allocation10_spill]] }
  0x4f   :  { %s5381_s23 = sld [smem:[#allocation11_spill]] }
  0x50   :  { %s5382_s26 = sld [smem:[#allocation12_spill]] }
  0xcc   :  { %v207_v5 = vpop.xlane.xlu0 %206 }
  0xcd   :  { %v212_v6 = vmul.f32 0.083333336, %v207_v5 }
  0xcf   :  { %v214_v7 = vsub.f32 %v200_v1, %v212_v6  ;;  %v388_v6 = vld [vmem:[%s4679_s3] sm:$0xff]  ;;  %s4625_s3 = smov 72  }
  0xd0   :  { %v210_v8 = vpop.xlane.xlu0 %209 }
  0xd1   :  { %v213_v9 = vmul.f32 0.083333336, %v210_v8  ;;  %v216_v10 = vmul.f32 %v214_v7, %v214_v7 }
  0xd3   :  { %v215_v11 = vsub.f32 %v201_v2, %v213_v9  ;;  %v218_v12 = vsel %vm204_vm0, %v216_v10, 0.0  ;;  %v3786_v9 = vld [vmem:[%s4689_s14] ss:$0 sm:$0xff] }
  0xd4   :  { %219 = vadd.xlane.f32.xlu1 %v218_v12 }
  0xd5   :  { %v217_v13 = vmul.f32 %v215_v11, %v215_v11 }
  0xd7   :  { %v221_v14 = vsel %vm204_vm0, %v217_v13, 0.0 }
  0xd8   :  { %222 = vadd.xlane.f32.xlu1 %v221_v14 }
 0x15d   :  { %v220_v17 = vpop.xlane.xlu1 %219 }
 0x15e   :  { %v224_v18 = vmul.f32 0.083333336, %v220_v17 }
 0x160   :  { %v226_v19 = vadd.f32 1e-05, %v224_v18 }
 0x161   :  { %v223_v20 = vpop.xlane.xlu1 %222 }
 0x162   :  { %4458 = vrsqrt.f32 %v226_v19  ;;  %v225_v21 = vmul.f32 0.083333336, %v223_v20  ;;  %v172_v20 = vlaneseq }
 0x164   :  { %v227_v22 = vadd.f32 1e-05, %v225_v21  ;;  %v173_v21 = vand.u32 127, %v172_v20 }
 0x166   :  { %4460 = vrsqrt.f32 %v227_v22  ;;  %vm191_vm4 = vcmp.ge.s32.totalorder %v173_v21, 8  ;;  %vm192_vm5 = vcmp.lt.s32.totalorder %v173_v21, 16  ;;  %vm181_vm7 = vcmp.lt.s32.totalorder %v173_v21, 8 }
 0x167   :  { %vm193_vm6 = vmand %vm191_vm4, %vm192_vm5 }
 0x16f   :  { %v4459_v23 = vpop.eup %4458 }
 0x170   :  { %v230_v25 = vmul.f32 %v4459_v23, %v214_v7  ;;  %v4619_v23 = vmov -1e+30  }
 0x172   :  { %v238_v27 = vmul.f32 %v3778_v24, %v230_v25 }
 0x173   :  { %v4461_v28 = vpop.eup %4460 }
 0x174   :  { %v231_v29 = vmul.f32 %v4461_v28, %v215_v11  ;;  %v246_v30 = vadd.f32 %v3779_v26, %v238_v27  ;;  %v4909_v27 = vsel %vm181_vm7, 0.0, %v4619_v23 }
 0x176   :  { %v239_v31 = vmul.f32 %v3778_v24, %v231_v29  ;;  %4088 = vmatprep.mubr.msk.f32.mxu0 %vm204_vm0, %v246_v30  ;;  %v4907_v24 = vsel %vm193_vm6, 0.0, %v4619_v23 }
 0x178   :  { %v247_v32 = vadd.f32 %v3779_v26, %v239_v31 }
 0x17a   :  { %4089 = vmatmul.mubr.msk.f32.vlgmr.msra.gmra.mxu0 %vm204_vm0, %v247_v32  ;;  %vm3721_vm0 = vcmask 56320  }
 0x23a   :  { %v4090_v34 = vpop.f32.mrf.mxu0 }
 0x23b   :  { %v339_v35 = vadd.f32 %v4090_v34, %v3780_v33 }
 0x23c   :  { %v333_v36 = vpop.f32.mrf.mxu0 }
 0x23d   :  { %v334_v37 = vadd.f32 %v3780_v33, %v333_v36  ;;  %v348_v38 = vsel %vm344_vm2, %v339_v35, 0.0 }
 0x23e   :  { %349 = vadd.xlane.f32.xlu1 %v348_v38 }
 0x23f   :  { %v345_v39 = vsel %vm344_vm2, %v334_v37, 0.0 }
 0x240   :  { %346 = vadd.xlane.f32.xlu0 %v345_v39 }
 0x2c7   :  { %v350_v40 = vpop.xlane.xlu1 %349 }
 0x2c8   :  { %v353_v41 = vmul.f32 0.03125, %v350_v40 }
 0x2c9   :  { %v347_v42 = vpop.xlane.xlu0 %346 }
 0x2ca   :  { %v355_v43 = vsub.f32 %v339_v35, %v353_v41  ;;  %v352_v44 = vmul.f32 0.03125, %v347_v42 }
 0x2cc   :  { %v354_v45 = vsub.f32 %v334_v37, %v352_v44  ;;  %v357_v46 = vmul.f32 %v355_v43, %v355_v43 }
 0x2ce   :  { %v361_v47 = vsel %vm344_vm2, %v357_v46, 0.0  ;;  %v356_v48 = vmul.f32 %v354_v45, %v354_v45 }
 0x2cf   :  { %362 = vadd.xlane.f32.xlu1 %v361_v47 }
 0x2d0   :  { %v358_v49 = vsel %vm344_vm2, %v356_v48, 0.0 }
 0x2d1   :  { %359 = vadd.xlane.f32.xlu0 %v358_v49 }
 0x358   :  { %v363_v54 = vpop.xlane.xlu1 %362 }
 0x359   :  { %v365_v55 = vmul.f32 0.03125, %v363_v54 }
 0x35a   :  { %v360_v56 = vpop.xlane.xlu0 %359 }
 0x35b   :  { %v367_v57 = vadd.f32 1e-05, %v365_v55  ;;  %v364_v58 = vmul.f32 0.03125, %v360_v56 }
 0x35d   :  { %4462 = vrsqrt.f32 %v367_v57  ;;  %v366_v59 = vadd.f32 1e-05, %v364_v58 }
 0x35f   :  { %4464 = vrsqrt.f32 %v366_v59 }
 0x36a   :  { %v4463_v60 = vpop.eup %4462 }
 0x36b   :  { %v371_v62 = vmul.f32 %v4463_v60, %v355_v43 }
 0x36c   :  { %v4465_v63 = vpop.eup %4464 }
 0x36d   :  { %v370_v1 = vmul.f32 %v4465_v63, %v354_v45  ;;  %v379_v2 = vmul.f32 %v3784_v61, %v371_v62 }
 0x36f   :  { %v378_v3 = vmul.f32 %v3784_v61, %v370_v1  ;;  %v387_v4 = vadd.f32 %v3785_v0, %v379_v2 }
 0x371   :  { %v386_v5 = vadd.f32 %v3785_v0, %v378_v3  ;;  %v4870_v8 = vadd.f32 %v388_v6, %v387_v4 }
 0x373   :  { %v4868_v7 = vadd.f32 %v388_v6, %v386_v5 }
 0x375   :  { %4099 = vmatprep.mubr.msk.f32.mxu1 %vm344_vm2, %v4868_v7 }
 0x376   :  { %4100 = vmatmul.mubr.msk.f32.vlgmr.msra.gmra.mxu1 %vm344_vm2, %v4870_v8 }
 0x436   :  { %v4101_v10 = vpop.f32.mrf.mxu1 }
 0x437   :  { %v4877_v11 = vadd.f32 %v4101_v10, %v3786_v9 }
 0x438   :  { %v474_v12 = vpop.f32.mrf.mxu1 }
 0x439   :  { %v4879_v13 = vadd.f32 %v3786_v9, %v474_v12  ;;  %487 = vrot.lane.b32.xlu0 %v4877_v11, %s4616_s0 }
 0x43b   :  { %485 = vrot.lane.b32.xlu1 %v4879_v13, %s4616_s0  ;;  %4106 = vmatprep.mubr.msk.f32.mxu0 %vm489_vm3, %v4879_v13 }
 0x43d   :  { %693 = vrot.lane.b32.xlu0 %v4879_v13, %s4617_s5 }
 0x43f   :  { %699 = vrot.lane.b32.xlu1 %v4877_v11, %s4618_s9 }
 0x443   :  { %697 = vrot.lane.b32.xlu1 %v4879_v13, %s4618_s9 }
 0x447   :  { %695 = vrot.lane.b32.xlu1 %v4877_v11, %s4617_s5 }
 0x4ab   :  { %v488_v14 = vpop.permute.xlu0 %487 }
 0x4ac   :  { %4102 = vmatprep.subr.msk.mxu0 %vm489_vm3, %v488_v14 }
 0x4ad   :  { %4103 = vmatpush3.xpose.msk.msra.mxu0 %vm489_vm3, %v488_v14  ;;  %v486_v15 = vpop.permute.xlu1 %485 }
 0x4ae   :  { %4104 = vmatprep.subr.msk.mxu0 %vm489_vm3, %v486_v15 }
 0x4af   :  { %v694_v17 = vpop.permute.xlu0 %693 }
 0x4b1   :  { %4105 = vmatpush3.xpose.msk.msra.mxu0 %vm489_vm3, %v486_v15  ;;  %v700_v16 = vpop.permute.xlu1 %699 }
 0x4b2   :  { %4116 = vmatprep.subr.msk.mxu0 %vm489_vm3, %v700_v16 }
 0x4b4   :  { %4107 = vmatmul.mubr.msk.f32.vlgmr.msra.gmra.mxu0 %vm489_vm3, %v4877_v11 }
 0x4b5   :  { %v698_v18 = vpop.permute.xlu1 %697  ;;  %4117 = vmatpush3.xpose.msk.msra.mxu0 %vm489_vm3, %v700_v16  ;;  %4120 = vmatprep.mubr.msk.f32.mxu0 %vm489_vm3, %v694_v17 }
 0x4b6   :  { %4118 = vmatprep.subr.msk.mxu0 %vm489_vm3, %v698_v18 }
 0x4b9   :  { %4119 = vmatpush3.xpose.msk.msra.mxu0 %vm489_vm3, %v698_v18  ;;  %v696_v19 = vpop.permute.xlu1 %695 }
 0x4bc   :  { %4121 = vmatmul.mubr.msk.f32.vlgmr.msra.gmra.mxu0 %vm489_vm3, %v696_v19 }
 0x574   :  { %v4108_v22 = vpop.f32.mrf.mxu0 }
 0x575   :  { %v574_v25 = vmul.f32 0.35355338, %v4108_v22 }
 0x576   :  { %v564_v26 = vpop.f32.mrf.mxu0 }
 0x577   :  { %v573_v28 = vmul.f32 0.35355338, %v564_v26  ;;  %v576_v29 = vadd.f32 %v574_v25, %v4907_v24 }
 0x579   :  { %v581_v30 = vsel %vm577_vm8, %v576_v29, -inf  ;;  %v575_v31 = vadd.f32 %v573_v28, %v4909_v27 }
 0x57a   :  { %582 = vmax.xlane.f32.xlu1 %v581_v30 }
 0x57b   :  { %v578_v32 = vsel %vm577_vm8, %v575_v31, -inf }
 0x57c   :  { %v4122_v33 = vpop.f32.mrf.mxu0  ;;  %579 = vmax.xlane.f32.xlu0 %v578_v32 }
 0x57d   :  { %v785_v35 = vmul.f32 0.35355338, %v4122_v33 }
 0x57e   :  { %v775_v34 = vpop.f32.mrf.mxu0 }
 0x57f   :  { %v784_v36 = vmul.f32 0.35355338, %v775_v34  ;;  %v787_v39 = vadd.f32 %v785_v35, %v4907_v24 }
 0x581   :  { %v786_v37 = vadd.f32 %v784_v36, %v4909_v27  ;;  %v791_v40 = vsel %vm577_vm8, %v787_v39, -inf }
 0x583   :  { %v788_v38 = vsel %vm577_vm8, %v786_v37, -inf }
 0x584   :  { %789 = vmax.xlane.f32.xlu0 %v788_v38 }
 0x588   :  { %792 = vmax.xlane.f32.xlu0 %v791_v40 }
 0x603   :  { %v583_v41 = vpop.xlane.xlu1 %582 }
 0x604   :  { %v585_v42 = vsub.f32 %v576_v29, %v583_v41 }
 0x605   :  { %v580_v43 = vpop.xlane.xlu0 %579 }
 0x606   :  { %v588_v44 = vmul.f32 1.442695, %v585_v42  ;;  %v584_v45 = vsub.f32 %v575_v31, %v580_v43 }
 0x608   :  { %4466 = vpow2.f32 %v588_v44  ;;  %v586_v46 = vmul.f32 1.442695, %v584_v45 }
 0x60a   :  { %4468 = vpow2.f32 %v586_v46 }
 0x60d   :  { %v790_v47 = vpop.xlane.xlu0 %789 }
 0x60e   :  { %v794_v48 = vsub.f32 %v786_v37, %v790_v47 }
 0x610   :  { %v796_v49 = vmul.f32 1.442695, %v794_v48 }
 0x611   :  { %v793_v50 = vpop.xlane.xlu0 %792 }
 0x612   :  { %4470 = vpow2.f32 %v796_v49  ;;  %v795_v51 = vsub.f32 %v787_v39, %v793_v50 }
 0x614   :  { %v798_v52 = vmul.f32 1.442695, %v795_v51 }
 0x615   :  { %v4467_v53 = vpop.eup %4466 }
 0x616   :  { %4472 = vpow2.f32 %v798_v52  ;;  %v593_v54 = vsel %vm577_vm8, %v4467_v53, 0.0 }
 0x617   :  { %v4469_v55 = vpop.eup %4468  ;;  %594 = vadd.xlane.f32.xlu1 %v593_v54 }
 0x618   :  { %v590_v56 = vsel %vm577_vm8, %v4469_v55, 0.0 }
 0x619   :  { %591 = vadd.xlane.f32.xlu0 %v590_v56 }
 0x61f   :  { %v4471_v57 = vpop.eup %4470 }
 0x620   :  { %v800_v58 = vsel %vm577_vm8, %v4471_v57, 0.0 }
 0x621   :  { %801 = vadd.xlane.f32.xlu0 %v800_v58 }
 0x623   :  { %v4473_v59 = vpop.eup %4472 }
 0x624   :  { %v803_v60 = vsel %vm577_vm8, %v4473_v59, 0.0 }
 0x625   :  { %804 = vadd.xlane.f32.xlu1 %v803_v60 }
 0x636   :  { %606 = vrot.lane.b32.xlu1 %v4879_v13, %s4620_s13 }
 0x637   :  { %608 = vrot.lane.b32.xlu0 %v4877_v11, %s4620_s13 }
 0x63a   :  { %818 = vrot.lane.b32.xlu1 %v4877_v11, %s4621_s17 }
 0x63b   :  { %909 = vrot.lane.b32.xlu0 %v4877_v11, %s4622_s21 }
 0x63e   :  { %816 = vrot.lane.b32.xlu1 %v4879_v13, %s4621_s17 }
 0x63f   :  { %903 = vrot.lane.b32.xlu0 %v4879_v13, %s4623_s25 }
 0x642   :  { %907 = vrot.lane.b32.xlu1 %v4879_v13, %s4622_s21 }
 0x646   :  { %905 = vrot.lane.b32.xlu1 %v4877_v11, %s4623_s25 }
 0x6a0   :  { %v595_v61 = vpop.xlane.xlu1 %594 }
 0x6a1   :  { %4474 = vrcp.f32 %v595_v61 }
 0x6a2   :  { %v592_v62 = vpop.xlane.xlu0 %591 }
 0x6a3   :  { %4476 = vrcp.f32 %v592_v62 }
 0x6aa   :  { %v802_v63 = vpop.xlane.xlu0 %801 }
 0x6ab   :  { %4478 = vrcp.f32 %v802_v63 }
 0x6ae   :  { %v4475_v0 = vpop.eup %4474  ;;  %v805_v1 = vpop.xlane.xlu1 %804 }
 0x6af   :  { %v609_v2 = vpop.permute.xlu0 %608  ;;  %v599_v3 = vmul.f32 %v4475_v0, %v595_v61  ;;  %4480 = vrcp.f32 %v805_v1 }
 0x6b0   :  { %4109 = vmatprep.subr.mxu1 %v609_v2  ;;  %v4477_v4 = vpop.eup %4476 }
 0x6b1   :  { %4110 = vmatpush3.msra.mxu1 %v609_v2  ;;  %v601_v5 = vsub.f32 2.0, %v599_v3  ;;  %v598_v6 = vmul.f32 %v4477_v4, %v592_v62 }
 0x6b2   :  { %v607_v9 = vpop.permute.xlu1 %606 }
 0x6b3   :  { %v600_v10 = vsub.f32 2.0, %v598_v6  ;;  %4111 = vmatprep.subr.mxu1 %v607_v9  ;;  %v603_v12 = vmul.f32 %v4475_v0, %v601_v5  ;;  %v910_v26 = vpop.permute.xlu0 %909 }
 0x6b4   :  { %4112 = vmatpush3.msra.mxu1 %v607_v9 }
 0x6b5   :  { %v602_v14 = vmul.f32 %v4477_v4, %v600_v10  ;;  %v605_v18 = vmul.f32 %v4467_v53, %v603_v12 }
 0x6b6   :  { %v819_v15 = vpop.permute.xlu1 %818 }
 0x6b7   :  { %4123 = vmatprep.subr.mxu1 %v819_v15  ;;  %v604_v16 = vmul.f32 %v4469_v55, %v602_v14  ;;  %v904_v32 = vpop.permute.xlu0 %903 }
 0x6b8   :  { %v4479_v17 = vpop.eup %4478 }
 0x6b9   :  { %v808_v19 = vmul.f32 %v4479_v17, %v802_v63  ;;  %4113 = vmatprep.mubr.msk.f32.mxu1 %vm577_vm8, %v604_v16 }
 0x6ba   :  { %v817_v20 = vpop.permute.xlu1 %816  ;;  %4114 = vmatmul.mubr.msk.f32.vlgmr.msra.gmra.mxu1 %vm577_vm8, %v605_v18 }
 0x6bb   :  { %v810_v21 = vsub.f32 2.0, %v808_v19  ;;  %4124 = vmatpush3.msra.mxu1 %v819_v15 }
 0x6bc   :  { %v4481_v22 = vpop.eup %4480  ;;  %4125 = vmatprep.subr.mxu1 %v817_v20 }
 0x6bd   :  { %v812_v23 = vmul.f32 %v4479_v17, %v810_v21  ;;  %v809_v25 = vmul.f32 %v4481_v22, %v805_v1  ;;  %4126 = vmatpush3.msra.mxu1 %v817_v20 }
 0x6be   :  { %4130 = vmatprep.subr.msk.mxu1 %vm489_vm3, %v910_v26  ;;  %v908_v33 = vpop.permute.xlu1 %907 }
 0x6bf   :  { %v811_v28 = vsub.f32 2.0, %v809_v25  ;;  %v814_v29 = vmul.f32 %v4471_v57, %v812_v23 }
 0x6c1   :  { %v813_v30 = vmul.f32 %v4481_v22, %v811_v28  ;;  %4127 = vmatprep.mubr.msk.f32.mxu1 %vm577_vm8, %v814_v29 }
 0x6c2   :  { %v906_v34 = vpop.permute.xlu1 %905 }
 0x6c3   :  { %v815_v31 = vmul.f32 %v4473_v59, %v813_v30 }
 0x6c5   :  { %4128 = vmatmul.mubr.msk.f32.vlgmr.msra.gmra.mxu1 %vm577_vm8, %v815_v31 }
 0x6c6   :  { %4131 = vmatpush3.xpose.msk.msra.mxu1 %vm489_vm3, %v910_v26  ;;  %4134 = vmatprep.mubr.msk.f32.mxu1 %vm489_vm3, %v904_v32 }
 0x6c7   :  { %4132 = vmatprep.subr.msk.mxu1 %vm489_vm3, %v908_v33 }
 0x6ca   :  { %4133 = vmatpush3.xpose.msk.msra.mxu1 %vm489_vm3, %v908_v33 }
 0x6cd   :  { %4135 = vmatmul.mubr.msk.f32.vlgmr.msra.gmra.mxu1 %vm489_vm3, %v906_v34 }
 0x77a   :  { %v4949_v35 = vpop.f32.mrf.mxu1 }
 0x77c   :  { %v4951_v36 = vpop.f32.mrf.mxu1 }
 0x785   :  { %v4953_v37 = vpop.f32.mrf.mxu1 }
 0x787   :  { %v4955_v38 = vpop.f32.mrf.mxu1 }
 0x78d   :  { %v4136_v39 = vpop.f32.mrf.mxu1 }
 0x78e   :  { %v995_v40 = vmul.f32 0.35355338, %v4136_v39 }
 0x78f   :  { %v985_v41 = vpop.f32.mrf.mxu1 }
 0x790   :  { %v994_v42 = vmul.f32 0.35355338, %v985_v41  ;;  %v997_v43 = vadd.f32 %v995_v40, %v4907_v24 }
 0x792   :  { %v1001_v44 = vsel %vm577_vm8, %v997_v43, -inf  ;;  %v996_v45 = vadd.f32 %v994_v42, %v4909_v27 }
 0x793   :  { %1002 = vmax.xlane.f32.xlu1 %v1001_v44 }
 0x794   :  { %v998_v46 = vsel %vm577_vm8, %v996_v45, -inf }
 0x795   :  { %999 = vmax.xlane.f32.xlu0 %v998_v46 }
 0x7a4   :  { %1026 = vrot.lane.b32.xlu1 %v4879_v13, %s4624_s29 }
 0x7a8   :  { %1119 = vrot.lane.b32.xlu1 %v4877_v11, %s4625_s3 }
 0x7ac   :  { %1117 = vrot.lane.b32.xlu1 %v4879_v13, %s4625_s3 }
 0x7b0   :  { %1115 = vrot.lane.b32.xlu1 %v4877_v11, %s4626_s30 }
 0x81c   :  { %v1003_v47 = vpop.xlane.xlu1 %1002 }
 0x81d   :  { %v1005_v48 = vsub.f32 %v997_v43, %v1003_v47 }
 0x81e   :  { %v1000_v49 = vpop.xlane.xlu0 %999 }
 0x81f   :  { %v1008_v50 = vmul.f32 1.442695, %v1005_v48  ;;  %v1004_v51 = vsub.f32 %v996_v45, %v1000_v49 }
 0x820   :  { %v1027_v59 = vpop.permute.xlu1 %1026 }
 0x821   :  { %4482 = vpow2.f32 %v1008_v50  ;;  %v1006_v52 = vmul.f32 1.442695, %v1004_v51  ;;  %v1357_v51 = vld [vmem:[%s4694_s19 + $0x18] sm:$0xff] }
 0x823   :  { %4484 = vpow2.f32 %v1006_v52  ;;  %v1356_v52 = vld [vmem:[%s4694_s19 + $0x10] sm:$0xff] }
 0x824   :  { %v1120_v61 = vpop.permute.xlu1 %1119 }
 0x828   :  { %v1118_v12 = vpop.permute.xlu1 %1117 }
 0x82c   :  { %v1116_v14 = vpop.permute.xlu1 %1115 }
 0x82e   :  { %v4483_v53 = vpop.eup %4482 }
 0x82f   :  { %v1013_v54 = vsel %vm577_vm8, %v4483_v53, 0.0 }
 0x830   :  { %v4485_v55 = vpop.eup %4484  ;;  %1014 = vadd.xlane.f32.xlu0 %v1013_v54  ;;  %v1354_v54 = vld [vmem:[%s4694_s19] sm:$0xff] }
 0x831   :  { %v1010_v56 = vsel %vm577_vm8, %v4485_v55, 0.0 }
 0x834   :  { %1011 = vadd.xlane.f32.xlu0 %v1010_v56 }
 0x84a   :  { %1028 = vrot.lane.b32.xlu0 %v4877_v11, %s4624_s29 }
 0x84e   :  { %1113 = vrot.lane.b32.xlu0 %v4879_v13, %s4626_s30 }
 0x8b9   :  { %v1015_v57 = vpop.xlane.xlu0 %1014 }
 0x8ba   :  { %4486 = vrcp.f32 %v1015_v57 }
 0x8bd   :  { %v1012_v58 = vpop.xlane.xlu0 %1011 }
 0x8be   :  { %4488 = vrcp.f32 %v1012_v58 }
 0x8c1   :  { %v1029_v60 = vpop.permute.xlu0 %1028 }
 0x8c2   :  { %4137 = vmatprep.subr.mxu0 %v1029_v60 }
 0x8c3   :  { %4138 = vmatpush3.msra.mxu0 %v1029_v60 }
 0x8c4   :  { %4139 = vmatprep.subr.mxu0 %v1027_v59 }
 0x8c5   :  { %4140 = vmatpush3.msra.mxu0 %v1027_v59  ;;  %v1114_v10 = vpop.permute.xlu0 %1113 }
 0x8c6   :  { %4144 = vmatprep.subr.msk.mxu0 %vm489_vm3, %v1120_v61 }
 0x8c7   :  { %v4487_v62 = vpop.eup %4486 }
 0x8c8   :  { %v1019_v63 = vmul.f32 %v4487_v62, %v1015_v57 }
 0x8ca   :  { %v1021_v1 = vsub.f32 2.0, %v1019_v63 }
 0x8cb   :  { %v4489_v0 = vpop.eup %4488 }
 0x8cc   :  { %v1018_v2 = vmul.f32 %v4489_v0, %v1012_v58  ;;  %v1023_v4 = vmul.f32 %v4487_v62, %v1021_v1 }
 0x8ce   :  { %v1020_v3 = vsub.f32 2.0, %v1018_v2  ;;  %v1025_v9 = vmul.f32 %v4483_v53, %v1023_v4  ;;  %v1355_v53 = vld [vmem:[%s4694_s19 + $0x8] sm:$0xff] }
 0x8d0   :  { %v1022_v5 = vmul.f32 %v4489_v0, %v1020_v3 }
 0x8d2   :  { %v1024_v6 = vmul.f32 %v4485_v55, %v1022_v5  ;;  %v3813_v5 = vld [vmem:[%s4699_s24] ss:$0 sm:$0xff] }
 0x8d4   :  { %4141 = vmatprep.mubr.msk.f32.mxu0 %vm577_vm8, %v1024_v6 }
 0x8d5   :  { %4142 = vmatmul.mubr.msk.f32.vlgmr.msra.gmra.mxu0 %vm577_vm8, %v1025_v9 }
 0x8d6   :  { %4145 = vmatpush3.xpose.msk.msra.mxu0 %vm489_vm3, %v1120_v61  ;;  %4148 = vmatprep.mubr.msk.f32.mxu0 %vm489_vm3, %v1114_v10 }
 0x8d7   :  { %4146 = vmatprep.subr.msk.mxu0 %vm489_vm3, %v1118_v12 }
 0x8da   :  { %4147 = vmatpush3.xpose.msk.msra.mxu0 %vm489_vm3, %v1118_v12 }
 0x8dd   :  { %4149 = vmatmul.mubr.msk.f32.vlgmr.msra.gmra.mxu0 %vm489_vm3, %v1116_v14 }
 0x995   :  { %v4143_v15 = vpop.f32.mrf.mxu0 }
 0x997   :  { %v1104_v16 = vpop.f32.mrf.mxu0 }
 0x99d   :  { %v4150_v17 = vpop.f32.mrf.mxu0 }
 0x99e   :  { %v1205_v18 = vmul.f32 0.35355338, %v4150_v17 }
 0x99f   :  { %v1195_v19 = vpop.f32.mrf.mxu0 }
 0x9a0   :  { %v1204_v20 = vmul.f32 0.35355338, %v1195_v19  ;;  %v1207_v21 = vadd.f32 %v1205_v18, %v4907_v24 }
 0x9a2   :  { %v1211_v22 = vsel %vm577_vm8, %v1207_v21, -inf  ;;  %v1206_v23 = vadd.f32 %v1204_v20, %v4909_v27 }
 0x9a3   :  { %1212 = vmax.xlane.f32.xlu1 %v1211_v22 }
 0x9a4   :  { %v1208_v25 = vsel %vm577_vm8, %v1206_v23, -inf }
 0x9a5   :  { %1209 = vmax.xlane.f32.xlu0 %v1208_v25  ;;  %v1495_v25 = vld [vmem:[%s4714_s12 + $0x18] sm:$0xff] }
 0x9a6   :  { %4169 = vmatprep.subr.mxu0 %v1495_v25 }
 0x9a7   :  { %4170 = vmatpush3.msra.mxu0 %v1495_v25  ;;  %v3827_v25 = vld [vmem:[%s4684_s8 + $0x38] sm:$0xff] }
 0x9b4   :  { %1236 = vrot.lane.b32.xlu1 %v4879_v13, %s4627_s27 }
 0x9b8   :  { %1325 = vrot.lane.b32.xlu1 %v4955_v38, %s4628_s28 }
 0x9bc   :  { %1327 = vrot.lane.b32.xlu1 %v4953_v37, %s4628_s28 }
 0x9c0   :  { %1335 = vrot.lane.b32.xlu1 %v4143_v15, %s4629_s1 }
 0xa2c   :  { %v1213_v26 = vpop.xlane.xlu1 %1212 }
 0xa2d   :  { %v1215_v28 = vsub.f32 %v1207_v21, %v1213_v26  ;;  %v1494_v26 = vld [vmem:[%s4714_s12 + $0x10] sm:$0xff] }
 0xa2e   :  { %v1210_v29 = vpop.xlane.xlu0 %1209  ;;  %4171 = vmatprep.subr.mxu0 %v1494_v26 }
 0xa2f   :  { %v1218_v30 = vmul.f32 1.442695, %v1215_v28  ;;  %v1214_v31 = vsub.f32 %v1206_v23, %v1210_v29  ;;  %v1493_v28 = vld [vmem:[%s4714_s12 + $0x8] sm:$0xff]  ;;  %4172 = vmatpush3.msra.mxu0 %v1494_v26  ;;  %v1492_v29 = vld [vmem:[%s4714_s12] sm:$0xff]  ;;  %v3826_v26 = vld [vmem:[%s4684_s8 + $0x30] sm:$0xff] }
 0xa30   :  { %v1237_v41 = vpop.permute.xlu1 %1236  ;;  %4173 = vmatprep.subr.mxu0 %v1493_v28 }
 0xa31   :  { %4490 = vpow2.f32 %v1218_v30  ;;  %v1216_v32 = vmul.f32 1.442695, %v1214_v31  ;;  %4174 = vmatpush3.msra.mxu0 %v1493_v28  ;;  %v1601_v30 = vld [vmem:[%s5376_s7 + $0x78] sm:$0xff]  ;;  %v1600_v31 = vld [vmem:[%s5376_s7 + $0x70] sm:$0xff]  ;;  %v3825_v28 = vld [vmem:[%s4684_s8 + $0x28] sm:$0xff] }
 0xa32   :  { %4175 = vmatprep.subr.mxu0 %v1492_v29 }
 0xa33   :  { %4492 = vpow2.f32 %v1216_v32  ;;  %4176 = vmatpush3.msra.mxu0 %v1492_v29  ;;  %v1599_v32 = vld [vmem:[%s5376_s7 + $0x68] sm:$0xff]  ;;  %v3824_v29 = vld [vmem:[%s4684_s8 + $0x20] sm:$0xff]  ;;  %s5383_s8 = sld [smem:[#allocation13_spill]] }
 0xa34   :  { %v1326_v57 = vpop.permute.xlu1 %1325  ;;  %4215 = vmatprep.subr.mxu0 %v3827_v25 }
 0xa35   :  { %v1347_v61 = vsel %vm489_vm3, %v4951_v36, %v1326_v57 }
 0xa38   :  { %v1328_v58 = vpop.permute.xlu1 %1327 }
 0xa39   :  { %v1348_v63 = vsel %vm489_vm3, %v4949_v35, %v1328_v58  ;;  %v1589_v58 = vld [vmem:[%s5376_s7 + $0x18] sm:$0xff] }
 0xa3c   :  { %v1336_v59 = vpop.permute.xlu1 %1335 }
 0xa3d   :  { %v1350_v2 = vsel %vm577_vm8, %v1348_v63, %v1336_v59  ;;  %v1588_v59 = vld [vmem:[%s5376_s7 + $0x10] sm:$0xff] }
 0xa3e   :  { %v4491_v33 = vpop.eup %4490 }
 0xa3f   :  { %v1223_v13 = vsel %vm577_vm8, %v4491_v33, 0.0 }
 0xa40   :  { %v4493_v34 = vpop.eup %4492  ;;  %1224 = vadd.xlane.f32.xlu0 %v1223_v13  ;;  %v1597_v13 = vld [vmem:[%s5376_s7 + $0x58] sm:$0xff] }
 0xa41   :  { %v1220_v38 = vsel %vm577_vm8, %v4493_v34, 0.0 }
 0xa44   :  { %1221 = vadd.xlane.f32.xlu0 %v1220_v38  ;;  %v1595_v38 = vld [vmem:[%s5376_s7 + $0x48] sm:$0xff] }
 0xa5a   :  { %1238 = vrot.lane.b32.xlu0 %v4877_v11, %s4627_s27 }
 0xa5e   :  { %1333 = vrot.lane.b32.xlu0 %v1104_v16, %s4629_s1 }
 0xac9   :  { %v1225_v37 = vpop.xlane.xlu0 %1224 }
 0xaca   :  { %4494 = vrcp.f32 %v1225_v37 }
 0xacd   :  { %v1222_v39 = vpop.xlane.xlu0 %1221 }
 0xace   :  { %4496 = vrcp.f32 %v1222_v39 }
 0xad1   :  { %v1239_v40 = vpop.permute.xlu0 %1238 }
 0xad2   :  { %4151 = vmatprep.subr.mxu1 %v1239_v40 }
 0xad3   :  { %4152 = vmatpush3.msra.mxu1 %v1239_v40  ;;  %v1592_v40 = vld [vmem:[%s5376_s7 + $0x30] sm:$0xff] }
 0xad4   :  { %4153 = vmatprep.subr.mxu1 %v1237_v41 }
 0xad5   :  { %4154 = vmatpush3.msra.mxu1 %v1237_v41  ;;  %v1334_v60 = vpop.permute.xlu0 %1333  ;;  %v1591_v41 = vld [vmem:[%s5376_s7 + $0x28] sm:$0xff] }
 0xad6   :  { %4158 = vmatprep.subr.mxu1 %v1357_v51  ;;  %v1349_v0 = vsel %vm577_vm8, %v1347_v61, %v1334_v60  ;;  %v1587_v60 = vld [vmem:[%s5376_s7 + $0x8] sm:$0xff]  ;;  %v1586_v61 = vld [vmem:[%s5376_s7] sm:$0xff] }
 0xad7   :  { %v4495_v42 = vpop.eup %4494 }
 0xad8   :  { %v1229_v43 = vmul.f32 %v4495_v42, %v1225_v37  ;;  %v1594_v37 = vld [vmem:[%s5376_s7 + $0x40] sm:$0xff] }
 0xada   :  { %v1231_v45 = vsub.f32 2.0, %v1229_v43 }
 0xadb   :  { %v4497_v44 = vpop.eup %4496 }
 0xadc   :  { %v1228_v11 = vmul.f32 %v4497_v44, %v1222_v39  ;;  %v1233_v47 = vmul.f32 %v4495_v42, %v1231_v45  ;;  %v1593_v39 = vld [vmem:[%s5376_s7 + $0x38] sm:$0xff]  ;;  %v1590_v42 = vld [vmem:[%s5376_s7 + $0x20] sm:$0xff] }
 0xade   :  { %v1230_v46 = vsub.f32 2.0, %v1228_v11  ;;  %v1235_v50 = vmul.f32 %v4491_v33, %v1233_v47  ;;  %v1598_v33 = vld [vmem:[%s5376_s7 + $0x60] sm:$0xff] }
 0xae0   :  { %v1232_v48 = vmul.f32 %v4497_v44, %v1230_v46 }
 0xae2   :  { %v1234_v49 = vmul.f32 %v4493_v34, %v1232_v48  ;;  %v1596_v34 = vld [vmem:[%s5376_s7 + $0x50] sm:$0xff] }
 0xae4   :  { %4155 = vmatprep.mubr.msk.f32.mxu1 %vm577_vm8, %v1234_v49  ;;  %v3816_v49 = vld [vmem:[%s5377_s11] ss:$0 sm:$0xff] }
 0xae5   :  { %4156 = vmatmul.mubr.msk.f32.vlgmr.msra.gmra.mxu1 %vm577_vm8, %v1235_v50 }
 0xae6   :  { %4159 = vmatpush3.msra.mxu1 %v1357_v51  ;;  %v3817_v51 = vld [vmem:[%s5378_s4] ss:$0 sm:$0xff] }
 0xae7   :  { %4160 = vmatprep.subr.mxu1 %v1356_v52 }
 0xae8   :  { %4161 = vmatpush3.msra.mxu1 %v1356_v52 }
 0xae9   :  { %4162 = vmatprep.subr.mxu1 %v1355_v53 }
 0xaea   :  { %4163 = vmatpush3.msra.mxu1 %v1355_v53 }
 0xaeb   :  { %4164 = vmatprep.subr.mxu1 %v1354_v54 }
 0xaec   :  { %4165 = vmatpush3.msra.mxu1 %v1354_v54 }
 0xaed   :  { %4180 = vmatprep.subr.mxu1 %v1601_v30 }
 0xba5   :  { %v4157_v55 = vpop.f32.mrf.mxu1 }
 0xba6   :  { %1343 = vrot.lane.b32.xlu1 %v4157_v55, %s4630_s2 }
 0xba7   :  { %v1314_v56 = vpop.f32.mrf.mxu1 }
 0xba8   :  { %1341 = vrot.lane.b32.xlu0 %v1314_v56, %s4630_s2 }
 0xc18   :  { %v1344_v62 = vpop.permute.xlu1 %1343 }
 0xc19   :  { %v1353_v4 = vsel %vm1351_vm9, %v1350_v2, %v1344_v62  ;;  %v3818_v62 = vld [vmem:[%s5379_s15] ss:$0 sm:$0xff] }
 0xc1a   :  { %v1342_v1 = vpop.permute.xlu0 %1341 }
 0xc1b   :  { %v1352_v3 = vsel %vm1351_vm9, %v1349_v0, %v1342_v1 }
 0xc1c   :  { %4166 = vmatprep.mubr.msk.f32.mxu1 %vm344_vm2, %v1352_v3 }
 0xc1d   :  { %4167 = vmatmul.mubr.msk.f32.vlgmr.msra.gmra.mxu1 %vm344_vm2, %v1353_v4 }
 0xc1e   :  { %4181 = vmatpush3.msra.mxu1 %v1601_v30 }
 0xc1f   :  { %4182 = vmatprep.subr.mxu1 %v1600_v31 }
 0xc20   :  { %4183 = vmatpush3.msra.mxu1 %v1600_v31 }
 0xc21   :  { %4184 = vmatprep.subr.mxu1 %v1599_v32 }
 0xc22   :  { %4185 = vmatpush3.msra.mxu1 %v1599_v32 }
 0xc23   :  { %4186 = vmatprep.subr.mxu1 %v1598_v33 }
 0xc24   :  { %4187 = vmatpush3.msra.mxu1 %v1598_v33 }
 0xc25   :  { %4188 = vmatprep.subr.mxu1 %v1597_v13 }
 0xc26   :  { %4189 = vmatpush3.msra.mxu1 %v1597_v13 }
 0xc27   :  { %4190 = vmatprep.subr.mxu1 %v1596_v34 }
 0xc28   :  { %4191 = vmatpush3.msra.mxu1 %v1596_v34 }
 0xc29   :  { %4192 = vmatprep.subr.mxu1 %v1595_v38 }
 0xc2a   :  { %4193 = vmatpush3.msra.mxu1 %v1595_v38 }
 0xc2b   :  { %4194 = vmatprep.subr.mxu1 %v1594_v37 }
 0xc2c   :  { %4195 = vmatpush3.msra.mxu1 %v1594_v37  ;;  %v3822_v37 = vld [vmem:[%s5381_s23] ss:$0 sm:$0xff] }
 0xc2d   :  { %4196 = vmatprep.subr.mxu1 %v1593_v39 }
 0xc2e   :  { %4197 = vmatpush3.msra.mxu1 %v1593_v39 }
 0xc2f   :  { %4198 = vmatprep.subr.mxu1 %v1592_v40 }
 0xc30   :  { %4199 = vmatpush3.msra.mxu1 %v1592_v40 }
 0xc31   :  { %4200 = vmatprep.subr.mxu1 %v1591_v41 }
 0xc32   :  { %4201 = vmatpush3.msra.mxu1 %v1591_v41 }
 0xc33   :  { %4202 = vmatprep.subr.mxu1 %v1590_v42 }
 0xc34   :  { %4203 = vmatpush3.msra.mxu1 %v1590_v42 }
 0xc35   :  { %4204 = vmatprep.subr.mxu1 %v1589_v58 }
 0xc36   :  { %4205 = vmatpush3.msra.mxu1 %v1589_v58 }
 0xc37   :  { %4206 = vmatprep.subr.mxu1 %v1588_v59 }
 0xc38   :  { %4207 = vmatpush3.msra.mxu1 %v1588_v59 }
 0xc39   :  { %4208 = vmatprep.subr.mxu1 %v1587_v60 }
 0xc3a   :  { %4209 = vmatpush3.msra.mxu1 %v1587_v60 }
 0xc3b   :  { %4210 = vmatprep.subr.mxu1 %v1586_v61 }
 0xc3c   :  { %4211 = vmatpush3.msra.mxu1 %v1586_v61 }
 0xcdd   :  { %v4168_v36 = vpop.f32.mrf.mxu1 }
 0xcde   :  { %v1443_v6 = vadd.f32 %v4168_v36, %v3813_v5 }
 0xcdf   :  { %v1437_v9 = vpop.f32.mrf.mxu1 }
 0xce0   :  { %v1438_v10 = vadd.f32 %v3813_v5, %v1437_v9  ;;  %v1447_v35 = vadd.f32 %v1443_v6, %v4870_v8  ;;  %v3821_v5 = vld [vmem:[%s5380_s18] ss:$0 sm:$0xff] }
 0xce2   :  { %v1453_v12 = vsel %vm344_vm2, %v1447_v35, 0.0  ;;  %v1446_v14 = vadd.f32 %v1438_v10, %v4868_v7 }
 0xce3   :  { %1454 = vadd.xlane.f32.xlu1 %v1453_v12 }
 0xce4   :  { %v1450_v15 = vsel %vm344_vm2, %v1446_v14, 0.0 }
 0xce5   :  { %1451 = vadd.xlane.f32.xlu0 %v1450_v15 }
 0xd6c   :  { %v1455_v16 = vpop.xlane.xlu1 %1454 }
 0xd6d   :  { %v1457_v17 = vmul.f32 0.03125, %v1455_v16 }
 0xd6e   :  { %v1452_v18 = vpop.xlane.xlu0 %1451 }
 0xd6f   :  { %v1456_v19 = vmul.f32 0.03125, %v1452_v18  ;;  %v5022_v20 = vsub.f32 %v1447_v35, %v1457_v17 }
 0xd71   :  { %v5024_v21 = vsub.f32 %v1446_v14, %v1456_v19  ;;  %v1461_v22 = vmul.f32 %v5022_v20, %v5022_v20 }
 0xd73   :  { %v1460_v8 = vmul.f32 %v5024_v21, %v5024_v21  ;;  %v1465_v23 = vsel %vm344_vm2, %v1461_v22, 0.0 }
 0xd75   :  { %v1462_v7 = vsel %vm344_vm2, %v1460_v8, 0.0 }
 0xd76   :  { %1463 = vadd.xlane.f32.xlu0 %v1462_v7 }
 0xd7a   :  { %1466 = vadd.xlane.f32.xlu0 %v1465_v23 }
 0xdff   :  { %v1464_v43 = vpop.xlane.xlu0 %1463 }
 0xe00   :  { %v1468_v44 = vmul.f32 0.03125, %v1464_v43  ;;  %v3823_v43 = vld [vmem:[%s5382_s26] ss:$0 sm:$0xff] }
 0xe02   :  { %v1470_v45 = vadd.f32 1e-05, %v1468_v44 }
 0xe03   :  { %v1467_v11 = vpop.xlane.xlu0 %1466 }
 0xe04   :  { %4498 = vrsqrt.f32 %v1470_v45  ;;  %v1469_v46 = vmul.f32 0.03125, %v1467_v11 }
 0xe06   :  { %v1471_v47 = vadd.f32 1e-05, %v1469_v46  ;;  %v3829_v46 = vld [vmem:[%s4689_s14 + $0x1] ss:$0 sm:$0xff]  ;;  %s5384_s14 = sld [smem:[#allocation14_spill]] }
 0xe08   :  { %4500 = vrsqrt.f32 %v1471_v47 }
 0xe11   :  { %v4499_v48 = vpop.eup %4498 }
 0xe12   :  { %v1474_v50 = vmul.f32 %v4499_v48, %v5024_v21 }
 0xe14   :  { %v1482_v52 = vmul.f32 %v3816_v49, %v1474_v50 }
 0xe15   :  { %v4501_v53 = vpop.eup %4500 }
 0xe16   :  { %v1475_v54 = vmul.f32 %v4501_v53, %v5022_v20  ;;  %v1490_v55 = vadd.f32 %v3817_v51, %v1482_v52 }
 0xe18   :  { %v1483_v56 = vmul.f32 %v3816_v49, %v1475_v54  ;;  %4177 = vmatprep.mubr.msk.f32.mxu0 %vm344_vm2, %v1490_v55 }
 0xe1a   :  { %v1491_v57 = vadd.f32 %v3817_v51, %v1483_v56 }
 0xe1c   :  { %4178 = vmatmul.mubr.msk.f32.vlgmr.msra.gmra.mxu0 %vm344_vm2, %v1491_v57 }
 0xe1d   :  { %4216 = vmatpush3.msra.mxu0 %v3827_v25 }
 0xe1e   :  { %4217 = vmatprep.subr.mxu0 %v3826_v26 }
 0xe1f   :  { %4218 = vmatpush3.msra.mxu0 %v3826_v26 }
 0xe20   :  { %4219 = vmatprep.subr.mxu0 %v3825_v28 }
 0xe21   :  { %4220 = vmatpush3.msra.mxu0 %v3825_v28 }
 0xe22   :  { %4221 = vmatprep.subr.mxu0 %v3824_v29 }
 0xe23   :  { %4222 = vmatpush3.msra.mxu0 %v3824_v29 }
 0xedc   :  { %v4179_v63 = vpop.f32.mrf.mxu0 }
 0xedd   :  { %v1581_v0 = vadd.f32 %v4179_v63, %v3818_v62 }
 0xede   :  { %v1575_v1 = vpop.f32.mrf.mxu0 }
 0xedf   :  { %v1576_v2 = vadd.f32 %v3818_v62, %v1575_v1  ;;  %v1585_v4 = vmax.f32 %v1581_v0, 0.0 }
 0xee1   :  { %v1584_v3 = vmax.f32 %v1576_v2, 0.0 }
 0xee3   :  { %4212 = vmatprep.mubr.f32.mxu1 %v1584_v3 }
 0xee4   :  { %4213 = vmatmul.mubr.f32.vlgmr.msra.gmra.mxu1 %v1585_v4 }
 0xfa4   :  { %v4214_v36 = vpop.f32.mrf.mxu1 }
 0xfa5   :  { %v1681_v6 = vadd.f32 %v4214_v36, %v3821_v5 }
 0xfa6   :  { %v1675_v9 = vpop.f32.mrf.mxu1 }
 0xfa7   :  { %v1676_v10 = vadd.f32 %v3821_v5, %v1675_v9  ;;  %v1685_v35 = vadd.f32 %v1681_v6, %v1491_v57 }
 0xfa9   :  { %v1691_v12 = vsel %vm344_vm2, %v1685_v35, 0.0  ;;  %v1684_v14 = vadd.f32 %v1676_v10, %v1490_v55 }
 0xfaa   :  { %1692 = vadd.xlane.f32.xlu1 %v1691_v12 }
 0xfab   :  { %v1688_v15 = vsel %vm344_vm2, %v1684_v14, 0.0 }
 0xfac   :  { %1689 = vadd.xlane.f32.xlu0 %v1688_v15 }
0x1033   :  { %v1693_v16 = vpop.xlane.xlu1 %1692 }
0x1034   :  { %v1695_v17 = vmul.f32 0.03125, %v1693_v16 }
0x1035   :  { %v1690_v18 = vpop.xlane.xlu0 %1689 }
0x1036   :  { %v1697_v19 = vsub.f32 %v1685_v35, %v1695_v17  ;;  %v1694_v20 = vmul.f32 0.03125, %v1690_v18 }
0x1038   :  { %v1696_v21 = vsub.f32 %v1684_v14, %v1694_v20  ;;  %v1699_v8 = vmul.f32 %v1697_v19, %v1697_v19 }
0x103a   :  { %v1703_v7 = vsel %vm344_vm2, %v1699_v8, 0.0  ;;  %v1698_v22 = vmul.f32 %v1696_v21, %v1696_v21 }
0x103b   :  { %1704 = vadd.xlane.f32.xlu1 %v1703_v7 }
0x103c   :  { %v1700_v23 = vsel %vm344_vm2, %v1698_v22, 0.0 }
0x103d   :  { %1701 = vadd.xlane.f32.xlu0 %v1700_v23 }
0x10c4   :  { %v1705_v30 = vpop.xlane.xlu1 %1704 }
0x10c5   :  { %v1707_v31 = vmul.f32 0.03125, %v1705_v30 }
0x10c6   :  { %v1702_v32 = vpop.xlane.xlu0 %1701 }
0x10c7   :  { %v1709_v33 = vadd.f32 1e-05, %v1707_v31  ;;  %v1706_v13 = vmul.f32 0.03125, %v1702_v32 }
0x10c9   :  { %4502 = vrsqrt.f32 %v1709_v33  ;;  %v1708_v34 = vadd.f32 1e-05, %v1706_v13 }
0x10cb   :  { %4504 = vrsqrt.f32 %v1708_v34 }
0x10d6   :  { %v4503_v38 = vpop.eup %4502 }
0x10d7   :  { %v1713_v39 = vmul.f32 %v4503_v38, %v1697_v19 }
0x10d8   :  { %v4505_v40 = vpop.eup %4504 }
0x10d9   :  { %v1712_v41 = vmul.f32 %v4505_v40, %v1696_v21  ;;  %v1721_v42 = vmul.f32 %v3822_v37, %v1713_v39 }
0x10db   :  { %v1720_v44 = vmul.f32 %v3822_v37, %v1712_v41  ;;  %v5072_v11 = vadd.f32 %v3823_v43, %v1721_v42 }
0x10dd   :  { %v5070_v45 = vadd.f32 %v3823_v43, %v1720_v44 }
0x10df   :  { %4223 = vmatprep.mubr.msk.f32.mxu0 %vm344_vm2, %v5070_v45 }
0x10e0   :  { %4224 = vmatmul.mubr.msk.f32.vlgmr.msra.gmra.mxu0 %vm344_vm2, %v5072_v11 }
0x11a0   :  { %v4225_v47 = vpop.f32.mrf.mxu0 }
0x11a1   :  { %v5079_v48 = vadd.f32 %v4225_v47, %v3829_v46 }
0x11a2   :  { %v1815_v49 = vpop.f32.mrf.mxu0 }
0x11a3   :  { %v5081_v50 = vadd.f32 %v3829_v46, %v1815_v49  ;;  %1828 = vrot.lane.b32.xlu0 %v5079_v48, %s4616_s0 }
0x11a5   :  { %1826 = vrot.lane.b32.xlu1 %v5081_v50, %s4616_s0  ;;  %4230 = vmatprep.mubr.msk.f32.mxu0 %vm489_vm3, %v5081_v50  ;;  %s5388_s0 = sld [smem:[#allocation18_spill]] }
0x1215   :  { %v1829_v51 = vpop.permute.xlu0 %1828 }
0x1216   :  { %4226 = vmatprep.subr.msk.mxu0 %vm489_vm3, %v1829_v51 }
0x1217   :  { %4227 = vmatpush3.xpose.msk.msra.mxu0 %vm489_vm3, %v1829_v51  ;;  %v1827_v52 = vpop.permute.xlu1 %1826 }
0x1218   :  { %4228 = vmatprep.subr.msk.mxu0 %vm489_vm3, %v1827_v52 }
0x121b   :  { %4229 = vmatpush3.xpose.msk.msra.mxu0 %vm489_vm3, %v1827_v52 }
0x121e   :  { %4231 = vmatmul.mubr.msk.f32.vlgmr.msra.gmra.mxu0 %vm489_vm3, %v5079_v48 }
0x12de   :  { %v4232_v53 = vpop.f32.mrf.mxu0 }
0x12df   :  { %v1914_v54 = vmul.f32 0.35355338, %v4232_v53 }
0x12e0   :  { %v1904_v55 = vpop.f32.mrf.mxu0 }
0x12e1   :  { %v1913_v56 = vmul.f32 0.35355338, %v1904_v55  ;;  %v1916_v57 = vadd.f32 %v1914_v54, %v4907_v24 }
0x12e3   :  { %v1920_v58 = vsel %vm577_vm8, %v1916_v57, -inf  ;;  %v1915_v59 = vadd.f32 %v1913_v56, %v4909_v27 }
0x12e4   :  { %1921 = vmax.xlane.f32.xlu0 %v1920_v58 }
0x12e5   :  { %v1917_v60 = vsel %vm577_vm8, %v1915_v59, -inf }
0x12e6   :  { %1918 = vmax.xlane.f32.xlu1 %v1917_v60 }
0x136d   :  { %v1922_v61 = vpop.xlane.xlu0 %1921 }
0x136e   :  { %v1924_v62 = vsub.f32 %v1916_v57, %v1922_v61 }
0x136f   :  { %v1919_v63 = vpop.xlane.xlu1 %1918 }
0x1370   :  { %v1927_v0 = vmul.f32 1.442695, %v1924_v62  ;;  %v1923_v1 = vsub.f32 %v1915_v59, %v1919_v63 }
0x1372   :  { %4506 = vpow2.f32 %v1927_v0  ;;  %v1925_v2 = vmul.f32 1.442695, %v1923_v1 }
0x1374   :  { %4508 = vpow2.f32 %v1925_v2 }
0x137f   :  { %v4507_v3 = vpop.eup %4506 }
0x1380   :  { %v1932_v4 = vsel %vm577_vm8, %v4507_v3, 0.0 }
0x1381   :  { %v4509_v5 = vpop.eup %4508  ;;  %1933 = vadd.xlane.f32.xlu1 %v1932_v4 }
0x1382   :  { %v1929_v36 = vsel %vm577_vm8, %v4509_v5, 0.0 }
0x1383   :  { %1930 = vadd.xlane.f32.xlu0 %v1929_v36 }
0x1392   :  { %1945 = vrot.lane.b32.xlu1 %v5081_v50, %s4620_s13 }
0x1396   :  { %2038 = vrot.lane.b32.xlu1 %v5079_v48, %s4618_s9 }
0x1399   :  { %1947 = vrot.lane.b32.xlu0 %v5079_v48, %s4620_s13  ;;  %s5391_s13 = sld [smem:[#allocation20_spill]] }
0x139a   :  { %2036 = vrot.lane.b32.xlu1 %v5081_v50, %s4618_s9  ;;  %s5390_s9 = sld [smem:[#allocation19_spill]] }
0x139d   :  { %2248 = vrot.lane.b32.xlu0 %v5079_v48, %s4622_s21 }
0x139e   :  { %2032 = vrot.lane.b32.xlu1 %v5081_v50, %s4617_s5 }
0x13a1   :  { %2034 = vrot.lane.b32.xlu0 %v5079_v48, %s4617_s5  ;;  %s5389_s5 = sld [smem:[#allocation21_spill]] }
0x13a2   :  { %2246 = vrot.lane.b32.xlu1 %v5081_v50, %s4622_s21  ;;  %s5393_s21 = sld [smem:[#allocation23_spill]] }
0x13a5   :  { %2242 = vrot.lane.b32.xlu0 %v5081_v50, %s4623_s25 }
0x13a6   :  { %2244 = vrot.lane.b32.xlu1 %v5079_v48, %s4623_s25  ;;  %s5394_s25 = sld [smem:[#allocation24_spill]] }
0x140a   :  { %v1934_v6 = vpop.xlane.xlu1 %1933 }
0x140b   :  { %4510 = vrcp.f32 %v1934_v6 }
0x140c   :  { %v1931_v9 = vpop.xlane.xlu0 %1930 }
0x140d   :  { %4512 = vrcp.f32 %v1931_v9 }
0x140e   :  { %v1946_v10 = vpop.permute.xlu1 %1945 }
0x1410   :  { %v1948_v35 = vpop.permute.xlu0 %1947 }
0x1411   :  { %4233 = vmatprep.subr.mxu0 %v1948_v35 }
0x1412   :  { %4234 = vmatpush3.msra.mxu0 %v1948_v35  ;;  %v2039_v12 = vpop.permute.xlu1 %2038 }
0x1413   :  { %4235 = vmatprep.subr.mxu0 %v1946_v10 }
0x1414   :  { %v2249_v14 = vpop.permute.xlu0 %2248  ;;  %4236 = vmatpush3.msra.mxu0 %v1946_v10 }
0x1415   :  { %4240 = vmatprep.subr.msk.mxu0 %vm489_vm3, %v2039_v12  ;;  %4254 = vmatprep.subr.msk.mxu1 %vm489_vm3, %v2249_v14 }
0x1416   :  { %4255 = vmatpush3.xpose.msk.msra.mxu1 %vm489_vm3, %v2249_v14  ;;  %v2037_v15 = vpop.permute.xlu1 %2036 }
0x1418   :  { %v4511_v16 = vpop.eup %4510  ;;  %v2035_v17 = vpop.permute.xlu0 %2034 }
0x1419   :  { %v1938_v18 = vmul.f32 %v4511_v16, %v1934_v6 }
0x141a   :  { %v4513_v19 = vpop.eup %4512  ;;  %v2033_v20 = vpop.permute.xlu1 %2032 }
0x141b   :  { %v1940_v21 = vsub.f32 2.0, %v1938_v18  ;;  %v1937_v8 = vmul.f32 %v4513_v19, %v1931_v9 }
0x141c   :  { %v2243_v7 = vpop.permute.xlu0 %2242 }
0x141d   :  { %v1939_v22 = vsub.f32 2.0, %v1937_v8  ;;  %4258 = vmatprep.mubr.msk.f32.mxu1 %vm489_vm3, %v2243_v7  ;;  %v1942_v23 = vmul.f32 %v4511_v16, %v1940_v21 }
0x141e   :  { %v2247_v25 = vpop.permute.xlu1 %2246 }
0x141f   :  { %v1941_v26 = vmul.f32 %v4513_v19, %v1939_v22  ;;  %4256 = vmatprep.subr.msk.mxu1 %vm489_vm3, %v2247_v25  ;;  %v1944_v29 = vmul.f32 %v4507_v3, %v1942_v23 }
0x1420   :  { %4257 = vmatpush3.xpose.msk.msra.mxu1 %vm489_vm3, %v2247_v25 }
0x1421   :  { %v1943_v28 = vmul.f32 %v4509_v5, %v1941_v26 }
0x1422   :  { %v2245_v30 = vpop.permute.xlu1 %2244 }
0x1423   :  { %4237 = vmatprep.mubr.msk.f32.mxu0 %vm577_vm8, %v1943_v28  ;;  %4259 = vmatmul.mubr.msk.f32.vlgmr.msra.gmra.mxu1 %vm489_vm3, %v2245_v30 }
0x1424   :  { %4238 = vmatmul.mubr.msk.f32.vlgmr.msra.gmra.mxu0 %vm577_vm8, %v1944_v29 }
0x1425   :  { %4241 = vmatpush3.xpose.msk.msra.mxu0 %vm489_vm3, %v2039_v12  ;;  %4244 = vmatprep.mubr.msk.f32.mxu0 %vm489_vm3, %v2033_v20 }
0x1426   :  { %4242 = vmatprep.subr.msk.mxu0 %vm489_vm3, %v2037_v15 }
0x1429   :  { %4243 = vmatpush3.xpose.msk.msra.mxu0 %vm489_vm3, %v2037_v15 }
0x142c   :  { %4245 = vmatmul.mubr.msk.f32.vlgmr.msra.gmra.mxu0 %vm489_vm3, %v2035_v17 }
0x14e3   :  { %v4260_v32 = vpop.f32.mrf.mxu1 }
0x14e4   :  { %v5135_v31 = vpop.f32.mrf.mxu0  ;;  %v2334_v44 = vmul.f32 0.35355338, %v4260_v32 }
0x14e5   :  { %v2324_v13 = vpop.f32.mrf.mxu1 }
0x14e6   :  { %v5137_v33 = vpop.f32.mrf.mxu0  ;;  %v2333_v39 = vmul.f32 0.35355338, %v2324_v13  ;;  %v2336_v51 = vadd.f32 %v2334_v44, %v4907_v24 }
0x14e8   :  { %v2335_v47 = vadd.f32 %v2333_v39, %v4909_v27  ;;  %v2340_v52 = vsel %vm577_vm8, %v2336_v51, -inf }
0x14ea   :  { %v2337_v49 = vsel %vm577_vm8, %v2335_v47, -inf }
0x14ec   :  { %v4246_v34 = vpop.f32.mrf.mxu0 }
0x14ed   :  { %v2124_v38 = vmul.f32 0.35355338, %v4246_v34 }
0x14ee   :  { %v2114_v37 = vpop.f32.mrf.mxu0 }
0x14ef   :  { %v2123_v40 = vmul.f32 0.35355338, %v2114_v37  ;;  %v2126_v41 = vadd.f32 %v2124_v38, %v4907_v24 }
0x14f1   :  { %v2130_v42 = vsel %vm577_vm8, %v2126_v41, -inf  ;;  %v2125_v43 = vadd.f32 %v2123_v40, %v4909_v27 }
0x14f2   :  { %2131 = vmax.xlane.f32.xlu1 %v2130_v42 }
0x14f3   :  { %v2127_v46 = vsel %vm577_vm8, %v2125_v43, -inf }
0x14f4   :  { %2128 = vmax.xlane.f32.xlu0 %v2127_v46 }
0x14f8   :  { %2338 = vmax.xlane.f32.xlu0 %v2337_v49 }
0x14fc   :  { %2341 = vmax.xlane.f32.xlu0 %v2340_v52 }
0x157b   :  { %v2132_v55 = vpop.xlane.xlu1 %2131 }
0x157c   :  { %v2134_v58 = vsub.f32 %v2126_v41, %v2132_v55 }
0x157d   :  { %v2129_v53 = vpop.xlane.xlu0 %2128 }
0x157e   :  { %v2133_v54 = vsub.f32 %v2125_v43, %v2129_v53  ;;  %v2137_v63 = vmul.f32 1.442695, %v2134_v58 }
0x1580   :  { %v2135_v59 = vmul.f32 1.442695, %v2133_v54 }
0x1581   :  { %v2339_v56 = vpop.xlane.xlu0 %2338 }
0x1582   :  { %v2343_v57 = vsub.f32 %v2335_v47, %v2339_v56 }
0x1584   :  { %v2345_v60 = vmul.f32 1.442695, %v2343_v57 }
0x1585   :  { %v2342_v61 = vpop.xlane.xlu0 %2341 }
0x1586   :  { %4514 = vpow2.f32 %v2345_v60  ;;  %v2344_v62 = vsub.f32 %v2336_v51, %v2342_v61 }
0x1587   :  { %4516 = vpow2.f32 %v2135_v59 }
0x1588   :  { %v2347_v0 = vmul.f32 1.442695, %v2344_v62 }
0x158a   :  { %4518 = vpow2.f32 %v2347_v0 }
0x158b   :  { %4520 = vpow2.f32 %v2137_v63 }
0x1593   :  { %v4515_v1 = vpop.eup %4514 }
0x1594   :  { %v2349_v2 = vsel %vm577_vm8, %v4515_v1, 0.0  ;;  %v4517_v3 = vpop.eup %4516 }
0x1595   :  { %2350 = vadd.xlane.f32.xlu0 %v2349_v2  ;;  %v2139_v5 = vsel %vm577_vm8, %v4517_v3, 0.0 }
0x1597   :  { %v4519_v4 = vpop.eup %4518 }
0x1598   :  { %v2352_v36 = vsel %vm577_vm8, %v4519_v4, 0.0  ;;  %v4521_v6 = vpop.eup %4520 }
0x1599   :  { %2140 = vadd.xlane.f32.xlu0 %v2139_v5  ;;  %2353 = vadd.xlane.f32.xlu1 %v2352_v36  ;;  %v2142_v9 = vsel %vm577_vm8, %v4521_v6, 0.0 }
0x159d   :  { %2143 = vadd.xlane.f32.xlu1 %v2142_v9 }
0x15ae   :  { %2155 = vrot.lane.b32.xlu1 %v5081_v50, %s4621_s17 }
0x15af   :  { %2157 = vrot.lane.b32.xlu0 %v5079_v48, %s4621_s17  ;;  %s5392_s17 = sld [smem:[#allocation22_spill]] }
0x15b2   :  { %2367 = vrot.lane.b32.xlu1 %v5079_v48, %s4624_s29 }
0x15b3   :  { %2458 = vrot.lane.b32.xlu0 %v5079_v48, %s4625_s3 }
0x15b6   :  { %2365 = vrot.lane.b32.xlu1 %v5081_v50, %s4624_s29  ;;  %s5395_s29 = sld [smem:[#allocation25_spill]] }
0x15b7   :  { %2452 = vrot.lane.b32.xlu0 %v5081_v50, %s4626_s30 }
0x15ba   :  { %2456 = vrot.lane.b32.xlu1 %v5081_v50, %s4625_s3  ;;  %s5396_s3 = sld [smem:[#allocation26_spill]] }
0x15be   :  { %2454 = vrot.lane.b32.xlu1 %v5079_v48, %s4626_s30 }
0x161e   :  { %v2351_v10 = vpop.xlane.xlu0 %2350 }
0x161f   :  { %4522 = vrcp.f32 %v2351_v10 }
0x1622   :  { %v2141_v35 = vpop.xlane.xlu0 %2140  ;;  %v2354_v12 = vpop.xlane.xlu1 %2353 }
0x1623   :  { %4524 = vrcp.f32 %v2141_v35 }
0x1624   :  { %4526 = vrcp.f32 %v2354_v12 }
0x1626   :  { %v2158_v14 = vpop.permute.xlu0 %2157  ;;  %v2144_v15 = vpop.xlane.xlu1 %2143 }
0x1627   :  { %4528 = vrcp.f32 %v2144_v15  ;;  %4247 = vmatprep.subr.mxu0 %v2158_v14 }
0x1628   :  { %4248 = vmatpush3.msra.mxu0 %v2158_v14 }
0x162a   :  { %v2156_v16 = vpop.permute.xlu1 %2155  ;;  %v2459_v39 = vpop.permute.xlu0 %2458 }
0x162b   :  { %4249 = vmatprep.subr.mxu0 %v2156_v16 }
0x162c   :  { %4250 = vmatpush3.msra.mxu0 %v2156_v16  ;;  %v4523_v17 = vpop.eup %4522 }
0x162d   :  { %v2357_v20 = vmul.f32 %v4523_v17, %v2351_v10 }
0x162e   :  { %v2368_v18 = vpop.permute.xlu1 %2367  ;;  %v2453_v43 = vpop.permute.xlu0 %2452 }
0x162f   :  { %4261 = vmatprep.subr.mxu0 %v2368_v18  ;;  %v2359_v25 = vsub.f32 2.0, %v2357_v20  ;;  %v3858_v20 = vld [vmem:[%s4694_s19 + $0x30] sm:$0xff] }
0x1630   :  { %v4525_v19 = vpop.eup %4524 }
0x1631   :  { %v4527_v21 = vpop.eup %4526  ;;  %v2147_v8 = vmul.f32 %v4525_v19, %v2141_v35  ;;  %v2361_v13 = vmul.f32 %v4523_v17, %v2359_v25 }
0x1632   :  { %v2358_v22 = vmul.f32 %v4527_v21, %v2354_v12  ;;  %v2366_v41 = vpop.permute.xlu1 %2365 }
0x1633   :  { %v2149_v7 = vsub.f32 2.0, %v2147_v8  ;;  %v2363_v40 = vmul.f32 %v4515_v1, %v2361_v13  ;;  %v3856_v8 = vld [vmem:[%s4694_s19 + $0x20] sm:$0xff] }
0x1634   :  { %v4529_v23 = vpop.eup %4528  ;;  %v2360_v30 = vsub.f32 2.0, %v2358_v22 }
0x1635   :  { %v2151_v26 = vmul.f32 %v4525_v19, %v2149_v7  ;;  %v2148_v28 = vmul.f32 %v4529_v23, %v2144_v15  ;;  %v3859_v19 = vld [vmem:[%s4694_s19 + $0x38] sm:$0xff] }
0x1636   :  { %v2362_v38 = vmul.f32 %v4527_v21, %v2360_v30  ;;  %v2457_v44 = vpop.permute.xlu1 %2456  ;;  %v3857_v21 = vld [vmem:[%s4694_s19 + $0x28] sm:$0xff]  ;;  %s5385_s19 = sld [smem:[#allocation17_spill]] }
0x1637   :  { %v2153_v29 = vmul.f32 %v4517_v3, %v2151_v26  ;;  %v2150_v32 = vsub.f32 2.0, %v2148_v28 }
0x1638   :  { %v2364_v42 = vmul.f32 %v4519_v4, %v2362_v38 }
0x1639   :  { %v2152_v34 = vmul.f32 %v4529_v23, %v2150_v32  ;;  %4251 = vmatprep.mubr.msk.f32.mxu0 %vm577_vm8, %v2153_v29 }
0x163a   :  { %v2455_v46 = vpop.permute.xlu1 %2454 }
0x163b   :  { %v2154_v37 = vmul.f32 %v4521_v6, %v2152_v34 }
0x163d   :  { %4252 = vmatmul.mubr.msk.f32.vlgmr.msra.gmra.mxu0 %vm577_vm8, %v2154_v37 }
0x163e   :  { %4262 = vmatpush3.msra.mxu0 %v2368_v18  ;;  %4265 = vmatprep.mubr.msk.f32.mxu0 %vm577_vm8, %v2363_v40  ;;  %v3861_v40 = vld [vmem:[%s4699_s24 + $0x1] ss:$0 sm:$0xff]  ;;  %s5386_s24 = sld [smem:[#allocation15_spill]] }
0x163f   :  { %4263 = vmatprep.subr.mxu0 %v2366_v41 }
0x1640   :  { %4264 = vmatpush3.msra.mxu0 %v2366_v41 }
0x1641   :  { %4268 = vmatprep.subr.msk.mxu0 %vm489_vm3, %v2459_v39  ;;  %4266 = vmatmul.mubr.msk.f32.vlgmr.msra.gmra.mxu0 %vm577_vm8, %v2364_v42 }
0x1642   :  { %4269 = vmatpush3.xpose.msk.msra.mxu0 %vm489_vm3, %v2459_v39  ;;  %4272 = vmatprep.mubr.msk.f32.mxu0 %vm489_vm3, %v2453_v43 }
0x1643   :  { %4270 = vmatprep.subr.msk.mxu0 %vm489_vm3, %v2457_v44 }
0x1646   :  { %4271 = vmatpush3.xpose.msk.msra.mxu0 %vm489_vm3, %v2457_v44 }
0x1649   :  { %4273 = vmatmul.mubr.msk.f32.vlgmr.msra.gmra.mxu0 %vm489_vm3, %v2455_v46 }
0x16fd   :  { %v4253_v47 = vpop.f32.mrf.mxu0 }
0x16ff   :  { %v2233_v49 = vpop.f32.mrf.mxu0 }
0x1701   :  { %v4267_v51 = vpop.f32.mrf.mxu0 }
0x1703   :  { %v2443_v52 = vpop.f32.mrf.mxu0 }
0x1709   :  { %v4274_v53 = vpop.f32.mrf.mxu0 }
0x170a   :  { %v2544_v54 = vmul.f32 0.35355338, %v4274_v53 }
0x170b   :  { %v2534_v55 = vpop.f32.mrf.mxu0 }
0x170c   :  { %v2543_v56 = vmul.f32 0.35355338, %v2534_v55  ;;  %v2546_v57 = vadd.f32 %v2544_v54, %v4907_v24 }
0x170e   :  { %v2550_v58 = vsel %vm577_vm8, %v2546_v57, -inf  ;;  %v2545_v59 = vadd.f32 %v2543_v56, %v4909_v27 }
0x170f   :  { %2551 = vmax.xlane.f32.xlu1 %v2550_v58  ;;  %v3871_v58 = vld [vmem:[%s4714_s12 + $0x38] sm:$0xff] }
0x1710   :  { %v2547_v60 = vsel %vm577_vm8, %v2545_v59, -inf  ;;  %4293 = vmatprep.subr.mxu0 %v3871_v58 }
0x1711   :  { %2548 = vmax.xlane.f32.xlu0 %v2547_v60  ;;  %4294 = vmatpush3.msra.mxu0 %v3871_v58  ;;  %v3869_v60 = vld [vmem:[%s4714_s12 + $0x28] sm:$0xff]  ;;  %v3080_v58 = vld [vmem:[%s5383_s8 + $0x10] sm:$0xff] }
0x1720   :  { %2575 = vrot.lane.b32.xlu1 %v5081_v50, %s4627_s27 }
0x1724   :  { %2664 = vrot.lane.b32.xlu1 %v2233_v49, %s4628_s28 }
0x1728   :  { %2666 = vrot.lane.b32.xlu1 %v4253_v47, %s4628_s28 }
0x172c   :  { %2674 = vrot.lane.b32.xlu1 %v4267_v51, %s4629_s1 }
0x1798   :  { %v2552_v61 = vpop.xlane.xlu1 %2551 }
0x1799   :  { %v2554_v62 = vsub.f32 %v2546_v57, %v2552_v61  ;;  %v3868_v61 = vld [vmem:[%s4714_s12 + $0x20] sm:$0xff] }
0x179a   :  { %v2549_v24 = vpop.xlane.xlu0 %2548 }
0x179b   :  { %v2557_v63 = vmul.f32 1.442695, %v2554_v62  ;;  %v2553_v0 = vsub.f32 %v2545_v59, %v2549_v24  ;;  %v3870_v59 = vld [vmem:[%s4714_s12 + $0x30] sm:$0xff]  ;;  %v3891_v62 = vld [vmem:[%s5376_s7 + $0xf8] sm:$0xff]  ;;  %s5387_s12 = sld [smem:[#allocation16_spill]] }
0x179c   :  { %v2576_v6 = vpop.permute.xlu1 %2575  ;;  %4295 = vmatprep.subr.mxu0 %v3870_v59  ;;  %v3890_v24 = vld [vmem:[%s5376_s7 + $0xf0] sm:$0xff] }
0x179d   :  { %4530 = vpow2.f32 %v2557_v63  ;;  %v2555_v27 = vmul.f32 1.442695, %v2553_v0  ;;  %4296 = vmatpush3.msra.mxu0 %v3870_v59  ;;  %v3889_v63 = vld [vmem:[%s5376_s7 + $0xe8] sm:$0xff]  ;;  %v3888_v0 = vld [vmem:[%s5376_s7 + $0xe0] sm:$0xff] }
0x179e   :  { %4297 = vmatprep.subr.mxu0 %v3869_v60  ;;  %v3079_v59 = vld [vmem:[%s5383_s8 + $0x8] sm:$0xff] }
0x179f   :  { %4532 = vpow2.f32 %v2555_v27  ;;  %4298 = vmatpush3.msra.mxu0 %v3869_v60  ;;  %v3887_v27 = vld [vmem:[%s5376_s7 + $0xd8] sm:$0xff]  ;;  %v3078_v60 = vld [vmem:[%s5383_s8] sm:$0xff] }
0x17a0   :  { %v2665_v23 = vpop.permute.xlu1 %2664  ;;  %4299 = vmatprep.subr.mxu0 %v3868_v61 }
0x17a1   :  { %v2686_v29 = vsel %vm489_vm3, %v5137_v33, %v2665_v23  ;;  %4300 = vmatpush3.msra.mxu0 %v3868_v61  ;;  %v3878_v23 = vld [vmem:[%s5376_s7 + $0x90] sm:$0xff] }
0x17a4   :  { %v2667_v25 = vpop.permute.xlu1 %2666 }
0x17a5   :  { %v2687_v32 = vsel %vm489_vm3, %v5135_v31, %v2667_v25  ;;  %v3877_v25 = vld [vmem:[%s5376_s7 + $0x88] sm:$0xff] }
0x17a8   :  { %v2675_v26 = vpop.permute.xlu1 %2674 }
0x17a9   :  { %v2689_v38 = vsel %vm577_vm8, %v2687_v32, %v2675_v26  ;;  %v3876_v26 = vld [vmem:[%s5376_s7 + $0x80] sm:$0xff] }
0x17aa   :  { %v4531_v1 = vpop.eup %4530 }
0x17ab   :  { %v2562_v2 = vsel %vm577_vm8, %v4531_v1, 0.0 }
0x17ac   :  { %v4533_v3 = vpop.eup %4532  ;;  %2563 = vadd.xlane.f32.xlu0 %v2562_v2  ;;  %v3885_v2 = vld [vmem:[%s5376_s7 + $0xc8] sm:$0xff] }
0x17ad   :  { %v2559_v50 = vsel %vm577_vm8, %v4533_v3, 0.0 }
0x17b0   :  { %2560 = vadd.xlane.f32.xlu0 %v2559_v50  ;;  %v3883_v50 = vld [vmem:[%s5376_s7 + $0xb8] sm:$0xff] }
0x17c6   :  { %2577 = vrot.lane.b32.xlu0 %v5079_v48, %s4627_s27 }
0x17ca   :  { %2672 = vrot.lane.b32.xlu0 %v2443_v52, %s4629_s1 }
0x1835   :  { %v2564_v4 = vpop.xlane.xlu0 %2563 }
0x1836   :  { %4534 = vrcp.f32 %v2564_v4 }
0x1839   :  { %v2561_v5 = vpop.xlane.xlu0 %2560 }
0x183a   :  { %4536 = vrcp.f32 %v2561_v5 }
0x183d   :  { %v2578_v36 = vpop.permute.xlu0 %2577 }
0x183e   :  { %4275 = vmatprep.subr.mxu1 %v2578_v36 }
0x183f   :  { %4276 = vmatpush3.msra.mxu1 %v2578_v36  ;;  %v3880_v36 = vld [vmem:[%s5376_s7 + $0xa0] sm:$0xff] }
0x1840   :  { %4277 = vmatprep.subr.mxu1 %v2576_v6 }
0x1841   :  { %4278 = vmatpush3.msra.mxu1 %v2576_v6  ;;  %v2673_v28 = vpop.permute.xlu0 %2672 }
0x1842   :  { %4282 = vmatprep.subr.mxu1 %v3859_v19  ;;  %v2688_v13 = vsel %vm577_vm8, %v2686_v29, %v2673_v28  ;;  %v3873_v28 = vld [vmem:[%s5379_s15 + $0x1] ss:$0 sm:$0xff] }
0x1843   :  { %v4535_v9 = vpop.eup %4534 }
0x1844   :  { %v2568_v10 = vmul.f32 %v4535_v9, %v2564_v4  ;;  %v3882_v4 = vld [vmem:[%s5376_s7 + $0xb0] sm:$0xff] }
0x1846   :  { %v2570_v12 = vsub.f32 2.0, %v2568_v10 }
0x1847   :  { %v4537_v35 = vpop.eup %4536 }
0x1848   :  { %v2567_v48 = vmul.f32 %v4537_v35, %v2561_v5  ;;  %v2572_v15 = vmul.f32 %v4535_v9, %v2570_v12  ;;  %v3881_v5 = vld [vmem:[%s5376_s7 + $0xa8] sm:$0xff] }
0x184a   :  { %v2569_v14 = vsub.f32 2.0, %v2567_v48  ;;  %v2574_v18 = vmul.f32 %v4531_v1, %v2572_v15  ;;  %v3886_v1 = vld [vmem:[%s5376_s7 + $0xd0] sm:$0xff]  ;;  %v3866_v15 = vld [vmem:[%s5377_s11 + $0x1] ss:$0 sm:$0xff] }
0x184c   :  { %v2571_v16 = vmul.f32 %v4537_v35, %v2569_v14 }
0x184e   :  { %v2573_v17 = vmul.f32 %v4533_v3, %v2571_v16  ;;  %v3884_v3 = vld [vmem:[%s5376_s7 + $0xc0] sm:$0xff] }
0x1850   :  { %4279 = vmatprep.mubr.msk.f32.mxu1 %vm577_vm8, %v2573_v17  ;;  %v3867_v17 = vld [vmem:[%s5378_s4 + $0x1] ss:$0 sm:$0xff] }
0x1851   :  { %4280 = vmatmul.mubr.msk.f32.vlgmr.msra.gmra.mxu1 %vm577_vm8, %v2574_v18 }
0x1852   :  { %4283 = vmatpush3.msra.mxu1 %v3859_v19 }
0x1853   :  { %4284 = vmatprep.subr.mxu1 %v3858_v20 }
0x1854   :  { %4285 = vmatpush3.msra.mxu1 %v3858_v20 }
0x1855   :  { %4286 = vmatprep.subr.mxu1 %v3857_v21 }
0x1856   :  { %4287 = vmatpush3.msra.mxu1 %v3857_v21 }
0x1857   :  { %4288 = vmatprep.subr.mxu1 %v3856_v8 }
0x1858   :  { %4289 = vmatpush3.msra.mxu1 %v3856_v8 }
0x1859   :  { %4304 = vmatprep.subr.mxu1 %v3891_v62 }
0x1911   :  { %v4281_v7 = vpop.f32.mrf.mxu1 }
0x1912   :  { %2682 = vrot.lane.b32.xlu1 %v4281_v7, %s4630_s2 }
0x1913   :  { %v2653_v22 = vpop.f32.mrf.mxu1 }
0x1914   :  { %2680 = vrot.lane.b32.xlu0 %v2653_v22, %s4630_s2  ;;  %v3879_v22 = vld [vmem:[%s5376_s7 + $0x98] sm:$0xff] }
0x1984   :  { %v2683_v30 = vpop.permute.xlu1 %2682 }
0x1985   :  { %v2691_v39 = vsel %vm1351_vm9, %v2689_v38, %v2683_v30 }
0x1986   :  { %v2681_v34 = vpop.permute.xlu0 %2680 }
0x1987   :  { %v2690_v37 = vsel %vm1351_vm9, %v2688_v13, %v2681_v34 }
0x1988   :  { %4290 = vmatprep.mubr.msk.f32.mxu1 %vm344_vm2, %v2690_v37  ;;  %v3893_v37 = vld [vmem:[%s5380_s18 + $0x1] ss:$0 sm:$0xff] }
0x1989   :  { %4291 = vmatmul.mubr.msk.f32.vlgmr.msra.gmra.mxu1 %vm344_vm2, %v2691_v39 }
0x198a   :  { %4305 = vmatpush3.msra.mxu1 %v3891_v62 }
0x198b   :  { %4306 = vmatprep.subr.mxu1 %v3890_v24 }
0x198c   :  { %4307 = vmatpush3.msra.mxu1 %v3890_v24 }
0x198d   :  { %4308 = vmatprep.subr.mxu1 %v3889_v63 }
0x198e   :  { %4309 = vmatpush3.msra.mxu1 %v3889_v63 }
0x198f   :  { %4310 = vmatprep.subr.mxu1 %v3888_v0 }
0x1990   :  { %4311 = vmatpush3.msra.mxu1 %v3888_v0 }
0x1991   :  { %4312 = vmatprep.subr.mxu1 %v3887_v27 }
0x1992   :  { %4313 = vmatpush3.msra.mxu1 %v3887_v27 }
0x1993   :  { %4314 = vmatprep.subr.mxu1 %v3886_v1 }
0x1994   :  { %4315 = vmatpush3.msra.mxu1 %v3886_v1 }
0x1995   :  { %4316 = vmatprep.subr.mxu1 %v3885_v2 }
0x1996   :  { %4317 = vmatpush3.msra.mxu1 %v3885_v2  ;;  %v3896_v2 = vld [vmem:[%s5381_s23 + $0x1] ss:$0 sm:$0xff] }
0x1997   :  { %4318 = vmatprep.subr.mxu1 %v3884_v3 }
0x1998   :  { %4319 = vmatpush3.msra.mxu1 %v3884_v3 }
0x1999   :  { %4320 = vmatprep.subr.mxu1 %v3883_v50 }
0x199a   :  { %4321 = vmatpush3.msra.mxu1 %v3883_v50 }
0x199b   :  { %4322 = vmatprep.subr.mxu1 %v3882_v4 }
0x199c   :  { %4323 = vmatpush3.msra.mxu1 %v3882_v4  ;;  %v3897_v4 = vld [vmem:[%s5382_s26 + $0x1] ss:$0 sm:$0xff] }
0x199d   :  { %4324 = vmatprep.subr.mxu1 %v3881_v5 }
0x199e   :  { %4325 = vmatpush3.msra.mxu1 %v3881_v5 }
0x199f   :  { %4326 = vmatprep.subr.mxu1 %v3880_v36 }
0x19a0   :  { %4327 = vmatpush3.msra.mxu1 %v3880_v36 }
0x19a1   :  { %4328 = vmatprep.subr.mxu1 %v3879_v22 }
0x19a2   :  { %4329 = vmatpush3.msra.mxu1 %v3879_v22  ;;  %v3201_v22 = vld [vmem:[%s5385_s19 + $0x18] sm:$0xff] }
0x19a3   :  { %4330 = vmatprep.subr.mxu1 %v3878_v23 }
0x19a4   :  { %4331 = vmatpush3.msra.mxu1 %v3878_v23  ;;  %v3200_v23 = vld [vmem:[%s5385_s19 + $0x10] sm:$0xff] }
0x19a5   :  { %4332 = vmatprep.subr.mxu1 %v3877_v25 }
0x19a6   :  { %4333 = vmatpush3.msra.mxu1 %v3877_v25  ;;  %v3199_v25 = vld [vmem:[%s5385_s19 + $0x8] sm:$0xff] }
0x19a7   :  { %4334 = vmatprep.subr.mxu1 %v3876_v26 }
0x19a8   :  { %4335 = vmatpush3.msra.mxu1 %v3876_v26  ;;  %v3198_v26 = vld [vmem:[%s5385_s19] sm:$0xff] }
0x1a49   :  { %v4292_v41 = vpop.f32.mrf.mxu1 }
0x1a4a   :  { %v2783_v33 = vadd.f32 %v4292_v41, %v3861_v40 }
0x1a4b   :  { %v2777_v42 = vpop.f32.mrf.mxu1 }
0x1a4c   :  { %v2787_v43 = vadd.f32 %v2783_v33, %v5072_v11  ;;  %v2778_v31 = vadd.f32 %v3861_v40, %v2777_v42 }
0x1a4e   :  { %v2786_v44 = vadd.f32 %v2778_v31, %v5070_v45  ;;  %v2795_v46 = vsel %vm344_vm2, %v2787_v43, 0.0 }
0x1a4f   :  { %2796 = vadd.xlane.f32.xlu1 %v2795_v46 }
0x1a50   :  { %v2792_v47 = vsel %vm344_vm2, %v2786_v44, 0.0 }
0x1a51   :  { %2793 = vadd.xlane.f32.xlu0 %v2792_v47 }
0x1ad8   :  { %v2797_v49 = vpop.xlane.xlu1 %2796 }
0x1ad9   :  { %v2799_v51 = vmul.f32 0.03125, %v2797_v49 }
0x1ada   :  { %v2794_v52 = vpop.xlane.xlu0 %2793 }
0x1adb   :  { %v2798_v53 = vmul.f32 0.03125, %v2794_v52  ;;  %v5214_v54 = vsub.f32 %v2787_v43, %v2799_v51 }
0x1add   :  { %v5216_v55 = vsub.f32 %v2786_v44, %v2798_v53  ;;  %v2803_v56 = vmul.f32 %v5214_v54, %v5214_v54 }
0x1adf   :  { %v2802_v45 = vmul.f32 %v5216_v55, %v5216_v55  ;;  %v2807_v57 = vsel %vm344_vm2, %v2803_v56, 0.0  ;;  %v3081_v56 = vld [vmem:[%s5383_s8 + $0x18] sm:$0xff] }
0x1ae1   :  { %v2804_v11 = vsel %vm344_vm2, %v2802_v45, 0.0 }
0x1ae2   :  { %2805 = vadd.xlane.f32.xlu0 %v2804_v11 }
0x1ae6   :  { %2808 = vadd.xlane.f32.xlu0 %v2807_v57  ;;  %v4631_v57 = vmov 0.0  }
0x1ae7   :  { %4339 = vmatprep.subr.mxu0 %v4631_v57  ;;  %4390 = vmatprep.subr.mxu1 %v4631_v57 }
0x1b6b   :  { %v2806_v6 = vpop.xlane.xlu0 %2805 }
0x1b6c   :  { %v2810_v9 = vmul.f32 0.03125, %v2806_v6 }
0x1b6e   :  { %v2812_v10 = vadd.f32 1e-05, %v2810_v9 }
0x1b6f   :  { %v2809_v35 = vpop.xlane.xlu0 %2808 }
0x1b70   :  { %4538 = vrsqrt.f32 %v2812_v10  ;;  %v2811_v12 = vmul.f32 0.03125, %v2809_v35 }
0x1b72   :  { %v2813_v48 = vadd.f32 1e-05, %v2811_v12 }
0x1b74   :  { %4540 = vrsqrt.f32 %v2813_v48 }
0x1b7d   :  { %v4539_v14 = vpop.eup %4538 }
0x1b7e   :  { %v2816_v16 = vmul.f32 %v4539_v14, %v5216_v55  ;;  %v3898_v14 = vld [vmem:[%s5384_s14] ss:$0 sm:$0xff] }
0x1b80   :  { %v2824_v18 = vmul.f32 %v3866_v15, %v2816_v16 }
0x1b81   :  { %v4541_v19 = vpop.eup %4540 }
0x1b82   :  { %v2817_v20 = vmul.f32 %v4541_v19, %v5214_v54  ;;  %v2832_v21 = vadd.f32 %v3867_v17, %v2824_v18 }
0x1b84   :  { %v2825_v8 = vmul.f32 %v3866_v15, %v2817_v20  ;;  %4301 = vmatprep.mubr.msk.f32.mxu0 %vm344_vm2, %v2832_v21 }
0x1b86   :  { %v2833_v7 = vadd.f32 %v3867_v17, %v2825_v8 }
0x1b88   :  { %4302 = vmatmul.mubr.msk.f32.vlgmr.msra.gmra.mxu0 %vm344_vm2, %v2833_v7 }
0x1b89   :  { %4347 = vmatprep.mubr.msk.f32.mxu0 %vm4632_vm10, %v4631_v57  ;;  %4340 = vmatpush3.msra.mxu0 %v3081_v56  ;;  %v3904_v56 = vld [vmem:[%s5390_s9] ss:$0 sm:$0xff] }
0x1b8a   :  { %4341 = vmatprep.subr.mxu0 %v4631_v57 }
0x1b8b   :  { %4342 = vmatpush3.msra.mxu0 %v3080_v58 }
0x1b8c   :  { %4343 = vmatprep.subr.mxu0 %v4631_v57 }
0x1b8d   :  { %4344 = vmatpush3.msra.mxu0 %v3079_v59  ;;  %v3905_v59 = vld [vmem:[%s5391_s13] ss:$0 sm:$0xff] }
0x1b8e   :  { %4345 = vmatprep.subr.mxu0 %v4631_v57 }
0x1b8f   :  { %4346 = vmatpush3.msra.mxu0 %v3078_v60 }
0x1b90   :  { %4350 = vmatprep.subr.mxu0 %v4631_v57 }
0x1c48   :  { %v4303_v29 = vpop.f32.mrf.mxu0 }
0x1c49   :  { %v2925_v30 = vadd.f32 %v4303_v29, %v3873_v28 }
0x1c4a   :  { %v2919_v32 = vpop.f32.mrf.mxu0 }
0x1c4b   :  { %v2920_v13 = vadd.f32 %v3873_v28, %v2919_v32  ;;  %v2929_v38 = vmax.f32 %v2925_v30, 0.0 }
0x1c4d   :  { %v2928_v34 = vmax.f32 %v2920_v13, 0.0  ;;  %v3900_v13 = vld [vmem:[%s5386_s24] ss:$0 sm:$0xff] }
0x1c4f   :  { %4336 = vmatprep.mubr.f32.mxu1 %v2928_v34 }
0x1c50   :  { %4337 = vmatmul.mubr.f32.vlgmr.msra.gmra.mxu1 %v2929_v38  ;;  %v3901_v38 = vld [vmem:[%s5387_s12] ss:$0 sm:$0xff] }
0x1c51   :  { %4394 = vmatprep.mubr.msk.f32.mxu1 %vm4632_vm10, %v4631_v57 }
0x1d10   :  { %v4338_v39 = vpop.f32.mrf.mxu1 }
0x1d11   :  { %v3027_v40 = vadd.f32 %v4338_v39, %v3893_v37 }
0x1d12   :  { %v3021_v41 = vpop.f32.mrf.mxu1 }
0x1d13   :  { %v3031_v33 = vadd.f32 %v3027_v40, %v2833_v7  ;;  %v3022_v42 = vadd.f32 %v3893_v37, %v3021_v41  ;;  %v3902_v41 = vld [vmem:[%s5388_s0] ss:$0 sm:$0xff] }
0x1d15   :  { %v3030_v43 = vadd.f32 %v3022_v42, %v2832_v21  ;;  %v3039_v31 = vsel %vm344_vm2, %v3031_v33, 0.0 }
0x1d16   :  { %3040 = vadd.xlane.f32.xlu1 %v3039_v31 }
0x1d17   :  { %v3036_v44 = vsel %vm344_vm2, %v3030_v43, 0.0 }
0x1d18   :  { %3037 = vadd.xlane.f32.xlu0 %v3036_v44 }
0x1d9f   :  { %v3041_v46 = vpop.xlane.xlu1 %3040 }
0x1da0   :  { %v3043_v47 = vmul.f32 0.03125, %v3041_v46 }
0x1da1   :  { %v3038_v49 = vpop.xlane.xlu0 %3037 }
0x1da2   :  { %v3045_v51 = vsub.f32 %v3031_v33, %v3043_v47  ;;  %v3042_v52 = vmul.f32 0.03125, %v3038_v49 }
0x1da4   :  { %v3044_v53 = vsub.f32 %v3030_v43, %v3042_v52  ;;  %v3047_v54 = vmul.f32 %v3045_v51, %v3045_v51  ;;  %v3315_v52 = vld [vmem:[%s5389_s5 + $0x8] sm:$0xff] }
0x1da6   :  { %v3051_v55 = vsel %vm344_vm2, %v3047_v54, 0.0  ;;  %v3046_v45 = vmul.f32 %v3044_v53, %v3044_v53 }
0x1da7   :  { %3052 = vadd.xlane.f32.xlu1 %v3051_v55 }
0x1da8   :  { %v3048_v11 = vsel %vm344_vm2, %v3046_v45, 0.0 }
0x1da9   :  { %3049 = vadd.xlane.f32.xlu0 %v3048_v11 }
0x1e30   :  { %v3053_v61 = vpop.xlane.xlu1 %3052 }
0x1e31   :  { %v3055_v62 = vmul.f32 0.03125, %v3053_v61 }
0x1e32   :  { %v3050_v24 = vpop.xlane.xlu0 %3049 }
0x1e33   :  { %v3057_v63 = vadd.f32 1e-05, %v3055_v62  ;;  %v3054_v0 = vmul.f32 0.03125, %v3050_v24  ;;  %v3399_v24 = vld [vmem:[%s5392_s17 + $0x18] sm:$0xff] }
0x1e35   :  { %4542 = vrsqrt.f32 %v3057_v63  ;;  %v3056_v27 = vadd.f32 1e-05, %v3054_v0  ;;  %v3398_v63 = vld [vmem:[%s5392_s17 + $0x10] sm:$0xff]  ;;  %v3397_v0 = vld [vmem:[%s5392_s17 + $0x8] sm:$0xff] }
0x1e37   :  { %4544 = vrsqrt.f32 %v3056_v27  ;;  %v3396_v27 = vld [vmem:[%s5392_s17] sm:$0xff] }
0x1e42   :  { %v4543_v1 = vpop.eup %4542 }
0x1e43   :  { %v3061_v3 = vmul.f32 %v4543_v1, %v3045_v51 }
0x1e44   :  { %v4545_v50 = vpop.eup %4544 }
0x1e45   :  { %v3060_v5 = vmul.f32 %v4545_v50, %v3044_v53  ;;  %v3069_v36 = vmul.f32 %v3896_v2, %v3061_v3  ;;  %v3314_v53 = vld [vmem:[%s5389_s5] sm:$0xff] }
0x1e46   :  { %v3908_v3 = vld [vmem:[%s5393_s21] ss:$0 sm:$0xff] }
0x1e47   :  { %v3068_v6 = vmul.f32 %v3896_v2, %v3060_v5  ;;  %v3077_v9 = vadd.f32 %v3897_v4, %v3069_v36 }
0x1e49   :  { %v3076_v10 = vadd.f32 %v3897_v4, %v3068_v6  ;;  %v3092_v12 = vrot.slane %v3077_v9, 6 }
0x1e4b   :  { %v3091_v35 = vrot.slane %v3076_v10, 7 }
0x1e4d   :  { %v5272_v48 = vsel %vm3093_vm11, %v3092_v12, %v3091_v35 }
0x1e4e   :  { %4348 = vmatmul.mubr.msk.f32.vlgmr.msra.gmra.mxu0 %vm344_vm2, %v5272_v48 }
0x1e4f   :  { %4358 = vmatprep.mubr.msk.f32.mxu0 %vm4632_vm10, %v4631_v57  ;;  %4351 = vmatpush3.msra.mxu0 %v3201_v22 }
0x1e50   :  { %4352 = vmatprep.subr.mxu0 %v4631_v57 }
0x1e51   :  { %4353 = vmatpush3.msra.mxu0 %v3200_v23 }
0x1e52   :  { %4354 = vmatprep.subr.mxu0 %v4631_v57 }
0x1e53   :  { %4355 = vmatpush3.msra.mxu0 %v3199_v25 }
0x1e54   :  { %4356 = vmatprep.subr.mxu0 %v4631_v57 }
0x1e55   :  { %4357 = vmatpush3.msra.mxu0 %v3198_v26  ;;  %v4633_v26 = vmov 0  }
0x1e56   :  { %4361 = vmatprep.subr.mxu0 %v4631_v57  ;;  %4457 = vset.pattern.permute.xlu0 %v4633_v26 }
0x1f0e   :  { %v3163_v15 = vpop.f32.mrf.mxu0 }
0x1f0f   :  { %v3164_v16 = vadd.f32 %v3898_v14, %v3163_v15  ;;  %v3509_v14 = vld [vmem:[%s4812_s6 + $0x10] sm:$0xff]  ;;  %v3508_v15 = vld [vmem:[%s4812_s6 + $0x8] sm:$0xff] }
0x1f10   :  { %v4349_v17 = vpop.f32.mrf.mxu0 }
0x1f11   :  { %v3170_v18 = vsel %vm3169_vm12, %v3164_v16, 0.0 }
0x1f12   :  { %3171 = vadd.xlane.f32.xlu0 %v3170_v18 }
0x1f9b   :  { %v3172_v19 = vpop.xlane.xlu0 %3171 }
0x1f9c   :  { %v3173_v20 = vmul.f32 0.03125, %v3172_v19 }
0x1f9e   :  { %v3174_v21 = vsub.f32 %v3164_v16, %v3173_v20  ;;  %v3507_v16 = vld [vmem:[%s4812_s6] sm:$0xff] }
0x1fa0   :  { %v3175_v8 = vmul.f32 %v3174_v21, %v3174_v21 }
0x1fa2   :  { %v3176_v7 = vsel %vm3169_vm12, %v3175_v8, 0.0 }
0x1fa3   :  { %3177 = vadd.xlane.f32.xlu1 %v3176_v7  ;;  %v3911_v7 = vld [vmem:[%s5395_s29] ss:$0 sm:$0xff] }
0x202c   :  { %v3178_v28 = vpop.xlane.xlu1 %3177 }
0x202d   :  { %v3179_v29 = vmul.f32 0.03125, %v3178_v28  ;;  %v3912_v28 = vld [vmem:[%s5396_s3] ss:$0 sm:$0xff] }
0x202f   :  { %v3180_v30 = vadd.f32 1e-05, %v3179_v29 }
0x2031   :  { %4546 = vrsqrt.f32 %v3180_v30 }
0x203e   :  { %v4547_v32 = vpop.eup %4546 }
0x203f   :  { %v3182_v34 = vmul.f32 %v4547_v32, %v3174_v21  ;;  %v3910_v21 = vld [vmem:[%s5394_s25] ss:$0 sm:$0xff] }
0x2041   :  { %v3189_v37 = vmul.f32 %v3900_v13, %v3182_v34  ;;  %v3906_v34 = vld [vmem:[#allocation2] ss:$0 sm:$0xff] }
0x2043   :  { %v3196_v39 = vadd.f32 %v3901_v38, %v3189_v37 }
0x2045   :  { %v3197_v40 = vmax.f32 %v3196_v39, 0.0 }
0x2047   :  { %4359 = vmatmul.mubr.msk.f32.vlgmr.msra.gmra.mxu0 %vm344_vm2, %v3197_v40 }
0x2048   :  { %4365 = vmatprep.mubr.msk.f32.mxu0 %vm4632_vm10, %v4631_v57  ;;  %4362 = vmatpush3.msra.mxu0 %v3315_v52  ;;  %v3915_v52 = vld [vmem:[%s4827_s10] ss:$0 sm:$0xff]  ;;  %s4635_s10 = smov [#allocation3]  }
0x2049   :  { %4363 = vmatprep.subr.mxu0 %v4631_v57  ;;  %s3730_s30 = sshll.u32 %s4635_s10, 4  ;;  %s3731_s30 = int_to_ptr.vmem [resolvable:$true] %s3730_s30 }
0x204a   :  { %4364 = vmatpush3.msra.mxu0 %v3314_v53  ;;  %p4559_p1 = scmp.lt.s32.totalorder %s3731_s30, %s3731_s30 }
0x204b   :  { %4368 = vmatprep.subr.mxu0 %v4631_v57 }
0x2107   :  { %v3278_v33 = vpop.f32.mrf.mxu0 }
0x2108   :  { %v3279_v42 = vadd.f32 %v3902_v41, %v3278_v33 }
0x2109   :  { %v4360_v43 = vpop.f32.mrf.mxu0 }
0x210a   :  { %v3285_v31 = vsel %vm3284_vm13, %v3279_v42, 0.0  ;;  %v3621_v43 = vld [vmem:[%s4832_s16] sm:$0xff] }
0x210b   :  { %3286 = vadd.xlane.f32.xlu0 %v3285_v31 }
0x2194   :  { %v3287_v44 = vpop.xlane.xlu0 %3286 }
0x2195   :  { %v3289_v46 = vmul.f32 0.0625, %v3287_v44 }
0x2197   :  { %v3290_v47 = vsub.f32 %v3279_v42, %v3289_v46  ;;  %v3622_v42 = vld [vmem:[%s4832_s16 + $0x8] sm:$0xff]  ;;  %s4634_s16 = smov 6  }
0x2198   :  { %4391 = vmatpush3.msra.mxu1 %v3622_v42 }
0x2199   :  { %v3291_v49 = vmul.f32 %v3290_v47, %v3290_v47  ;;  %4392 = vmatprep.subr.mxu1 %v4631_v57 }
0x219a   :  { %4393 = vmatpush3.msra.mxu1 %v3621_v43 }
0x219b   :  { %v3292_v51 = vsel %vm3284_vm13, %v3291_v49, 0.0 }
0x219c   :  { %3293 = vadd.xlane.f32.xlu1 %v3292_v51 }
0x2225   :  { %v3294_v54 = vpop.xlane.xlu1 %3293 }
0x2226   :  { %v3295_v55 = vmul.f32 0.0625, %v3294_v54 }
0x2228   :  { %v3296_v45 = vadd.f32 1e-05, %v3295_v55 }
0x222a   :  { %4548 = vrsqrt.f32 %v3296_v45  ;;  %v3916_v45 = vld [vmem:[%s4837_s22] ss:$0 sm:$0xff]  ;;  %s4554_s22 = scalar_lea.vmem %s3731_s30, 32 }
0x222b   :  { %p4555_p0 = scmp.ne.s32.totalorder %s3731_s30, %s4554_s22  ;;  %p4560_p2 = scmp.lt.s32.totalorder %s4554_s22, %s4554_s22 }
0x222d   :  { %p4561_p3 = por %p4560_p2, %p4559_p1 }
0x222f   :  { %p4562_p4 = pnand %p4561_p3, %p4555_p0 }
0x2237   :  { %v4549_v11 = vpop.eup %4548 }
0x2238   :  { %v3298_v58 = vmul.f32 %v4549_v11, %v3290_v47 }
0x223a   :  { %v3305_v60 = vmul.f32 %v3904_v56, %v3298_v58 }
0x223c   :  { %v3312_v61 = vadd.f32 %v3905_v59, %v3305_v60 }
0x223e   :  { %v3313_v62 = vmax.f32 %v3312_v61, 0.0 }
0x2240   :  { %4366 = vmatmul.mubr.msk.f32.vlgmr.msra.gmra.mxu0 %vm577_vm8, %v3313_v62 }
0x2241   :  { %4369 = vmatpush3.msra.mxu0 %v3399_v24  ;;  %4376 = vmatprep.mubr.msk.f32.mxu0 %vm4632_vm10, %v4631_v57 }
0x2242   :  { %4370 = vmatprep.subr.mxu0 %v4631_v57 }
0x2243   :  { %4371 = vmatpush3.msra.mxu0 %v3398_v63 }
0x2244   :  { %4372 = vmatprep.subr.mxu0 %v4631_v57 }
0x2245   :  { %4373 = vmatpush3.msra.mxu0 %v3397_v0 }
0x2246   :  { %4374 = vmatprep.subr.mxu0 %v4631_v57 }
0x2247   :  { %4375 = vmatpush3.msra.mxu0 %v3396_v27 }
0x2248   :  { %4377 = vmatmul.mubr.msk.f32.vlgmr.msra.gmra.mxu0 %vm344_vm2, %v5272_v48  ;;  %4379 = vmatprep.subr.mxu0 %v4631_v57  ;;  %v3510_v48 = vld [vmem:[%s4812_s6 + $0x18] sm:$0xff]  ;;  %s5397_s6 = sld [smem:[#allocation27_spill]] }
0x2249   :  { %4387 = vmatprep.mubr.msk.f32.mxu0 %vm4632_vm10, %v4631_v57  ;;  %4380 = vmatpush3.msra.mxu0 %v3510_v48 }
0x224a   :  { %4381 = vmatprep.subr.mxu0 %v4631_v57 }
0x224b   :  { %4382 = vmatpush3.msra.mxu0 %v3509_v14 }
0x224c   :  { %4383 = vmatprep.subr.mxu0 %v4631_v57 }
0x224d   :  { %4384 = vmatpush3.msra.mxu0 %v3508_v15 }
0x224e   :  { %4385 = vmatprep.subr.mxu0 %v4631_v57  ;;  %v3914_v49 = vld [vmem:[%s5397_s6] ss:$0 sm:$0xff] }
0x224f   :  { %4386 = vmatpush3.msra.mxu0 %v3507_v16 }
0x2300   :  { %v3392_v1 = vpop.f32.mrf.mxu0 }
0x2301   :  { %v3393_v38 = vadd.f32 %v3906_v34, %v3392_v1 }
0x2302   :  { %v4367_v2 = vpop.f32.mrf.mxu0 }
0x2308   :  { %v3473_v50 = vpop.f32.mrf.mxu0 }
0x2309   :  { %v3474_v4 = vadd.f32 %v3908_v3, %v3473_v50 }
0x230a   :  { %v4378_v5 = vpop.f32.mrf.mxu0 }
0x230b   :  { %v3479_v36 = vsel %vm3169_vm12, %v3474_v4, 0.0 }
0x230c   :  { %3480 = vadd.xlane.f32.xlu0 %v3479_v36 }
0x2395   :  { %v3481_v6 = vpop.xlane.xlu0 %3480 }
0x2396   :  { %v3482_v9 = vmul.f32 0.03125, %v3481_v6 }
0x2398   :  { %v3483_v10 = vsub.f32 %v3474_v4, %v3482_v9 }
0x239a   :  { %v3484_v35 = vmul.f32 %v3483_v10, %v3483_v10 }
0x239c   :  { %v3485_v12 = vsel %vm3169_vm12, %v3484_v35, 0.0 }
0x239d   :  { %3486 = vadd.xlane.f32.xlu1 %v3485_v12 }
0x2426   :  { %v3487_v17 = vpop.xlane.xlu1 %3486 }
0x2427   :  { %v3488_v18 = vmul.f32 0.03125, %v3487_v17 }
0x2429   :  { %v3489_v19 = vadd.f32 1e-05, %v3488_v18 }
0x242b   :  { %4550 = vrsqrt.f32 %v3489_v19 }
0x2438   :  { %v4551_v20 = vpop.eup %4550 }
0x2439   :  { %v3491_v8 = vmul.f32 %v4551_v20, %v3483_v10 }
0x243b   :  { %v3498_v22 = vmul.f32 %v3910_v21, %v3491_v8 }
0x243d   :  { %v3505_v23 = vadd.f32 %v3911_v7, %v3498_v22 }
0x243f   :  { %v3506_v25 = vmax.f32 %v3505_v23, 0.0 }
0x2441   :  { %4388 = vmatmul.mubr.msk.f32.vlgmr.msra.gmra.mxu0 %vm344_vm2, %v3506_v25 }
0x2501   :  { %v3587_v29 = vpop.f32.mrf.mxu0 }
0x2502   :  { %v3588_v30 = vadd.f32 %v3912_v28, %v3587_v29 }
0x2503   :  { %v4389_v32 = vpop.f32.mrf.mxu0 }
0x2504   :  { %v3593_v13 = vsel %vm3284_vm13, %v3588_v30, 0.0 }
0x2505   :  { %3594 = vadd.xlane.f32.xlu0 %v3593_v13 }
0x251b   :  { %3705 = vperm.xlu0 %4457, %v3393_v38  }
0x258e   :  { %v3595_v37 = vpop.xlane.xlu0 %3594 }
0x258f   :  { %v3596_v39 = vmul.f32 0.0625, %v3595_v37 }
0x2591   :  { %v3597_v40 = vsub.f32 %v3588_v30, %v3596_v39 }
0x2593   :  { %v3598_v41 = vmul.f32 %v3597_v40, %v3597_v40 }
0x2595   :  { %v3599_v33 = vsel %vm3284_vm13, %v3598_v41, 0.0 }
0x2596   :  { %3600 = vadd.xlane.f32.xlu1 %v3599_v33  ;;  %v3706_v59 = vpop.permute.xlu0 %3705 }
0x261f   :  { %v3601_v31 = vpop.xlane.xlu1 %3600 }
0x2620   :  { %v3602_v44 = vmul.f32 0.0625, %v3601_v31 }
0x2622   :  { %v3603_v46 = vadd.f32 1e-05, %v3602_v44 }
0x2624   :  { %4552 = vrsqrt.f32 %v3603_v46 }
0x2631   :  { %v4553_v47 = vpop.eup %4552 }
0x2632   :  { %v3605_v51 = vmul.f32 %v4553_v47, %v3597_v40 }
0x2634   :  { %v3612_v53 = vmul.f32 %v3914_v49, %v3605_v51 }
0x2636   :  { %v3619_v54 = vadd.f32 %v3915_v52, %v3612_v53 }
0x2638   :  { %v3620_v55 = vmax.f32 %v3619_v54, 0.0 }
0x263a   :  { %4395 = vmatmul.mubr.msk.f32.vlgmr.msra.gmra.mxu1 %vm577_vm8, %v3620_v55 }
0x26fa   :  { %v3699_v11 = vpop.f32.mrf.mxu1 }
0x26fb   :  { %v3700_v56 = vadd.f32 %v3916_v45, %v3699_v11 }
0x26fc   :  { %v4396_v58 = vpop.f32.mrf.mxu1 }
0x26fd   :  { %v3710_v57 = vsel %vm3709_vm14, %v3700_v56, 0.0  ;;  %v3708_v61 = vadd.f32 %v3706_v59, %v3700_v56 }
0x26fe   :  { %3711 = vadd.xlane.f32.xlu1 %v3710_v57 }
0x270f   :  { %3716 = vrot.lane.b32.xlu1 %v3393_v38, %s4634_s16 }
0x2787   :  { %v3712_v60 = vpop.xlane.xlu1 %3711 }
0x2788   :  { %v3714_v62 = vmul.f32 0.16666667, %v3712_v60 }
0x278a   :  { %v3715_v24 = vsub.f32 %v3708_v61, %v3714_v62 }
0x278b   :  { %v3717_v63 = vpop.permute.xlu1 %3716 }
0x278c   :  { %v3720_v0 = vsel %vm3719_vm15, %v3715_v24, %v3717_v63 }
0x278d   :  { %v3722_v27 = vsel %vm3721_vm0, %v3720_v0, 0.0 }
0x278e   :  { %3723 = vst [vmem:[#allocation3] sm:$0x3] %v3722_v27 }
0x278f   :  { %4565 = shalt.err (!%p4562_p4)
}
0x2790   :  { %3733 = dma.vmem_to_hbm [thread:$0]  %s3731_s30, 32, %s4842_s20, [#allocation4]  }
0x2791   :  { %4574 = dma.done.wait [#allocation4], 32  }
0x2792   :  { %4575 = vsyncadd [#allocation4], 4294967264 }
0x2793   :  { %3737 = vsyncpa [#allocation4], 1 }

</bundles_post_ra>
